<compile_context>
chip_gen: v7x
topology: tpu7x:2x2x1
jax: 0.10.0
libtpu: 0.0.40
codegen_flags: <defaults>
</compile_context>

<pallas_src>
import functools
import math

import jax
import jax.numpy as jnp
from jax import lax
from jax.experimental import pallas as pl
from jax.experimental.pallas import tpu as pltpu


# --------------------------------- fused kernel -----------------------------------
def _crnn_fused_kernel(x2d_ref, wih0_ref, whh0_ref, b0_ref,
                       wih1_ref, whh1_ref, b1_ref,
                       fcw_ref, fcb_ref, h0_ref, c0_ref,
                       out_ref, lstm_out_ref, hn_ref, cn_ref, *, T, B, H):
    """x2d_ref: (T*B, F) with row = t*B + b; W_ih packed (Din, 8H) fwd|bwd, W_hh (2, H, 4H)."""
    G = 4 * H

    def cell(gates, c_prev):
        # One full-(B, 4H) sigmoid pass; tanh only on the g-gate slice.
        s_all = jax.nn.sigmoid(gates)
        i = s_all[:, 0 * H:1 * H]
        f = s_all[:, 1 * H:2 * H]
        o = s_all[:, 3 * H:4 * H]
        g = jnp.tanh(gates[:, 2 * H:3 * H])
        c_new = f * c_prev + i * g
        h_new = o * jnp.tanh(c_new)
        return h_new, c_new

    def bidir_layer(xin2d, wih_ref, whh_ref, b_ref, layer):
        """xin2d: (T*B, Din). Returns per-time fwd/bwd hidden-state lists."""
        # Hoisted input projection for BOTH directions in one MXU matmul (+ folded bias),
        # off the serial recurrence path. Fwd/bwd halves are vreg-aligned lane slices.
        xg_all = jnp.dot(xin2d, wih_ref[...],
                         preferred_element_type=jnp.float32) + b_ref[...]
        xg_f = xg_all[:, :G]
        xg_b = xg_all[:, G:]

        whh_f, whh_b = whh_ref[0], whh_ref[1]
        hf, cf = h0_ref[2 * layer + 0], c0_ref[2 * layer + 0]
        hb, cb = h0_ref[2 * layer + 1], c0_ref[2 * layer + 1]
        out_f = [None] * T
        out_b = [None] * T
        for s in range(T):                       # fully unrolled (static T)
            r = T - 1 - s                        # backward direction reads reversed time
            gf = xg_f[s * B:(s + 1) * B, :] + jnp.dot(
                hf, whh_f, preferred_element_type=jnp.float32)
            gb = xg_b[r * B:(r + 1) * B, :] + jnp.dot(
                hb, whh_b, preferred_element_type=jnp.float32)
            hf, cf = cell(gf, cf)
            hb, cb = cell(gb, cb)
            out_f[s] = hf
            out_b[r] = hb
        hn_ref[2 * layer + 0] = hf
        cn_ref[2 * layer + 0] = cf
        hn_ref[2 * layer + 1] = hb
        cn_ref[2 * layer + 1] = cb
        return out_f, out_b

    # ---------------- layer 0 ----------------
    h_f0, h_b0 = bidir_layer(x2d_ref[...], wih0_ref, whh0_ref, b0_ref, 0)
    # TODO(synk): inter-layer LSTM dropout (p=0.6) applies only in training mode; omitted (eval).

    # Layer-1 input, same (T*B, 2H) row ordering (row = t*B + b).
    x1 = jnp.concatenate(
        [jnp.concatenate([h_f0[t], h_b0[t]], axis=1) for t in range(T)], axis=0)

    # ---------------- layer 1 ----------------
    h_f1, h_b1 = bidir_layer(x1, wih1_ref, whh1_ref, b1_ref, 1)

    # -------- batch-first lstm_out + FC/sigmoid/mean head (in-kernel epilogue) --------
    full_t = [jnp.concatenate([h_f1[t], h_b1[t]], axis=1) for t in range(T)]  # (B, 2H) each

    for b in range(B):
        plane_b = jnp.concatenate([full_t[t][b:b + 1, :] for t in range(T)], axis=0)  # (T, 2H)
        lstm_out_ref[b] = plane_b                # dense full-plane store, batch-first layout

    fcw = fcw_ref[...]                           # (1, 2H)
    fcb = fcb_ref[0]                             # scalar from SMEM
    logit_cols = [jnp.sum(full_t[t] * fcw, axis=-1, keepdims=True) + fcb     # (B, 1) each
                  for t in range(T)]
    logits_bt = jnp.concatenate(logit_cols, axis=1)                          # (B, T)
    probs = jax.nn.sigmoid(logits_bt)            # single EUP pass over all (b, t) logits
    out_ref[...] = jnp.mean(probs, axis=-1, keepdims=True)                   # (B, 1)


# ---------------------------------- wrapper ---------------------------------------
def crnn_discriminator_forward(note_seq, state, params):
    """note_seq: (B, T, num_feats) batch_first; state = (h0, c0), each (4, B, H)."""
    h0, c0 = state
    B, T, F = note_seq.shape
    H = h0.shape[-1]

    # Input dropout (p=0.6) is identity in eval mode.
    # Single tiny layout op outside the kernel: (B,T,F) -> (T*B,F) with row = t*B + b so
    # the hoisted x @ W_ih^T projection is one dense MXU matmul per layer.
    x2d = jnp.transpose(note_seq, (1, 0, 2)).reshape(T * B, F)

    vmem = pl.BlockSpec(memory_space=pltpu.MemorySpace.VMEM)
    smem = pl.BlockSpec(memory_space=pltpu.MemorySpace.SMEM)

    out2d, lstm_out, h_n, c_n = pl.pallas_call(
        functools.partial(_crnn_fused_kernel, T=T, B=B, H=H),
        out_shape=(
            jax.ShapeDtypeStruct((B, 1), jnp.float32),
            jax.ShapeDtypeStruct((B, T, 2 * H), jnp.float32),
            jax.ShapeDtypeStruct((4, B, H), jnp.float32),
            jax.ShapeDtypeStruct((4, B, H), jnp.float32),
        ),
        in_specs=[vmem] * 8 + [smem] + [vmem, vmem],
        out_specs=(vmem, vmem, vmem, vmem),
    )(x2d, params["wih0"], params["whh0"], params["b0"],
      params["wih1"], params["whh1"], params["b1"],
      params["fc_w"], params["fc_b"], h0, c0)

    return out2d[:, 0], lstm_out, (h_n, c_n)


# -------------------------- deterministic parameter init ---------------------------
def init_params(key, num_feats, hidden):
    """W_ih pre-transposed & dir-packed (Din, 8H) = [fwd | bwd]; W_hh (2, H, 4H);
    biases pre-summed (b_ih + b_hh) and dir-packed (1, 8H)."""
    H = hidden
    kb = 1.0 / math.sqrt(H)
    keys = iter(jax.random.split(key, 18))

    def u(shape, bound):
        return jax.random.uniform(next(keys), shape, jnp.float32, -bound, bound)

    def layer(din):
        wih = jnp.concatenate([u((din, 4 * H), kb), u((din, 4 * H), kb)], axis=1)   # (din, 8H)
        whh = jnp.stack([u((H, 4 * H), kb), u((H, 4 * H), kb)])                     # (2, H, 4H)
        b = jnp.concatenate([u((4 * H,), kb) + u((4 * H,), kb),
                             u((4 * H,), kb) + u((4 * H,), kb)]).reshape(1, 8 * H)  # (1, 8H)
        return wih, whh, b

    wih0, whh0, b0 = layer(num_feats)
    wih1, whh1, b1 = layer(2 * H)
    kf = 1.0 / math.sqrt(2 * H)
    return {
        "wih0": wih0, "whh0": whh0, "b0": b0,
        "wih1": wih1, "whh1": whh1, "b1": b1,
        "fc_w": u((1, 2 * H), kf),
        "fc_b": u((1,), kf),
    }


# ------------------------------ pure-JAX reference ---------------------------------
def _lstm_dir_ref(x_tm, wih, whh, b, h0, c0):
    Hd = h0.shape[-1]

    def step(carry, x_t):
        h, c = carry
        g = (jnp.dot(x_t, wih, precision=lax.Precision.HIGHEST)
             + jnp.dot(h, whh, precision=lax.Precision.HIGHEST) + b)
        i = jax.nn.sigmoid(g[:, 0:Hd])
        f = jax.nn.sigmoid(g[:, Hd:2 * Hd])
        gg = jnp.tanh(g[:, 2 * Hd:3 * Hd])
        o = jax.nn.sigmoid(g[:, 3 * Hd:4 * Hd])
        c = f * c + i * gg
        h = o * jnp.tanh(c)
        return (h, c), h

    (h, c), hs = lax.scan(step, (h0, c0), x_tm)
    return hs, h, c


def reference_forward(note_seq, state, params):
    h0, c0 = state
    x = jnp.transpose(note_seq, (1, 0, 2))                     # (T, B, F)
    layer_in = x
    hns, cns = [], []
    for layer in range(2):
        wih = params[f"wih{layer}"]                            # (din, 8H)
        whh = params[f"whh{layer}"]                            # (2, H, 4H)
        b = params[f"b{layer}"]                                # (1, 8H)
        G = whh.shape[-1]
        hf, hlf, clf = _lstm_dir_ref(layer_in, wih[:, :G], whh[0], b[:, :G],
                                     h0[2 * layer + 0], c0[2 * layer + 0])
        hb_r, hlb, clb = _lstm_dir_ref(layer_in[::-1], wih[:, G:], whh[1], b[:, G:],
                                       h0[2 * layer + 1], c0[2 * layer + 1])
        hb = hb_r[::-1]
        layer_in = jnp.concatenate([hf, hb], axis=-1)
        hns += [hlf, hlb]
        cns += [clf, clb]
    lstm_out = jnp.transpose(layer_in, (1, 0, 2))              # (B, T, 2H)
    logits = jnp.sum(lstm_out * params["fc_w"], axis=-1) + params["fc_b"][0]
    out = jnp.mean(jax.nn.sigmoid(logits), axis=1)
    return out, lstm_out, (jnp.stack(hns, axis=0), jnp.stack(cns, axis=0))


# ----------------------------------- main ------------------------------------------
if __name__ == "__main__":
    B, T, F, H = 2, 8, 4, 32   # batch, seq, num_feats, hidden_units
    key = jax.random.PRNGKey(0)
    kx, kp = jax.random.split(key)
    note_seq = jax.random.normal(kx, (B, T, F), jnp.float32)
    params = init_params(kp, F, H)
    # init_hidden(): zeros of shape (num_layers * 2, B, H)
    state = (jnp.zeros((4, B, H), jnp.float32), jnp.zeros((4, B, H), jnp.float32))

    fwd = jax.jit(crnn_discriminator_forward)
    out, lstm_out, (h_n, c_n) = fwd(note_seq, state, params)
    jax.block_until_ready((out, lstm_out, h_n, c_n))

    assert out.shape == (B,)
    assert lstm_out.shape == (B, T, 2 * H)
    assert h_n.shape == (4, B, H) and c_n.shape == (4, B, H)
    assert bool(jnp.all(jnp.isfinite(out)))

    # Correctness vs. pure-JAX reference (loose tolerance absorbs MXU/XLA precision diffs).
    out_r, lstm_r, (hn_r, cn_r) = reference_forward(note_seq, state, params)

    def _close(a, b, tol=2e-2):
        return bool(jnp.max(jnp.abs(a - b)) < tol)

    assert _close(out, out_r)
    assert _close(lstm_out, lstm_r)
    assert _close(h_n, hn_r)
    assert _close(c_n, cn_r)

    print("KERNEL_OK")
</pallas_src>

<mosaic_0001>
module attributes {stable_mosaic.version = 11 : i64} {
  func.func @_crnn_fused_kernel(%arg0: memref<16x4xf32, #tpu.memory_space<vmem>>, %arg1: memref<4x256xf32, #tpu.memory_space<vmem>>, %arg2: memref<2x32x128xf32, #tpu.memory_space<vmem>>, %arg3: memref<1x256xf32, #tpu.memory_space<vmem>>, %arg4: memref<64x256xf32, #tpu.memory_space<vmem>>, %arg5: memref<2x32x128xf32, #tpu.memory_space<vmem>>, %arg6: memref<1x256xf32, #tpu.memory_space<vmem>>, %arg7: memref<1x64xf32, #tpu.memory_space<vmem>>, %arg8: memref<1xf32, #tpu.memory_space<smem>>, %arg9: memref<4x2x32xf32, #tpu.memory_space<vmem>>, %arg10: memref<4x2x32xf32, #tpu.memory_space<vmem>>, %arg11: memref<2x1xf32, #tpu.memory_space<vmem>>, %arg12: memref<2x8x64xf32, #tpu.memory_space<vmem>>, %arg13: memref<4x2x32xf32, #tpu.memory_space<vmem>>, %arg14: memref<4x2x32xf32, #tpu.memory_space<vmem>>) attributes {dimension_semantics = [], scalar_prefetch = 0 : i64, scratch_operands = 0 : i64, tpu.core_type = #tpu.core_type<tc>} {
    %c0 = arith.constant 0 : index
    %c0_0 = arith.constant 0 : index
    %0 = vector.load %arg0[%c0, %c0_0] : memref<16x4xf32, #tpu.memory_space<vmem>>, vector<16x4xf32>
    %c0_1 = arith.constant 0 : index
    %c0_2 = arith.constant 0 : index
    %1 = vector.load %arg1[%c0_1, %c0_2] : memref<4x256xf32, #tpu.memory_space<vmem>>, vector<4x256xf32>
    %cst = arith.constant dense<0.000000e+00> : vector<16x256xf32>
    %2 = tpu.matmul %0, %1, %cst {dimension_numbers = #tpu.dot_dimension_numbers<[1], [0], [0], [1], [0, 0, 1, 1], [], []>} : vector<16x4xf32>, vector<4x256xf32>, vector<16x256xf32> -> vector<16x256xf32>
    %c0_3 = arith.constant 0 : index
    %c0_4 = arith.constant 0 : index
    %3 = vector.load %arg3[%c0_3, %c0_4] : memref<1x256xf32, #tpu.memory_space<vmem>>, vector<1x256xf32>
    %4 = vector.broadcast %3 : vector<1x256xf32> to vector<16x256xf32>
    %5 = arith.addf %2, %4 : vector<16x256xf32>
    %6 = vector.extract_strided_slice %5 {offsets = [0, 0], sizes = [16, 128], strides = [1, 1]} : vector<16x256xf32> to vector<16x128xf32>
    %7 = vector.extract_strided_slice %5 {offsets = [0, 128], sizes = [16, 128], strides = [1, 1]} : vector<16x256xf32> to vector<16x128xf32>
    %c0_5 = arith.constant 0 : index
    %c0_6 = arith.constant 0 : index
    %c0_7 = arith.constant 0 : index
    %8 = vector.load %arg2[%c0_5, %c0_6, %c0_7] : memref<2x32x128xf32, #tpu.memory_space<vmem>>, vector<1x32x128xf32>
    %9 = vector.shape_cast %8 : vector<1x32x128xf32> to vector<32x128xf32>
    %c1 = arith.constant 1 : index
    %c0_8 = arith.constant 0 : index
    %c0_9 = arith.constant 0 : index
    %10 = vector.load %arg2[%c1, %c0_8, %c0_9] : memref<2x32x128xf32, #tpu.memory_space<vmem>>, vector<1x32x128xf32>
    %11 = vector.shape_cast %10 : vector<1x32x128xf32> to vector<32x128xf32>
    %c0_10 = arith.constant 0 : index
    %c0_11 = arith.constant 0 : index
    %c0_12 = arith.constant 0 : index
    %12 = vector.load %arg9[%c0_10, %c0_11, %c0_12] : memref<4x2x32xf32, #tpu.memory_space<vmem>>, vector<1x2x32xf32>
    %13 = vector.shape_cast %12 : vector<1x2x32xf32> to vector<2x32xf32>
    %c0_13 = arith.constant 0 : index
    %c0_14 = arith.constant 0 : index
    %c0_15 = arith.constant 0 : index
    %14 = vector.load %arg10[%c0_13, %c0_14, %c0_15] : memref<4x2x32xf32, #tpu.memory_space<vmem>>, vector<1x2x32xf32>
    %15 = vector.shape_cast %14 : vector<1x2x32xf32> to vector<2x32xf32>
    %c1_16 = arith.constant 1 : index
    %c0_17 = arith.constant 0 : index
    %c0_18 = arith.constant 0 : index
    %16 = vector.load %arg9[%c1_16, %c0_17, %c0_18] : memref<4x2x32xf32, #tpu.memory_space<vmem>>, vector<1x2x32xf32>
    %17 = vector.shape_cast %16 : vector<1x2x32xf32> to vector<2x32xf32>
    %c1_19 = arith.constant 1 : index
    %c0_20 = arith.constant 0 : index
    %c0_21 = arith.constant 0 : index
    %18 = vector.load %arg10[%c1_19, %c0_20, %c0_21] : memref<4x2x32xf32, #tpu.memory_space<vmem>>, vector<1x2x32xf32>
    %19 = vector.shape_cast %18 : vector<1x2x32xf32> to vector<2x32xf32>
    %20 = vector.extract_strided_slice %6 {offsets = [0, 0], sizes = [2, 128], strides = [1, 1]} : vector<16x128xf32> to vector<2x128xf32>
    %cst_22 = arith.constant dense<0.000000e+00> : vector<2x128xf32>
    %21 = tpu.matmul %13, %9, %cst_22 {dimension_numbers = #tpu.dot_dimension_numbers<[1], [0], [0], [1], [0, 0, 1, 1], [], []>} : vector<2x32xf32>, vector<32x128xf32>, vector<2x128xf32> -> vector<2x128xf32>
    %22 = arith.addf %20, %21 : vector<2x128xf32>
    %23 = vector.extract_strided_slice %7 {offsets = [14, 0], sizes = [2, 128], strides = [1, 1]} : vector<16x128xf32> to vector<2x128xf32>
    %cst_23 = arith.constant dense<0.000000e+00> : vector<2x128xf32>
    %24 = tpu.matmul %17, %11, %cst_23 {dimension_numbers = #tpu.dot_dimension_numbers<[1], [0], [0], [1], [0, 0, 1, 1], [], []>} : vector<2x32xf32>, vector<32x128xf32>, vector<2x128xf32> -> vector<2x128xf32>
    %25 = arith.addf %23, %24 : vector<2x128xf32>
    %26 = arith.negf %22 : vector<2x128xf32>
    %27 = math.exp %26 : vector<2x128xf32>
    %cst_24 = arith.constant 1.000000e+00 : f32
    %28 = vector.broadcast %cst_24 : f32 to vector<2x128xf32>
    %29 = arith.addf %28, %27 : vector<2x128xf32>
    %30 = arith.divf %28, %29 : vector<2x128xf32>
    %31 = vector.extract_strided_slice %30 {offsets = [0, 0], sizes = [2, 32], strides = [1, 1]} : vector<2x128xf32> to vector<2x32xf32>
    %32 = vector.extract_strided_slice %30 {offsets = [0, 32], sizes = [2, 32], strides = [1, 1]} : vector<2x128xf32> to vector<2x32xf32>
    %33 = vector.extract_strided_slice %30 {offsets = [0, 96], sizes = [2, 32], strides = [1, 1]} : vector<2x128xf32> to vector<2x32xf32>
    %34 = vector.extract_strided_slice %22 {offsets = [0, 64], sizes = [2, 32], strides = [1, 1]} : vector<2x128xf32> to vector<2x32xf32>
    %35 = math.tanh %34 : vector<2x32xf32>
    %36 = arith.mulf %32, %15 : vector<2x32xf32>
    %37 = arith.mulf %31, %35 : vector<2x32xf32>
    %38 = arith.addf %36, %37 : vector<2x32xf32>
    %39 = math.tanh %38 : vector<2x32xf32>
    %40 = arith.mulf %33, %39 : vector<2x32xf32>
    %41 = arith.negf %25 : vector<2x128xf32>
    %42 = math.exp %41 : vector<2x128xf32>
    %cst_25 = arith.constant 1.000000e+00 : f32
    %43 = vector.broadcast %cst_25 : f32 to vector<2x128xf32>
    %44 = arith.addf %43, %42 : vector<2x128xf32>
    %45 = arith.divf %43, %44 : vector<2x128xf32>
    %46 = vector.extract_strided_slice %45 {offsets = [0, 0], sizes = [2, 32], strides = [1, 1]} : vector<2x128xf32> to vector<2x32xf32>
    %47 = vector.extract_strided_slice %45 {offsets = [0, 32], sizes = [2, 32], strides = [1, 1]} : vector<2x128xf32> to vector<2x32xf32>
    %48 = vector.extract_strided_slice %45 {offsets = [0, 96], sizes = [2, 32], strides = [1, 1]} : vector<2x128xf32> to vector<2x32xf32>
    %49 = vector.extract_strided_slice %25 {offsets = [0, 64], sizes = [2, 32], strides = [1, 1]} : vector<2x128xf32> to vector<2x32xf32>
    %50 = math.tanh %49 : vector<2x32xf32>
    %51 = arith.mulf %47, %19 : vector<2x32xf32>
    %52 = arith.mulf %46, %50 : vector<2x32xf32>
    %53 = arith.addf %51, %52 : vector<2x32xf32>
    %54 = math.tanh %53 : vector<2x32xf32>
    %55 = arith.mulf %48, %54 : vector<2x32xf32>
    %56 = vector.extract_strided_slice %6 {offsets = [2, 0], sizes = [2, 128], strides = [1, 1]} : vector<16x128xf32> to vector<2x128xf32>
    %cst_26 = arith.constant dense<0.000000e+00> : vector<2x128xf32>
    %57 = tpu.matmul %40, %9, %cst_26 {dimension_numbers = #tpu.dot_dimension_numbers<[1], [0], [0], [1], [0, 0, 1, 1], [], []>} : vector<2x32xf32>, vector<32x128xf32>, vector<2x128xf32> -> vector<2x128xf32>
    %58 = arith.addf %56, %57 : vector<2x128xf32>
    %59 = vector.extract_strided_slice %7 {offsets = [12, 0], sizes = [2, 128], strides = [1, 1]} : vector<16x128xf32> to vector<2x128xf32>
    %cst_27 = arith.constant dense<0.000000e+00> : vector<2x128xf32>
    %60 = tpu.matmul %55, %11, %cst_27 {dimension_numbers = #tpu.dot_dimension_numbers<[1], [0], [0], [1], [0, 0, 1, 1], [], []>} : vector<2x32xf32>, vector<32x128xf32>, vector<2x128xf32> -> vector<2x128xf32>
    %61 = arith.addf %59, %60 : vector<2x128xf32>
    %62 = arith.negf %58 : vector<2x128xf32>
    %63 = math.exp %62 : vector<2x128xf32>
    %cst_28 = arith.constant 1.000000e+00 : f32
    %64 = vector.broadcast %cst_28 : f32 to vector<2x128xf32>
    %65 = arith.addf %64, %63 : vector<2x128xf32>
    %66 = arith.divf %64, %65 : vector<2x128xf32>
    %67 = vector.extract_strided_slice %66 {offsets = [0, 0], sizes = [2, 32], strides = [1, 1]} : vector<2x128xf32> to vector<2x32xf32>
    %68 = vector.extract_strided_slice %66 {offsets = [0, 32], sizes = [2, 32], strides = [1, 1]} : vector<2x128xf32> to vector<2x32xf32>
    %69 = vector.extract_strided_slice %66 {offsets = [0, 96], sizes = [2, 32], strides = [1, 1]} : vector<2x128xf32> to vector<2x32xf32>
    %70 = vector.extract_strided_slice %58 {offsets = [0, 64], sizes = [2, 32], strides = [1, 1]} : vector<2x128xf32> to vector<2x32xf32>
    %71 = math.tanh %70 : vector<2x32xf32>
    %72 = arith.mulf %68, %38 : vector<2x32xf32>
    %73 = arith.mulf %67, %71 : vector<2x32xf32>
    %74 = arith.addf %72, %73 : vector<2x32xf32>
    %75 = math.tanh %74 : vector<2x32xf32>
    %76 = arith.mulf %69, %75 : vector<2x32xf32>
    %77 = arith.negf %61 : vector<2x128xf32>
    %78 = math.exp %77 : vector<2x128xf32>
    %cst_29 = arith.constant 1.000000e+00 : f32
    %79 = vector.broadcast %cst_29 : f32 to vector<2x128xf32>
    %80 = arith.addf %79, %78 : vector<2x128xf32>
    %81 = arith.divf %79, %80 : vector<2x128xf32>
    %82 = vector.extract_strided_slice %81 {offsets = [0, 0], sizes = [2, 32], strides = [1, 1]} : vector<2x128xf32> to vector<2x32xf32>
    %83 = vector.extract_strided_slice %81 {offsets = [0, 32], sizes = [2, 32], strides = [1, 1]} : vector<2x128xf32> to vector<2x32xf32>
    %84 = vector.extract_strided_slice %81 {offsets = [0, 96], sizes = [2, 32], strides = [1, 1]} : vector<2x128xf32> to vector<2x32xf32>
    %85 = vector.extract_strided_slice %61 {offsets = [0, 64], sizes = [2, 32], strides = [1, 1]} : vector<2x128xf32> to vector<2x32xf32>
    %86 = math.tanh %85 : vector<2x32xf32>
    %87 = arith.mulf %83, %53 : vector<2x32xf32>
    %88 = arith.mulf %82, %86 : vector<2x32xf32>
    %89 = arith.addf %87, %88 : vector<2x32xf32>
    %90 = math.tanh %89 : vector<2x32xf32>
    %91 = arith.mulf %84, %90 : vector<2x32xf32>
    %92 = vector.extract_strided_slice %6 {offsets = [4, 0], sizes = [2, 128], strides = [1, 1]} : vector<16x128xf32> to vector<2x128xf32>
    %cst_30 = arith.constant dense<0.000000e+00> : vector<2x128xf32>
    %93 = tpu.matmul %76, %9, %cst_30 {dimension_numbers = #tpu.dot_dimension_numbers<[1], [0], [0], [1], [0, 0, 1, 1], [], []>} : vector<2x32xf32>, vector<32x128xf32>, vector<2x128xf32> -> vector<2x128xf32>
    %94 = arith.addf %92, %93 : vector<2x128xf32>
    %95 = vector.extract_strided_slice %7 {offsets = [10, 0], sizes = [2, 128], strides = [1, 1]} : vector<16x128xf32> to vector<2x128xf32>
    %cst_31 = arith.constant dense<0.000000e+00> : vector<2x128xf32>
    %96 = tpu.matmul %91, %11, %cst_31 {dimension_numbers = #tpu.dot_dimension_numbers<[1], [0], [0], [1], [0, 0, 1, 1], [], []>} : vector<2x32xf32>, vector<32x128xf32>, vector<2x128xf32> -> vector<2x128xf32>
    %97 = arith.addf %95, %96 : vector<2x128xf32>
    %98 = arith.negf %94 : vector<2x128xf32>
    %99 = math.exp %98 : vector<2x128xf32>
    %cst_32 = arith.constant 1.000000e+00 : f32
    %100 = vector.broadcast %cst_32 : f32 to vector<2x128xf32>
    %101 = arith.addf %100, %99 : vector<2x128xf32>
    %102 = arith.divf %100, %101 : vector<2x128xf32>
    %103 = vector.extract_strided_slice %102 {offsets = [0, 0], sizes = [2, 32], strides = [1, 1]} : vector<2x128xf32> to vector<2x32xf32>
    %104 = vector.extract_strided_slice %102 {offsets = [0, 32], sizes = [2, 32], strides = [1, 1]} : vector<2x128xf32> to vector<2x32xf32>
    %105 = vector.extract_strided_slice %102 {offsets = [0, 96], sizes = [2, 32], strides = [1, 1]} : vector<2x128xf32> to vector<2x32xf32>
    %106 = vector.extract_strided_slice %94 {offsets = [0, 64], sizes = [2, 32], strides = [1, 1]} : vector<2x128xf32> to vector<2x32xf32>
    %107 = math.tanh %106 : vector<2x32xf32>
    %108 = arith.mulf %104, %74 : vector<2x32xf32>
    %109 = arith.mulf %103, %107 : vector<2x32xf32>
    %110 = arith.addf %108, %109 : vector<2x32xf32>
    %111 = math.tanh %110 : vector<2x32xf32>
    %112 = arith.mulf %105, %111 : vector<2x32xf32>
    %113 = arith.negf %97 : vector<2x128xf32>
    %114 = math.exp %113 : vector<2x128xf32>
    %cst_33 = arith.constant 1.000000e+00 : f32
    %115 = vector.broadcast %cst_33 : f32 to vector<2x128xf32>
    %116 = arith.addf %115, %114 : vector<2x128xf32>
    %117 = arith.divf %115, %116 : vector<2x128xf32>
    %118 = vector.extract_strided_slice %117 {offsets = [0, 0], sizes = [2, 32], strides = [1, 1]} : vector<2x128xf32> to vector<2x32xf32>
    %119 = vector.extract_strided_slice %117 {offsets = [0, 32], sizes = [2, 32], strides = [1, 1]} : vector<2x128xf32> to vector<2x32xf32>
    %120 = vector.extract_strided_slice %117 {offsets = [0, 96], sizes = [2, 32], strides = [1, 1]} : vector<2x128xf32> to vector<2x32xf32>
    %121 = vector.extract_strided_slice %97 {offsets = [0, 64], sizes = [2, 32], strides = [1, 1]} : vector<2x128xf32> to vector<2x32xf32>
    %122 = math.tanh %121 : vector<2x32xf32>
    %123 = arith.mulf %119, %89 : vector<2x32xf32>
    %124 = arith.mulf %118, %122 : vector<2x32xf32>
    %125 = arith.addf %123, %124 : vector<2x32xf32>
    %126 = math.tanh %125 : vector<2x32xf32>
    %127 = arith.mulf %120, %126 : vector<2x32xf32>
    %128 = vector.extract_strided_slice %6 {offsets = [6, 0], sizes = [2, 128], strides = [1, 1]} : vector<16x128xf32> to vector<2x128xf32>
    %cst_34 = arith.constant dense<0.000000e+00> : vector<2x128xf32>
    %129 = tpu.matmul %112, %9, %cst_34 {dimension_numbers = #tpu.dot_dimension_numbers<[1], [0], [0], [1], [0, 0, 1, 1], [], []>} : vector<2x32xf32>, vector<32x128xf32>, vector<2x128xf32> -> vector<2x128xf32>
    %130 = arith.addf %128, %129 : vector<2x128xf32>
    %131 = vector.extract_strided_slice %7 {offsets = [8, 0], sizes = [2, 128], strides = [1, 1]} : vector<16x128xf32> to vector<2x128xf32>
    %cst_35 = arith.constant dense<0.000000e+00> : vector<2x128xf32>
    %132 = tpu.matmul %127, %11, %cst_35 {dimension_numbers = #tpu.dot_dimension_numbers<[1], [0], [0], [1], [0, 0, 1, 1], [], []>} : vector<2x32xf32>, vector<32x128xf32>, vector<2x128xf32> -> vector<2x128xf32>
    %133 = arith.addf %131, %132 : vector<2x128xf32>
    %134 = arith.negf %130 : vector<2x128xf32>
    %135 = math.exp %134 : vector<2x128xf32>
    %cst_36 = arith.constant 1.000000e+00 : f32
    %136 = vector.broadcast %cst_36 : f32 to vector<2x128xf32>
    %137 = arith.addf %136, %135 : vector<2x128xf32>
    %138 = arith.divf %136, %137 : vector<2x128xf32>
    %139 = vector.extract_strided_slice %138 {offsets = [0, 0], sizes = [2, 32], strides = [1, 1]} : vector<2x128xf32> to vector<2x32xf32>
    %140 = vector.extract_strided_slice %138 {offsets = [0, 32], sizes = [2, 32], strides = [1, 1]} : vector<2x128xf32> to vector<2x32xf32>
    %141 = vector.extract_strided_slice %138 {offsets = [0, 96], sizes = [2, 32], strides = [1, 1]} : vector<2x128xf32> to vector<2x32xf32>
    %142 = vector.extract_strided_slice %130 {offsets = [0, 64], sizes = [2, 32], strides = [1, 1]} : vector<2x128xf32> to vector<2x32xf32>
    %143 = math.tanh %142 : vector<2x32xf32>
    %144 = arith.mulf %140, %110 : vector<2x32xf32>
    %145 = arith.mulf %139, %143 : vector<2x32xf32>
    %146 = arith.addf %144, %145 : vector<2x32xf32>
    %147 = math.tanh %146 : vector<2x32xf32>
    %148 = arith.mulf %141, %147 : vector<2x32xf32>
    %149 = arith.negf %133 : vector<2x128xf32>
    %150 = math.exp %149 : vector<2x128xf32>
    %cst_37 = arith.constant 1.000000e+00 : f32
    %151 = vector.broadcast %cst_37 : f32 to vector<2x128xf32>
    %152 = arith.addf %151, %150 : vector<2x128xf32>
    %153 = arith.divf %151, %152 : vector<2x128xf32>
    %154 = vector.extract_strided_slice %153 {offsets = [0, 0], sizes = [2, 32], strides = [1, 1]} : vector<2x128xf32> to vector<2x32xf32>
    %155 = vector.extract_strided_slice %153 {offsets = [0, 32], sizes = [2, 32], strides = [1, 1]} : vector<2x128xf32> to vector<2x32xf32>
    %156 = vector.extract_strided_slice %153 {offsets = [0, 96], sizes = [2, 32], strides = [1, 1]} : vector<2x128xf32> to vector<2x32xf32>
    %157 = vector.extract_strided_slice %133 {offsets = [0, 64], sizes = [2, 32], strides = [1, 1]} : vector<2x128xf32> to vector<2x32xf32>
    %158 = math.tanh %157 : vector<2x32xf32>
    %159 = arith.mulf %155, %125 : vector<2x32xf32>
    %160 = arith.mulf %154, %158 : vector<2x32xf32>
    %161 = arith.addf %159, %160 : vector<2x32xf32>
    %162 = math.tanh %161 : vector<2x32xf32>
    %163 = arith.mulf %156, %162 : vector<2x32xf32>
    %164 = vector.extract_strided_slice %6 {offsets = [8, 0], sizes = [2, 128], strides = [1, 1]} : vector<16x128xf32> to vector<2x128xf32>
    %cst_38 = arith.constant dense<0.000000e+00> : vector<2x128xf32>
    %165 = tpu.matmul %148, %9, %cst_38 {dimension_numbers = #tpu.dot_dimension_numbers<[1], [0], [0], [1], [0, 0, 1, 1], [], []>} : vector<2x32xf32>, vector<32x128xf32>, vector<2x128xf32> -> vector<2x128xf32>
    %166 = arith.addf %164, %165 : vector<2x128xf32>
    %167 = vector.extract_strided_slice %7 {offsets = [6, 0], sizes = [2, 128], strides = [1, 1]} : vector<16x128xf32> to vector<2x128xf32>
    %cst_39 = arith.constant dense<0.000000e+00> : vector<2x128xf32>
    %168 = tpu.matmul %163, %11, %cst_39 {dimension_numbers = #tpu.dot_dimension_numbers<[1], [0], [0], [1], [0, 0, 1, 1], [], []>} : vector<2x32xf32>, vector<32x128xf32>, vector<2x128xf32> -> vector<2x128xf32>
    %169 = arith.addf %167, %168 : vector<2x128xf32>
    %170 = arith.negf %166 : vector<2x128xf32>
    %171 = math.exp %170 : vector<2x128xf32>
    %cst_40 = arith.constant 1.000000e+00 : f32
    %172 = vector.broadcast %cst_40 : f32 to vector<2x128xf32>
    %173 = arith.addf %172, %171 : vector<2x128xf32>
    %174 = arith.divf %172, %173 : vector<2x128xf32>
    %175 = vector.extract_strided_slice %174 {offsets = [0, 0], sizes = [2, 32], strides = [1, 1]} : vector<2x128xf32> to vector<2x32xf32>
    %176 = vector.extract_strided_slice %174 {offsets = [0, 32], sizes = [2, 32], strides = [1, 1]} : vector<2x128xf32> to vector<2x32xf32>
    %177 = vector.extract_strided_slice %174 {offsets = [0, 96], sizes = [2, 32], strides = [1, 1]} : vector<2x128xf32> to vector<2x32xf32>
    %178 = vector.extract_strided_slice %166 {offsets = [0, 64], sizes = [2, 32], strides = [1, 1]} : vector<2x128xf32> to vector<2x32xf32>
    %179 = math.tanh %178 : vector<2x32xf32>
    %180 = arith.mulf %176, %146 : vector<2x32xf32>
    %181 = arith.mulf %175, %179 : vector<2x32xf32>
    %182 = arith.addf %180, %181 : vector<2x32xf32>
    %183 = math.tanh %182 : vector<2x32xf32>
    %184 = arith.mulf %177, %183 : vector<2x32xf32>
    %185 = arith.negf %169 : vector<2x128xf32>
    %186 = math.exp %185 : vector<2x128xf32>
    %cst_41 = arith.constant 1.000000e+00 : f32
    %187 = vector.broadcast %cst_41 : f32 to vector<2x128xf32>
    %188 = arith.addf %187, %186 : vector<2x128xf32>
    %189 = arith.divf %187, %188 : vector<2x128xf32>
    %190 = vector.extract_strided_slice %189 {offsets = [0, 0], sizes = [2, 32], strides = [1, 1]} : vector<2x128xf32> to vector<2x32xf32>
    %191 = vector.extract_strided_slice %189 {offsets = [0, 32], sizes = [2, 32], strides = [1, 1]} : vector<2x128xf32> to vector<2x32xf32>
    %192 = vector.extract_strided_slice %189 {offsets = [0, 96], sizes = [2, 32], strides = [1, 1]} : vector<2x128xf32> to vector<2x32xf32>
    %193 = vector.extract_strided_slice %169 {offsets = [0, 64], sizes = [2, 32], strides = [1, 1]} : vector<2x128xf32> to vector<2x32xf32>
    %194 = math.tanh %193 : vector<2x32xf32>
    %195 = arith.mulf %191, %161 : vector<2x32xf32>
    %196 = arith.mulf %190, %194 : vector<2x32xf32>
    %197 = arith.addf %195, %196 : vector<2x32xf32>
    %198 = math.tanh %197 : vector<2x32xf32>
    %199 = arith.mulf %192, %198 : vector<2x32xf32>
    %200 = vector.extract_strided_slice %6 {offsets = [10, 0], sizes = [2, 128], strides = [1, 1]} : vector<16x128xf32> to vector<2x128xf32>
    %cst_42 = arith.constant dense<0.000000e+00> : vector<2x128xf32>
    %201 = tpu.matmul %184, %9, %cst_42 {dimension_numbers = #tpu.dot_dimension_numbers<[1], [0], [0], [1], [0, 0, 1, 1], [], []>} : vector<2x32xf32>, vector<32x128xf32>, vector<2x128xf32> -> vector<2x128xf32>
    %202 = arith.addf %200, %201 : vector<2x128xf32>
    %203 = vector.extract_strided_slice %7 {offsets = [4, 0], sizes = [2, 128], strides = [1, 1]} : vector<16x128xf32> to vector<2x128xf32>
    %cst_43 = arith.constant dense<0.000000e+00> : vector<2x128xf32>
    %204 = tpu.matmul %199, %11, %cst_43 {dimension_numbers = #tpu.dot_dimension_numbers<[1], [0], [0], [1], [0, 0, 1, 1], [], []>} : vector<2x32xf32>, vector<32x128xf32>, vector<2x128xf32> -> vector<2x128xf32>
    %205 = arith.addf %203, %204 : vector<2x128xf32>
    %206 = arith.negf %202 : vector<2x128xf32>
    %207 = math.exp %206 : vector<2x128xf32>
    %cst_44 = arith.constant 1.000000e+00 : f32
    %208 = vector.broadcast %cst_44 : f32 to vector<2x128xf32>
    %209 = arith.addf %208, %207 : vector<2x128xf32>
    %210 = arith.divf %208, %209 : vector<2x128xf32>
    %211 = vector.extract_strided_slice %210 {offsets = [0, 0], sizes = [2, 32], strides = [1, 1]} : vector<2x128xf32> to vector<2x32xf32>
    %212 = vector.extract_strided_slice %210 {offsets = [0, 32], sizes = [2, 32], strides = [1, 1]} : vector<2x128xf32> to vector<2x32xf32>
    %213 = vector.extract_strided_slice %210 {offsets = [0, 96], sizes = [2, 32], strides = [1, 1]} : vector<2x128xf32> to vector<2x32xf32>
    %214 = vector.extract_strided_slice %202 {offsets = [0, 64], sizes = [2, 32], strides = [1, 1]} : vector<2x128xf32> to vector<2x32xf32>
    %215 = math.tanh %214 : vector<2x32xf32>
    %216 = arith.mulf %212, %182 : vector<2x32xf32>
    %217 = arith.mulf %211, %215 : vector<2x32xf32>
    %218 = arith.addf %216, %217 : vector<2x32xf32>
    %219 = math.tanh %218 : vector<2x32xf32>
    %220 = arith.mulf %213, %219 : vector<2x32xf32>
    %221 = arith.negf %205 : vector<2x128xf32>
    %222 = math.exp %221 : vector<2x128xf32>
    %cst_45 = arith.constant 1.000000e+00 : f32
    %223 = vector.broadcast %cst_45 : f32 to vector<2x128xf32>
    %224 = arith.addf %223, %222 : vector<2x128xf32>
    %225 = arith.divf %223, %224 : vector<2x128xf32>
    %226 = vector.extract_strided_slice %225 {offsets = [0, 0], sizes = [2, 32], strides = [1, 1]} : vector<2x128xf32> to vector<2x32xf32>
    %227 = vector.extract_strided_slice %225 {offsets = [0, 32], sizes = [2, 32], strides = [1, 1]} : vector<2x128xf32> to vector<2x32xf32>
    %228 = vector.extract_strided_slice %225 {offsets = [0, 96], sizes = [2, 32], strides = [1, 1]} : vector<2x128xf32> to vector<2x32xf32>
    %229 = vector.extract_strided_slice %205 {offsets = [0, 64], sizes = [2, 32], strides = [1, 1]} : vector<2x128xf32> to vector<2x32xf32>
    %230 = math.tanh %229 : vector<2x32xf32>
    %231 = arith.mulf %227, %197 : vector<2x32xf32>
    %232 = arith.mulf %226, %230 : vector<2x32xf32>
    %233 = arith.addf %231, %232 : vector<2x32xf32>
    %234 = math.tanh %233 : vector<2x32xf32>
    %235 = arith.mulf %228, %234 : vector<2x32xf32>
    %236 = vector.extract_strided_slice %6 {offsets = [12, 0], sizes = [2, 128], strides = [1, 1]} : vector<16x128xf32> to vector<2x128xf32>
    %cst_46 = arith.constant dense<0.000000e+00> : vector<2x128xf32>
    %237 = tpu.matmul %220, %9, %cst_46 {dimension_numbers = #tpu.dot_dimension_numbers<[1], [0], [0], [1], [0, 0, 1, 1], [], []>} : vector<2x32xf32>, vector<32x128xf32>, vector<2x128xf32> -> vector<2x128xf32>
    %238 = arith.addf %236, %237 : vector<2x128xf32>
    %239 = vector.extract_strided_slice %7 {offsets = [2, 0], sizes = [2, 128], strides = [1, 1]} : vector<16x128xf32> to vector<2x128xf32>
    %cst_47 = arith.constant dense<0.000000e+00> : vector<2x128xf32>
    %240 = tpu.matmul %235, %11, %cst_47 {dimension_numbers = #tpu.dot_dimension_numbers<[1], [0], [0], [1], [0, 0, 1, 1], [], []>} : vector<2x32xf32>, vector<32x128xf32>, vector<2x128xf32> -> vector<2x128xf32>
    %241 = arith.addf %239, %240 : vector<2x128xf32>
    %242 = arith.negf %238 : vector<2x128xf32>
    %243 = math.exp %242 : vector<2x128xf32>
    %cst_48 = arith.constant 1.000000e+00 : f32
    %244 = vector.broadcast %cst_48 : f32 to vector<2x128xf32>
    %245 = arith.addf %244, %243 : vector<2x128xf32>
    %246 = arith.divf %244, %245 : vector<2x128xf32>
    %247 = vector.extract_strided_slice %246 {offsets = [0, 0], sizes = [2, 32], strides = [1, 1]} : vector<2x128xf32> to vector<2x32xf32>
    %248 = vector.extract_strided_slice %246 {offsets = [0, 32], sizes = [2, 32], strides = [1, 1]} : vector<2x128xf32> to vector<2x32xf32>
    %249 = vector.extract_strided_slice %246 {offsets = [0, 96], sizes = [2, 32], strides = [1, 1]} : vector<2x128xf32> to vector<2x32xf32>
    %250 = vector.extract_strided_slice %238 {offsets = [0, 64], sizes = [2, 32], strides = [1, 1]} : vector<2x128xf32> to vector<2x32xf32>
    %251 = math.tanh %250 : vector<2x32xf32>
    %252 = arith.mulf %248, %218 : vector<2x32xf32>
    %253 = arith.mulf %247, %251 : vector<2x32xf32>
    %254 = arith.addf %252, %253 : vector<2x32xf32>
    %255 = math.tanh %254 : vector<2x32xf32>
    %256 = arith.mulf %249, %255 : vector<2x32xf32>
    %257 = arith.negf %241 : vector<2x128xf32>
    %258 = math.exp %257 : vector<2x128xf32>
    %cst_49 = arith.constant 1.000000e+00 : f32
    %259 = vector.broadcast %cst_49 : f32 to vector<2x128xf32>
    %260 = arith.addf %259, %258 : vector<2x128xf32>
    %261 = arith.divf %259, %260 : vector<2x128xf32>
    %262 = vector.extract_strided_slice %261 {offsets = [0, 0], sizes = [2, 32], strides = [1, 1]} : vector<2x128xf32> to vector<2x32xf32>
    %263 = vector.extract_strided_slice %261 {offsets = [0, 32], sizes = [2, 32], strides = [1, 1]} : vector<2x128xf32> to vector<2x32xf32>
    %264 = vector.extract_strided_slice %261 {offsets = [0, 96], sizes = [2, 32], strides = [1, 1]} : vector<2x128xf32> to vector<2x32xf32>
    %265 = vector.extract_strided_slice %241 {offsets = [0, 64], sizes = [2, 32], strides = [1, 1]} : vector<2x128xf32> to vector<2x32xf32>
    %266 = math.tanh %265 : vector<2x32xf32>
    %267 = arith.mulf %263, %233 : vector<2x32xf32>
    %268 = arith.mulf %262, %266 : vector<2x32xf32>
    %269 = arith.addf %267, %268 : vector<2x32xf32>
    %270 = math.tanh %269 : vector<2x32xf32>
    %271 = arith.mulf %264, %270 : vector<2x32xf32>
    %272 = vector.extract_strided_slice %6 {offsets = [14, 0], sizes = [2, 128], strides = [1, 1]} : vector<16x128xf32> to vector<2x128xf32>
    %cst_50 = arith.constant dense<0.000000e+00> : vector<2x128xf32>
    %273 = tpu.matmul %256, %9, %cst_50 {dimension_numbers = #tpu.dot_dimension_numbers<[1], [0], [0], [1], [0, 0, 1, 1], [], []>} : vector<2x32xf32>, vector<32x128xf32>, vector<2x128xf32> -> vector<2x128xf32>
    %274 = arith.addf %272, %273 : vector<2x128xf32>
    %275 = vector.extract_strided_slice %7 {offsets = [0, 0], sizes = [2, 128], strides = [1, 1]} : vector<16x128xf32> to vector<2x128xf32>
    %cst_51 = arith.constant dense<0.000000e+00> : vector<2x128xf32>
    %276 = tpu.matmul %271, %11, %cst_51 {dimension_numbers = #tpu.dot_dimension_numbers<[1], [0], [0], [1], [0, 0, 1, 1], [], []>} : vector<2x32xf32>, vector<32x128xf32>, vector<2x128xf32> -> vector<2x128xf32>
    %277 = arith.addf %275, %276 : vector<2x128xf32>
    %278 = arith.negf %274 : vector<2x128xf32>
    %279 = math.exp %278 : vector<2x128xf32>
    %cst_52 = arith.constant 1.000000e+00 : f32
    %280 = vector.broadcast %cst_52 : f32 to vector<2x128xf32>
    %281 = arith.addf %280, %279 : vector<2x128xf32>
    %282 = arith.divf %280, %281 : vector<2x128xf32>
    %283 = vector.extract_strided_slice %282 {offsets = [0, 0], sizes = [2, 32], strides = [1, 1]} : vector<2x128xf32> to vector<2x32xf32>
    %284 = vector.extract_strided_slice %282 {offsets = [0, 32], sizes = [2, 32], strides = [1, 1]} : vector<2x128xf32> to vector<2x32xf32>
    %285 = vector.extract_strided_slice %282 {offsets = [0, 96], sizes = [2, 32], strides = [1, 1]} : vector<2x128xf32> to vector<2x32xf32>
    %286 = vector.extract_strided_slice %274 {offsets = [0, 64], sizes = [2, 32], strides = [1, 1]} : vector<2x128xf32> to vector<2x32xf32>
    %287 = math.tanh %286 : vector<2x32xf32>
    %288 = arith.mulf %284, %254 : vector<2x32xf32>
    %289 = arith.mulf %283, %287 : vector<2x32xf32>
    %290 = arith.addf %288, %289 : vector<2x32xf32>
    %291 = math.tanh %290 : vector<2x32xf32>
    %292 = arith.mulf %285, %291 : vector<2x32xf32>
    %293 = arith.negf %277 : vector<2x128xf32>
    %294 = math.exp %293 : vector<2x128xf32>
    %cst_53 = arith.constant 1.000000e+00 : f32
    %295 = vector.broadcast %cst_53 : f32 to vector<2x128xf32>
    %296 = arith.addf %295, %294 : vector<2x128xf32>
    %297 = arith.divf %295, %296 : vector<2x128xf32>
    %298 = vector.extract_strided_slice %297 {offsets = [0, 0], sizes = [2, 32], strides = [1, 1]} : vector<2x128xf32> to vector<2x32xf32>
    %299 = vector.extract_strided_slice %297 {offsets = [0, 32], sizes = [2, 32], strides = [1, 1]} : vector<2x128xf32> to vector<2x32xf32>
    %300 = vector.extract_strided_slice %297 {offsets = [0, 96], sizes = [2, 32], strides = [1, 1]} : vector<2x128xf32> to vector<2x32xf32>
    %301 = vector.extract_strided_slice %277 {offsets = [0, 64], sizes = [2, 32], strides = [1, 1]} : vector<2x128xf32> to vector<2x32xf32>
    %302 = math.tanh %301 : vector<2x32xf32>
    %303 = arith.mulf %299, %269 : vector<2x32xf32>
    %304 = arith.mulf %298, %302 : vector<2x32xf32>
    %305 = arith.addf %303, %304 : vector<2x32xf32>
    %306 = math.tanh %305 : vector<2x32xf32>
    %307 = arith.mulf %300, %306 : vector<2x32xf32>
    %c0_54 = arith.constant 0 : index
    %c0_55 = arith.constant 0 : index
    %c0_56 = arith.constant 0 : index
    %308 = vector.load %arg13[%c0_54, %c0_55, %c0_56] : memref<4x2x32xf32, #tpu.memory_space<vmem>>, vector<1x2x32xf32>
    %309 = vector.shape_cast %308 : vector<1x2x32xf32> to vector<2x32xf32>
    %310 = vector.shape_cast %292 : vector<2x32xf32> to vector<1x2x32xf32>
    tpu.vector_store %arg13[%c0_54, %c0_55, %c0_56], %310 {strides = array<i32>} : memref<4x2x32xf32, #tpu.memory_space<vmem>>, vector<1x2x32xf32>,
    %c0_57 = arith.constant 0 : index
    %c0_58 = arith.constant 0 : index
    %c0_59 = arith.constant 0 : index
    %311 = vector.load %arg14[%c0_57, %c0_58, %c0_59] : memref<4x2x32xf32, #tpu.memory_space<vmem>>, vector<1x2x32xf32>
    %312 = vector.shape_cast %311 : vector<1x2x32xf32> to vector<2x32xf32>
    %313 = vector.shape_cast %290 : vector<2x32xf32> to vector<1x2x32xf32>
    tpu.vector_store %arg14[%c0_57, %c0_58, %c0_59], %313 {strides = array<i32>} : memref<4x2x32xf32, #tpu.memory_space<vmem>>, vector<1x2x32xf32>,
    %c1_60 = arith.constant 1 : index
    %c0_61 = arith.constant 0 : index
    %c0_62 = arith.constant 0 : index
    %314 = vector.load %arg13[%c1_60, %c0_61, %c0_62] : memref<4x2x32xf32, #tpu.memory_space<vmem>>, vector<1x2x32xf32>
    %315 = vector.shape_cast %314 : vector<1x2x32xf32> to vector<2x32xf32>
    %316 = vector.shape_cast %307 : vector<2x32xf32> to vector<1x2x32xf32>
    tpu.vector_store %arg13[%c1_60, %c0_61, %c0_62], %316 {strides = array<i32>} : memref<4x2x32xf32, #tpu.memory_space<vmem>>, vector<1x2x32xf32>,
    %c1_63 = arith.constant 1 : index
    %c0_64 = arith.constant 0 : index
    %c0_65 = arith.constant 0 : index
    %317 = vector.load %arg14[%c1_63, %c0_64, %c0_65] : memref<4x2x32xf32, #tpu.memory_space<vmem>>, vector<1x2x32xf32>
    %318 = vector.shape_cast %317 : vector<1x2x32xf32> to vector<2x32xf32>
    %319 = vector.shape_cast %305 : vector<2x32xf32> to vector<1x2x32xf32>
    tpu.vector_store %arg14[%c1_63, %c0_64, %c0_65], %319 {strides = array<i32>} : memref<4x2x32xf32, #tpu.memory_space<vmem>>, vector<1x2x32xf32>,
    %320 = tpu.concatenate %40, %307 in 1 : vector<2x32xf32>, vector<2x32xf32> -> vector<2x64xf32>
    %321 = tpu.concatenate %76, %271 in 1 : vector<2x32xf32>, vector<2x32xf32> -> vector<2x64xf32>
    %322 = tpu.concatenate %112, %235 in 1 : vector<2x32xf32>, vector<2x32xf32> -> vector<2x64xf32>
    %323 = tpu.concatenate %148, %199 in 1 : vector<2x32xf32>, vector<2x32xf32> -> vector<2x64xf32>
    %324 = tpu.concatenate %184, %163 in 1 : vector<2x32xf32>, vector<2x32xf32> -> vector<2x64xf32>
    %325 = tpu.concatenate %220, %127 in 1 : vector<2x32xf32>, vector<2x32xf32> -> vector<2x64xf32>
    %326 = tpu.concatenate %256, %91 in 1 : vector<2x32xf32>, vector<2x32xf32> -> vector<2x64xf32>
    %327 = tpu.concatenate %292, %55 in 1 : vector<2x32xf32>, vector<2x32xf32> -> vector<2x64xf32>
    %328 = tpu.concatenate %320, %321, %322, %323, %324, %325, %326, %327 in 0 : vector<2x64xf32>, vector<2x64xf32>, vector<2x64xf32>, vector<2x64xf32>, vector<2x64xf32>, vector<2x64xf32>, vector<2x64xf32>, vector<2x64xf32> -> vector<16x64xf32>
    %c0_66 = arith.constant 0 : index
    %c0_67 = arith.constant 0 : index
    %329 = vector.load %arg4[%c0_66, %c0_67] : memref<64x256xf32, #tpu.memory_space<vmem>>, vector<64x256xf32>
    %cst_68 = arith.constant dense<0.000000e+00> : vector<16x256xf32>
    %330 = tpu.matmul %328, %329, %cst_68 {dimension_numbers = #tpu.dot_dimension_numbers<[1], [0], [0], [1], [0, 0, 1, 1], [], []>} : vector<16x64xf32>, vector<64x256xf32>, vector<16x256xf32> -> vector<16x256xf32>
    %c0_69 = arith.constant 0 : index
    %c0_70 = arith.constant 0 : index
    %331 = vector.load %arg6[%c0_69, %c0_70] : memref<1x256xf32, #tpu.memory_space<vmem>>, vector<1x256xf32>
    %332 = vector.broadcast %331 : vector<1x256xf32> to vector<16x256xf32>
    %333 = arith.addf %330, %332 : vector<16x256xf32>
    %334 = vector.extract_strided_slice %333 {offsets = [0, 0], sizes = [16, 128], strides = [1, 1]} : vector<16x256xf32> to vector<16x128xf32>
    %335 = vector.extract_strided_slice %333 {offsets = [0, 128], sizes = [16, 128], strides = [1, 1]} : vector<16x256xf32> to vector<16x128xf32>
    %c0_71 = arith.constant 0 : index
    %c0_72 = arith.constant 0 : index
    %c0_73 = arith.constant 0 : index
    %336 = vector.load %arg5[%c0_71, %c0_72, %c0_73] : memref<2x32x128xf32, #tpu.memory_space<vmem>>, vector<1x32x128xf32>
    %337 = vector.shape_cast %336 : vector<1x32x128xf32> to vector<32x128xf32>
    %c1_74 = arith.constant 1 : index
    %c0_75 = arith.constant 0 : index
    %c0_76 = arith.constant 0 : index
    %338 = vector.load %arg5[%c1_74, %c0_75, %c0_76] : memref<2x32x128xf32, #tpu.memory_space<vmem>>, vector<1x32x128xf32>
    %339 = vector.shape_cast %338 : vector<1x32x128xf32> to vector<32x128xf32>
    %c2 = arith.constant 2 : index
    %c0_77 = arith.constant 0 : index
    %c0_78 = arith.constant 0 : index
    %340 = vector.load %arg9[%c2, %c0_77, %c0_78] : memref<4x2x32xf32, #tpu.memory_space<vmem>>, vector<1x2x32xf32>
    %341 = vector.shape_cast %340 : vector<1x2x32xf32> to vector<2x32xf32>
    %c2_79 = arith.constant 2 : index
    %c0_80 = arith.constant 0 : index
    %c0_81 = arith.constant 0 : index
    %342 = vector.load %arg10[%c2_79, %c0_80, %c0_81] : memref<4x2x32xf32, #tpu.memory_space<vmem>>, vector<1x2x32xf32>
    %343 = vector.shape_cast %342 : vector<1x2x32xf32> to vector<2x32xf32>
    %c3 = arith.constant 3 : index
    %c0_82 = arith.constant 0 : index
    %c0_83 = arith.constant 0 : index
    %344 = vector.load %arg9[%c3, %c0_82, %c0_83] : memref<4x2x32xf32, #tpu.memory_space<vmem>>, vector<1x2x32xf32>
    %345 = vector.shape_cast %344 : vector<1x2x32xf32> to vector<2x32xf32>
    %c3_84 = arith.constant 3 : index
    %c0_85 = arith.constant 0 : index
    %c0_86 = arith.constant 0 : index
    %346 = vector.load %arg10[%c3_84, %c0_85, %c0_86] : memref<4x2x32xf32, #tpu.memory_space<vmem>>, vector<1x2x32xf32>
    %347 = vector.shape_cast %346 : vector<1x2x32xf32> to vector<2x32xf32>
    %348 = vector.extract_strided_slice %334 {offsets = [0, 0], sizes = [2, 128], strides = [1, 1]} : vector<16x128xf32> to vector<2x128xf32>
    %cst_87 = arith.constant dense<0.000000e+00> : vector<2x128xf32>
    %349 = tpu.matmul %341, %337, %cst_87 {dimension_numbers = #tpu.dot_dimension_numbers<[1], [0], [0], [1], [0, 0, 1, 1], [], []>} : vector<2x32xf32>, vector<32x128xf32>, vector<2x128xf32> -> vector<2x128xf32>
    %350 = arith.addf %348, %349 : vector<2x128xf32>
    %351 = vector.extract_strided_slice %335 {offsets = [14, 0], sizes = [2, 128], strides = [1, 1]} : vector<16x128xf32> to vector<2x128xf32>
    %cst_88 = arith.constant dense<0.000000e+00> : vector<2x128xf32>
    %352 = tpu.matmul %345, %339, %cst_88 {dimension_numbers = #tpu.dot_dimension_numbers<[1], [0], [0], [1], [0, 0, 1, 1], [], []>} : vector<2x32xf32>, vector<32x128xf32>, vector<2x128xf32> -> vector<2x128xf32>
    %353 = arith.addf %351, %352 : vector<2x128xf32>
    %354 = arith.negf %350 : vector<2x128xf32>
    %355 = math.exp %354 : vector<2x128xf32>
    %cst_89 = arith.constant 1.000000e+00 : f32
    %356 = vector.broadcast %cst_89 : f32 to vector<2x128xf32>
    %357 = arith.addf %356, %355 : vector<2x128xf32>
    %358 = arith.divf %356, %357 : vector<2x128xf32>
    %359 = vector.extract_strided_slice %358 {offsets = [0, 0], sizes = [2, 32], strides = [1, 1]} : vector<2x128xf32> to vector<2x32xf32>
    %360 = vector.extract_strided_slice %358 {offsets = [0, 32], sizes = [2, 32], strides = [1, 1]} : vector<2x128xf32> to vector<2x32xf32>
    %361 = vector.extract_strided_slice %358 {offsets = [0, 96], sizes = [2, 32], strides = [1, 1]} : vector<2x128xf32> to vector<2x32xf32>
    %362 = vector.extract_strided_slice %350 {offsets = [0, 64], sizes = [2, 32], strides = [1, 1]} : vector<2x128xf32> to vector<2x32xf32>
    %363 = math.tanh %362 : vector<2x32xf32>
    %364 = arith.mulf %360, %343 : vector<2x32xf32>
    %365 = arith.mulf %359, %363 : vector<2x32xf32>
    %366 = arith.addf %364, %365 : vector<2x32xf32>
    %367 = math.tanh %366 : vector<2x32xf32>
    %368 = arith.mulf %361, %367 : vector<2x32xf32>
    %369 = arith.negf %353 : vector<2x128xf32>
    %370 = math.exp %369 : vector<2x128xf32>
    %cst_90 = arith.constant 1.000000e+00 : f32
    %371 = vector.broadcast %cst_90 : f32 to vector<2x128xf32>
    %372 = arith.addf %371, %370 : vector<2x128xf32>
    %373 = arith.divf %371, %372 : vector<2x128xf32>
    %374 = vector.extract_strided_slice %373 {offsets = [0, 0], sizes = [2, 32], strides = [1, 1]} : vector<2x128xf32> to vector<2x32xf32>
    %375 = vector.extract_strided_slice %373 {offsets = [0, 32], sizes = [2, 32], strides = [1, 1]} : vector<2x128xf32> to vector<2x32xf32>
    %376 = vector.extract_strided_slice %373 {offsets = [0, 96], sizes = [2, 32], strides = [1, 1]} : vector<2x128xf32> to vector<2x32xf32>
    %377 = vector.extract_strided_slice %353 {offsets = [0, 64], sizes = [2, 32], strides = [1, 1]} : vector<2x128xf32> to vector<2x32xf32>
    %378 = math.tanh %377 : vector<2x32xf32>
    %379 = arith.mulf %375, %347 : vector<2x32xf32>
    %380 = arith.mulf %374, %378 : vector<2x32xf32>
    %381 = arith.addf %379, %380 : vector<2x32xf32>
    %382 = math.tanh %381 : vector<2x32xf32>
    %383 = arith.mulf %376, %382 : vector<2x32xf32>
    %384 = vector.extract_strided_slice %334 {offsets = [2, 0], sizes = [2, 128], strides = [1, 1]} : vector<16x128xf32> to vector<2x128xf32>
    %cst_91 = arith.constant dense<0.000000e+00> : vector<2x128xf32>
    %385 = tpu.matmul %368, %337, %cst_91 {dimension_numbers = #tpu.dot_dimension_numbers<[1], [0], [0], [1], [0, 0, 1, 1], [], []>} : vector<2x32xf32>, vector<32x128xf32>, vector<2x128xf32> -> vector<2x128xf32>
    %386 = arith.addf %384, %385 : vector<2x128xf32>
    %387 = vector.extract_strided_slice %335 {offsets = [12, 0], sizes = [2, 128], strides = [1, 1]} : vector<16x128xf32> to vector<2x128xf32>
    %cst_92 = arith.constant dense<0.000000e+00> : vector<2x128xf32>
    %388 = tpu.matmul %383, %339, %cst_92 {dimension_numbers = #tpu.dot_dimension_numbers<[1], [0], [0], [1], [0, 0, 1, 1], [], []>} : vector<2x32xf32>, vector<32x128xf32>, vector<2x128xf32> -> vector<2x128xf32>
    %389 = arith.addf %387, %388 : vector<2x128xf32>
    %390 = arith.negf %386 : vector<2x128xf32>
    %391 = math.exp %390 : vector<2x128xf32>
    %cst_93 = arith.constant 1.000000e+00 : f32
    %392 = vector.broadcast %cst_93 : f32 to vector<2x128xf32>
    %393 = arith.addf %392, %391 : vector<2x128xf32>
    %394 = arith.divf %392, %393 : vector<2x128xf32>
    %395 = vector.extract_strided_slice %394 {offsets = [0, 0], sizes = [2, 32], strides = [1, 1]} : vector<2x128xf32> to vector<2x32xf32>
    %396 = vector.extract_strided_slice %394 {offsets = [0, 32], sizes = [2, 32], strides = [1, 1]} : vector<2x128xf32> to vector<2x32xf32>
    %397 = vector.extract_strided_slice %394 {offsets = [0, 96], sizes = [2, 32], strides = [1, 1]} : vector<2x128xf32> to vector<2x32xf32>
    %398 = vector.extract_strided_slice %386 {offsets = [0, 64], sizes = [2, 32], strides = [1, 1]} : vector<2x128xf32> to vector<2x32xf32>
    %399 = math.tanh %398 : vector<2x32xf32>
    %400 = arith.mulf %396, %366 : vector<2x32xf32>
    %401 = arith.mulf %395, %399 : vector<2x32xf32>
    %402 = arith.addf %400, %401 : vector<2x32xf32>
    %403 = math.tanh %402 : vector<2x32xf32>
    %404 = arith.mulf %397, %403 : vector<2x32xf32>
    %405 = arith.negf %389 : vector<2x128xf32>
    %406 = math.exp %405 : vector<2x128xf32>
    %cst_94 = arith.constant 1.000000e+00 : f32
    %407 = vector.broadcast %cst_94 : f32 to vector<2x128xf32>
    %408 = arith.addf %407, %406 : vector<2x128xf32>
    %409 = arith.divf %407, %408 : vector<2x128xf32>
    %410 = vector.extract_strided_slice %409 {offsets = [0, 0], sizes = [2, 32], strides = [1, 1]} : vector<2x128xf32> to vector<2x32xf32>
    %411 = vector.extract_strided_slice %409 {offsets = [0, 32], sizes = [2, 32], strides = [1, 1]} : vector<2x128xf32> to vector<2x32xf32>
    %412 = vector.extract_strided_slice %409 {offsets = [0, 96], sizes = [2, 32], strides = [1, 1]} : vector<2x128xf32> to vector<2x32xf32>
    %413 = vector.extract_strided_slice %389 {offsets = [0, 64], sizes = [2, 32], strides = [1, 1]} : vector<2x128xf32> to vector<2x32xf32>
    %414 = math.tanh %413 : vector<2x32xf32>
    %415 = arith.mulf %411, %381 : vector<2x32xf32>
    %416 = arith.mulf %410, %414 : vector<2x32xf32>
    %417 = arith.addf %415, %416 : vector<2x32xf32>
    %418 = math.tanh %417 : vector<2x32xf32>
    %419 = arith.mulf %412, %418 : vector<2x32xf32>
    %420 = vector.extract_strided_slice %334 {offsets = [4, 0], sizes = [2, 128], strides = [1, 1]} : vector<16x128xf32> to vector<2x128xf32>
    %cst_95 = arith.constant dense<0.000000e+00> : vector<2x128xf32>
    %421 = tpu.matmul %404, %337, %cst_95 {dimension_numbers = #tpu.dot_dimension_numbers<[1], [0], [0], [1], [0, 0, 1, 1], [], []>} : vector<2x32xf32>, vector<32x128xf32>, vector<2x128xf32> -> vector<2x128xf32>
    %422 = arith.addf %420, %421 : vector<2x128xf32>
    %423 = vector.extract_strided_slice %335 {offsets = [10, 0], sizes = [2, 128], strides = [1, 1]} : vector<16x128xf32> to vector<2x128xf32>
    %cst_96 = arith.constant dense<0.000000e+00> : vector<2x128xf32>
    %424 = tpu.matmul %419, %339, %cst_96 {dimension_numbers = #tpu.dot_dimension_numbers<[1], [0], [0], [1], [0, 0, 1, 1], [], []>} : vector<2x32xf32>, vector<32x128xf32>, vector<2x128xf32> -> vector<2x128xf32>
    %425 = arith.addf %423, %424 : vector<2x128xf32>
    %426 = arith.negf %422 : vector<2x128xf32>
    %427 = math.exp %426 : vector<2x128xf32>
    %cst_97 = arith.constant 1.000000e+00 : f32
    %428 = vector.broadcast %cst_97 : f32 to vector<2x128xf32>
    %429 = arith.addf %428, %427 : vector<2x128xf32>
    %430 = arith.divf %428, %429 : vector<2x128xf32>
    %431 = vector.extract_strided_slice %430 {offsets = [0, 0], sizes = [2, 32], strides = [1, 1]} : vector<2x128xf32> to vector<2x32xf32>
    %432 = vector.extract_strided_slice %430 {offsets = [0, 32], sizes = [2, 32], strides = [1, 1]} : vector<2x128xf32> to vector<2x32xf32>
    %433 = vector.extract_strided_slice %430 {offsets = [0, 96], sizes = [2, 32], strides = [1, 1]} : vector<2x128xf32> to vector<2x32xf32>
    %434 = vector.extract_strided_slice %422 {offsets = [0, 64], sizes = [2, 32], strides = [1, 1]} : vector<2x128xf32> to vector<2x32xf32>
    %435 = math.tanh %434 : vector<2x32xf32>
    %436 = arith.mulf %432, %402 : vector<2x32xf32>
    %437 = arith.mulf %431, %435 : vector<2x32xf32>
    %438 = arith.addf %436, %437 : vector<2x32xf32>
    %439 = math.tanh %438 : vector<2x32xf32>
    %440 = arith.mulf %433, %439 : vector<2x32xf32>
    %441 = arith.negf %425 : vector<2x128xf32>
    %442 = math.exp %441 : vector<2x128xf32>
    %cst_98 = arith.constant 1.000000e+00 : f32
    %443 = vector.broadcast %cst_98 : f32 to vector<2x128xf32>
    %444 = arith.addf %443, %442 : vector<2x128xf32>
    %445 = arith.divf %443, %444 : vector<2x128xf32>
    %446 = vector.extract_strided_slice %445 {offsets = [0, 0], sizes = [2, 32], strides = [1, 1]} : vector<2x128xf32> to vector<2x32xf32>
    %447 = vector.extract_strided_slice %445 {offsets = [0, 32], sizes = [2, 32], strides = [1, 1]} : vector<2x128xf32> to vector<2x32xf32>
    %448 = vector.extract_strided_slice %445 {offsets = [0, 96], sizes = [2, 32], strides = [1, 1]} : vector<2x128xf32> to vector<2x32xf32>
    %449 = vector.extract_strided_slice %425 {offsets = [0, 64], sizes = [2, 32], strides = [1, 1]} : vector<2x128xf32> to vector<2x32xf32>
    %450 = math.tanh %449 : vector<2x32xf32>
    %451 = arith.mulf %447, %417 : vector<2x32xf32>
    %452 = arith.mulf %446, %450 : vector<2x32xf32>
    %453 = arith.addf %451, %452 : vector<2x32xf32>
    %454 = math.tanh %453 : vector<2x32xf32>
    %455 = arith.mulf %448, %454 : vector<2x32xf32>
    %456 = vector.extract_strided_slice %334 {offsets = [6, 0], sizes = [2, 128], strides = [1, 1]} : vector<16x128xf32> to vector<2x128xf32>
    %cst_99 = arith.constant dense<0.000000e+00> : vector<2x128xf32>
    %457 = tpu.matmul %440, %337, %cst_99 {dimension_numbers = #tpu.dot_dimension_numbers<[1], [0], [0], [1], [0, 0, 1, 1], [], []>} : vector<2x32xf32>, vector<32x128xf32>, vector<2x128xf32> -> vector<2x128xf32>
    %458 = arith.addf %456, %457 : vector<2x128xf32>
    %459 = vector.extract_strided_slice %335 {offsets = [8, 0], sizes = [2, 128], strides = [1, 1]} : vector<16x128xf32> to vector<2x128xf32>
    %cst_100 = arith.constant dense<0.000000e+00> : vector<2x128xf32>
    %460 = tpu.matmul %455, %339, %cst_100 {dimension_numbers = #tpu.dot_dimension_numbers<[1], [0], [0], [1], [0, 0, 1, 1], [], []>} : vector<2x32xf32>, vector<32x128xf32>, vector<2x128xf32> -> vector<2x128xf32>
    %461 = arith.addf %459, %460 : vector<2x128xf32>
    %462 = arith.negf %458 : vector<2x128xf32>
    %463 = math.exp %462 : vector<2x128xf32>
    %cst_101 = arith.constant 1.000000e+00 : f32
    %464 = vector.broadcast %cst_101 : f32 to vector<2x128xf32>
    %465 = arith.addf %464, %463 : vector<2x128xf32>
    %466 = arith.divf %464, %465 : vector<2x128xf32>
    %467 = vector.extract_strided_slice %466 {offsets = [0, 0], sizes = [2, 32], strides = [1, 1]} : vector<2x128xf32> to vector<2x32xf32>
    %468 = vector.extract_strided_slice %466 {offsets = [0, 32], sizes = [2, 32], strides = [1, 1]} : vector<2x128xf32> to vector<2x32xf32>
    %469 = vector.extract_strided_slice %466 {offsets = [0, 96], sizes = [2, 32], strides = [1, 1]} : vector<2x128xf32> to vector<2x32xf32>
    %470 = vector.extract_strided_slice %458 {offsets = [0, 64], sizes = [2, 32], strides = [1, 1]} : vector<2x128xf32> to vector<2x32xf32>
    %471 = math.tanh %470 : vector<2x32xf32>
    %472 = arith.mulf %468, %438 : vector<2x32xf32>
    %473 = arith.mulf %467, %471 : vector<2x32xf32>
    %474 = arith.addf %472, %473 : vector<2x32xf32>
    %475 = math.tanh %474 : vector<2x32xf32>
    %476 = arith.mulf %469, %475 : vector<2x32xf32>
    %477 = arith.negf %461 : vector<2x128xf32>
    %478 = math.exp %477 : vector<2x128xf32>
    %cst_102 = arith.constant 1.000000e+00 : f32
    %479 = vector.broadcast %cst_102 : f32 to vector<2x128xf32>
    %480 = arith.addf %479, %478 : vector<2x128xf32>
    %481 = arith.divf %479, %480 : vector<2x128xf32>
    %482 = vector.extract_strided_slice %481 {offsets = [0, 0], sizes = [2, 32], strides = [1, 1]} : vector<2x128xf32> to vector<2x32xf32>
    %483 = vector.extract_strided_slice %481 {offsets = [0, 32], sizes = [2, 32], strides = [1, 1]} : vector<2x128xf32> to vector<2x32xf32>
    %484 = vector.extract_strided_slice %481 {offsets = [0, 96], sizes = [2, 32], strides = [1, 1]} : vector<2x128xf32> to vector<2x32xf32>
    %485 = vector.extract_strided_slice %461 {offsets = [0, 64], sizes = [2, 32], strides = [1, 1]} : vector<2x128xf32> to vector<2x32xf32>
    %486 = math.tanh %485 : vector<2x32xf32>
    %487 = arith.mulf %483, %453 : vector<2x32xf32>
    %488 = arith.mulf %482, %486 : vector<2x32xf32>
    %489 = arith.addf %487, %488 : vector<2x32xf32>
    %490 = math.tanh %489 : vector<2x32xf32>
    %491 = arith.mulf %484, %490 : vector<2x32xf32>
    %492 = vector.extract_strided_slice %334 {offsets = [8, 0], sizes = [2, 128], strides = [1, 1]} : vector<16x128xf32> to vector<2x128xf32>
    %cst_103 = arith.constant dense<0.000000e+00> : vector<2x128xf32>
    %493 = tpu.matmul %476, %337, %cst_103 {dimension_numbers = #tpu.dot_dimension_numbers<[1], [0], [0], [1], [0, 0, 1, 1], [], []>} : vector<2x32xf32>, vector<32x128xf32>, vector<2x128xf32> -> vector<2x128xf32>
    %494 = arith.addf %492, %493 : vector<2x128xf32>
    %495 = vector.extract_strided_slice %335 {offsets = [6, 0], sizes = [2, 128], strides = [1, 1]} : vector<16x128xf32> to vector<2x128xf32>
    %cst_104 = arith.constant dense<0.000000e+00> : vector<2x128xf32>
    %496 = tpu.matmul %491, %339, %cst_104 {dimension_numbers = #tpu.dot_dimension_numbers<[1], [0], [0], [1], [0, 0, 1, 1], [], []>} : vector<2x32xf32>, vector<32x128xf32>, vector<2x128xf32> -> vector<2x128xf32>
    %497 = arith.addf %495, %496 : vector<2x128xf32>
    %498 = arith.negf %494 : vector<2x128xf32>
    %499 = math.exp %498 : vector<2x128xf32>
    %cst_105 = arith.constant 1.000000e+00 : f32
    %500 = vector.broadcast %cst_105 : f32 to vector<2x128xf32>
    %501 = arith.addf %500, %499 : vector<2x128xf32>
    %502 = arith.divf %500, %501 : vector<2x128xf32>
    %503 = vector.extract_strided_slice %502 {offsets = [0, 0], sizes = [2, 32], strides = [1, 1]} : vector<2x128xf32> to vector<2x32xf32>
    %504 = vector.extract_strided_slice %502 {offsets = [0, 32], sizes = [2, 32], strides = [1, 1]} : vector<2x128xf32> to vector<2x32xf32>
    %505 = vector.extract_strided_slice %502 {offsets = [0, 96], sizes = [2, 32], strides = [1, 1]} : vector<2x128xf32> to vector<2x32xf32>
    %506 = vector.extract_strided_slice %494 {offsets = [0, 64], sizes = [2, 32], strides = [1, 1]} : vector<2x128xf32> to vector<2x32xf32>
    %507 = math.tanh %506 : vector<2x32xf32>
    %508 = arith.mulf %504, %474 : vector<2x32xf32>
    %509 = arith.mulf %503, %507 : vector<2x32xf32>
    %510 = arith.addf %508, %509 : vector<2x32xf32>
    %511 = math.tanh %510 : vector<2x32xf32>
    %512 = arith.mulf %505, %511 : vector<2x32xf32>
    %513 = arith.negf %497 : vector<2x128xf32>
    %514 = math.exp %513 : vector<2x128xf32>
    %cst_106 = arith.constant 1.000000e+00 : f32
    %515 = vector.broadcast %cst_106 : f32 to vector<2x128xf32>
    %516 = arith.addf %515, %514 : vector<2x128xf32>
    %517 = arith.divf %515, %516 : vector<2x128xf32>
    %518 = vector.extract_strided_slice %517 {offsets = [0, 0], sizes = [2, 32], strides = [1, 1]} : vector<2x128xf32> to vector<2x32xf32>
    %519 = vector.extract_strided_slice %517 {offsets = [0, 32], sizes = [2, 32], strides = [1, 1]} : vector<2x128xf32> to vector<2x32xf32>
    %520 = vector.extract_strided_slice %517 {offsets = [0, 96], sizes = [2, 32], strides = [1, 1]} : vector<2x128xf32> to vector<2x32xf32>
    %521 = vector.extract_strided_slice %497 {offsets = [0, 64], sizes = [2, 32], strides = [1, 1]} : vector<2x128xf32> to vector<2x32xf32>
    %522 = math.tanh %521 : vector<2x32xf32>
    %523 = arith.mulf %519, %489 : vector<2x32xf32>
    %524 = arith.mulf %518, %522 : vector<2x32xf32>
    %525 = arith.addf %523, %524 : vector<2x32xf32>
    %526 = math.tanh %525 : vector<2x32xf32>
    %527 = arith.mulf %520, %526 : vector<2x32xf32>
    %528 = vector.extract_strided_slice %334 {offsets = [10, 0], sizes = [2, 128], strides = [1, 1]} : vector<16x128xf32> to vector<2x128xf32>
    %cst_107 = arith.constant dense<0.000000e+00> : vector<2x128xf32>
    %529 = tpu.matmul %512, %337, %cst_107 {dimension_numbers = #tpu.dot_dimension_numbers<[1], [0], [0], [1], [0, 0, 1, 1], [], []>} : vector<2x32xf32>, vector<32x128xf32>, vector<2x128xf32> -> vector<2x128xf32>
    %530 = arith.addf %528, %529 : vector<2x128xf32>
    %531 = vector.extract_strided_slice %335 {offsets = [4, 0], sizes = [2, 128], strides = [1, 1]} : vector<16x128xf32> to vector<2x128xf32>
    %cst_108 = arith.constant dense<0.000000e+00> : vector<2x128xf32>
    %532 = tpu.matmul %527, %339, %cst_108 {dimension_numbers = #tpu.dot_dimension_numbers<[1], [0], [0], [1], [0, 0, 1, 1], [], []>} : vector<2x32xf32>, vector<32x128xf32>, vector<2x128xf32> -> vector<2x128xf32>
    %533 = arith.addf %531, %532 : vector<2x128xf32>
    %534 = arith.negf %530 : vector<2x128xf32>
    %535 = math.exp %534 : vector<2x128xf32>
    %cst_109 = arith.constant 1.000000e+00 : f32
    %536 = vector.broadcast %cst_109 : f32 to vector<2x128xf32>
    %537 = arith.addf %536, %535 : vector<2x128xf32>
    %538 = arith.divf %536, %537 : vector<2x128xf32>
    %539 = vector.extract_strided_slice %538 {offsets = [0, 0], sizes = [2, 32], strides = [1, 1]} : vector<2x128xf32> to vector<2x32xf32>
    %540 = vector.extract_strided_slice %538 {offsets = [0, 32], sizes = [2, 32], strides = [1, 1]} : vector<2x128xf32> to vector<2x32xf32>
    %541 = vector.extract_strided_slice %538 {offsets = [0, 96], sizes = [2, 32], strides = [1, 1]} : vector<2x128xf32> to vector<2x32xf32>
    %542 = vector.extract_strided_slice %530 {offsets = [0, 64], sizes = [2, 32], strides = [1, 1]} : vector<2x128xf32> to vector<2x32xf32>
    %543 = math.tanh %542 : vector<2x32xf32>
    %544 = arith.mulf %540, %510 : vector<2x32xf32>
    %545 = arith.mulf %539, %543 : vector<2x32xf32>
    %546 = arith.addf %544, %545 : vector<2x32xf32>
    %547 = math.tanh %546 : vector<2x32xf32>
    %548 = arith.mulf %541, %547 : vector<2x32xf32>
    %549 = arith.negf %533 : vector<2x128xf32>
    %550 = math.exp %549 : vector<2x128xf32>
    %cst_110 = arith.constant 1.000000e+00 : f32
    %551 = vector.broadcast %cst_110 : f32 to vector<2x128xf32>
    %552 = arith.addf %551, %550 : vector<2x128xf32>
    %553 = arith.divf %551, %552 : vector<2x128xf32>
    %554 = vector.extract_strided_slice %553 {offsets = [0, 0], sizes = [2, 32], strides = [1, 1]} : vector<2x128xf32> to vector<2x32xf32>
    %555 = vector.extract_strided_slice %553 {offsets = [0, 32], sizes = [2, 32], strides = [1, 1]} : vector<2x128xf32> to vector<2x32xf32>
    %556 = vector.extract_strided_slice %553 {offsets = [0, 96], sizes = [2, 32], strides = [1, 1]} : vector<2x128xf32> to vector<2x32xf32>
    %557 = vector.extract_strided_slice %533 {offsets = [0, 64], sizes = [2, 32], strides = [1, 1]} : vector<2x128xf32> to vector<2x32xf32>
    %558 = math.tanh %557 : vector<2x32xf32>
    %559 = arith.mulf %555, %525 : vector<2x32xf32>
    %560 = arith.mulf %554, %558 : vector<2x32xf32>
    %561 = arith.addf %559, %560 : vector<2x32xf32>
    %562 = math.tanh %561 : vector<2x32xf32>
    %563 = arith.mulf %556, %562 : vector<2x32xf32>
    %564 = vector.extract_strided_slice %334 {offsets = [12, 0], sizes = [2, 128], strides = [1, 1]} : vector<16x128xf32> to vector<2x128xf32>
    %cst_111 = arith.constant dense<0.000000e+00> : vector<2x128xf32>
    %565 = tpu.matmul %548, %337, %cst_111 {dimension_numbers = #tpu.dot_dimension_numbers<[1], [0], [0], [1], [0, 0, 1, 1], [], []>} : vector<2x32xf32>, vector<32x128xf32>, vector<2x128xf32> -> vector<2x128xf32>
    %566 = arith.addf %564, %565 : vector<2x128xf32>
    %567 = vector.extract_strided_slice %335 {offsets = [2, 0], sizes = [2, 128], strides = [1, 1]} : vector<16x128xf32> to vector<2x128xf32>
    %cst_112 = arith.constant dense<0.000000e+00> : vector<2x128xf32>
    %568 = tpu.matmul %563, %339, %cst_112 {dimension_numbers = #tpu.dot_dimension_numbers<[1], [0], [0], [1], [0, 0, 1, 1], [], []>} : vector<2x32xf32>, vector<32x128xf32>, vector<2x128xf32> -> vector<2x128xf32>
    %569 = arith.addf %567, %568 : vector<2x128xf32>
    %570 = arith.negf %566 : vector<2x128xf32>
    %571 = math.exp %570 : vector<2x128xf32>
    %cst_113 = arith.constant 1.000000e+00 : f32
    %572 = vector.broadcast %cst_113 : f32 to vector<2x128xf32>
    %573 = arith.addf %572, %571 : vector<2x128xf32>
    %574 = arith.divf %572, %573 : vector<2x128xf32>
    %575 = vector.extract_strided_slice %574 {offsets = [0, 0], sizes = [2, 32], strides = [1, 1]} : vector<2x128xf32> to vector<2x32xf32>
    %576 = vector.extract_strided_slice %574 {offsets = [0, 32], sizes = [2, 32], strides = [1, 1]} : vector<2x128xf32> to vector<2x32xf32>
    %577 = vector.extract_strided_slice %574 {offsets = [0, 96], sizes = [2, 32], strides = [1, 1]} : vector<2x128xf32> to vector<2x32xf32>
    %578 = vector.extract_strided_slice %566 {offsets = [0, 64], sizes = [2, 32], strides = [1, 1]} : vector<2x128xf32> to vector<2x32xf32>
    %579 = math.tanh %578 : vector<2x32xf32>
    %580 = arith.mulf %576, %546 : vector<2x32xf32>
    %581 = arith.mulf %575, %579 : vector<2x32xf32>
    %582 = arith.addf %580, %581 : vector<2x32xf32>
    %583 = math.tanh %582 : vector<2x32xf32>
    %584 = arith.mulf %577, %583 : vector<2x32xf32>
    %585 = arith.negf %569 : vector<2x128xf32>
    %586 = math.exp %585 : vector<2x128xf32>
    %cst_114 = arith.constant 1.000000e+00 : f32
    %587 = vector.broadcast %cst_114 : f32 to vector<2x128xf32>
    %588 = arith.addf %587, %586 : vector<2x128xf32>
    %589 = arith.divf %587, %588 : vector<2x128xf32>
    %590 = vector.extract_strided_slice %589 {offsets = [0, 0], sizes = [2, 32], strides = [1, 1]} : vector<2x128xf32> to vector<2x32xf32>
    %591 = vector.extract_strided_slice %589 {offsets = [0, 32], sizes = [2, 32], strides = [1, 1]} : vector<2x128xf32> to vector<2x32xf32>
    %592 = vector.extract_strided_slice %589 {offsets = [0, 96], sizes = [2, 32], strides = [1, 1]} : vector<2x128xf32> to vector<2x32xf32>
    %593 = vector.extract_strided_slice %569 {offsets = [0, 64], sizes = [2, 32], strides = [1, 1]} : vector<2x128xf32> to vector<2x32xf32>
    %594 = math.tanh %593 : vector<2x32xf32>
    %595 = arith.mulf %591, %561 : vector<2x32xf32>
    %596 = arith.mulf %590, %594 : vector<2x32xf32>
    %597 = arith.addf %595, %596 : vector<2x32xf32>
    %598 = math.tanh %597 : vector<2x32xf32>
    %599 = arith.mulf %592, %598 : vector<2x32xf32>
    %600 = vector.extract_strided_slice %334 {offsets = [14, 0], sizes = [2, 128], strides = [1, 1]} : vector<16x128xf32> to vector<2x128xf32>
    %cst_115 = arith.constant dense<0.000000e+00> : vector<2x128xf32>
    %601 = tpu.matmul %584, %337, %cst_115 {dimension_numbers = #tpu.dot_dimension_numbers<[1], [0], [0], [1], [0, 0, 1, 1], [], []>} : vector<2x32xf32>, vector<32x128xf32>, vector<2x128xf32> -> vector<2x128xf32>
    %602 = arith.addf %600, %601 : vector<2x128xf32>
    %603 = vector.extract_strided_slice %335 {offsets = [0, 0], sizes = [2, 128], strides = [1, 1]} : vector<16x128xf32> to vector<2x128xf32>
    %cst_116 = arith.constant dense<0.000000e+00> : vector<2x128xf32>
    %604 = tpu.matmul %599, %339, %cst_116 {dimension_numbers = #tpu.dot_dimension_numbers<[1], [0], [0], [1], [0, 0, 1, 1], [], []>} : vector<2x32xf32>, vector<32x128xf32>, vector<2x128xf32> -> vector<2x128xf32>
    %605 = arith.addf %603, %604 : vector<2x128xf32>
    %606 = arith.negf %602 : vector<2x128xf32>
    %607 = math.exp %606 : vector<2x128xf32>
    %cst_117 = arith.constant 1.000000e+00 : f32
    %608 = vector.broadcast %cst_117 : f32 to vector<2x128xf32>
    %609 = arith.addf %608, %607 : vector<2x128xf32>
    %610 = arith.divf %608, %609 : vector<2x128xf32>
    %611 = vector.extract_strided_slice %610 {offsets = [0, 0], sizes = [2, 32], strides = [1, 1]} : vector<2x128xf32> to vector<2x32xf32>
    %612 = vector.extract_strided_slice %610 {offsets = [0, 32], sizes = [2, 32], strides = [1, 1]} : vector<2x128xf32> to vector<2x32xf32>
    %613 = vector.extract_strided_slice %610 {offsets = [0, 96], sizes = [2, 32], strides = [1, 1]} : vector<2x128xf32> to vector<2x32xf32>
    %614 = vector.extract_strided_slice %602 {offsets = [0, 64], sizes = [2, 32], strides = [1, 1]} : vector<2x128xf32> to vector<2x32xf32>
    %615 = math.tanh %614 : vector<2x32xf32>
    %616 = arith.mulf %612, %582 : vector<2x32xf32>
    %617 = arith.mulf %611, %615 : vector<2x32xf32>
    %618 = arith.addf %616, %617 : vector<2x32xf32>
    %619 = math.tanh %618 : vector<2x32xf32>
    %620 = arith.mulf %613, %619 : vector<2x32xf32>
    %621 = arith.negf %605 : vector<2x128xf32>
    %622 = math.exp %621 : vector<2x128xf32>
    %cst_118 = arith.constant 1.000000e+00 : f32
    %623 = vector.broadcast %cst_118 : f32 to vector<2x128xf32>
    %624 = arith.addf %623, %622 : vector<2x128xf32>
    %625 = arith.divf %623, %624 : vector<2x128xf32>
    %626 = vector.extract_strided_slice %625 {offsets = [0, 0], sizes = [2, 32], strides = [1, 1]} : vector<2x128xf32> to vector<2x32xf32>
    %627 = vector.extract_strided_slice %625 {offsets = [0, 32], sizes = [2, 32], strides = [1, 1]} : vector<2x128xf32> to vector<2x32xf32>
    %628 = vector.extract_strided_slice %625 {offsets = [0, 96], sizes = [2, 32], strides = [1, 1]} : vector<2x128xf32> to vector<2x32xf32>
    %629 = vector.extract_strided_slice %605 {offsets = [0, 64], sizes = [2, 32], strides = [1, 1]} : vector<2x128xf32> to vector<2x32xf32>
    %630 = math.tanh %629 : vector<2x32xf32>
    %631 = arith.mulf %627, %597 : vector<2x32xf32>
    %632 = arith.mulf %626, %630 : vector<2x32xf32>
    %633 = arith.addf %631, %632 : vector<2x32xf32>
    %634 = math.tanh %633 : vector<2x32xf32>
    %635 = arith.mulf %628, %634 : vector<2x32xf32>
    %c2_119 = arith.constant 2 : index
    %c0_120 = arith.constant 0 : index
    %c0_121 = arith.constant 0 : index
    %636 = vector.load %arg13[%c2_119, %c0_120, %c0_121] : memref<4x2x32xf32, #tpu.memory_space<vmem>>, vector<1x2x32xf32>
    %637 = vector.shape_cast %636 : vector<1x2x32xf32> to vector<2x32xf32>
    %638 = vector.shape_cast %620 : vector<2x32xf32> to vector<1x2x32xf32>
    tpu.vector_store %arg13[%c2_119, %c0_120, %c0_121], %638 {strides = array<i32>} : memref<4x2x32xf32, #tpu.memory_space<vmem>>, vector<1x2x32xf32>,
    %c2_122 = arith.constant 2 : index
    %c0_123 = arith.constant 0 : index
    %c0_124 = arith.constant 0 : index
    %639 = vector.load %arg14[%c2_122, %c0_123, %c0_124] : memref<4x2x32xf32, #tpu.memory_space<vmem>>, vector<1x2x32xf32>
    %640 = vector.shape_cast %639 : vector<1x2x32xf32> to vector<2x32xf32>
    %641 = vector.shape_cast %618 : vector<2x32xf32> to vector<1x2x32xf32>
    tpu.vector_store %arg14[%c2_122, %c0_123, %c0_124], %641 {strides = array<i32>} : memref<4x2x32xf32, #tpu.memory_space<vmem>>, vector<1x2x32xf32>,
    %c3_125 = arith.constant 3 : index
    %c0_126 = arith.constant 0 : index
    %c0_127 = arith.constant 0 : index
    %642 = vector.load %arg13[%c3_125, %c0_126, %c0_127] : memref<4x2x32xf32, #tpu.memory_space<vmem>>, vector<1x2x32xf32>
    %643 = vector.shape_cast %642 : vector<1x2x32xf32> to vector<2x32xf32>
    %644 = vector.shape_cast %635 : vector<2x32xf32> to vector<1x2x32xf32>
    tpu.vector_store %arg13[%c3_125, %c0_126, %c0_127], %644 {strides = array<i32>} : memref<4x2x32xf32, #tpu.memory_space<vmem>>, vector<1x2x32xf32>,
    %c3_128 = arith.constant 3 : index
    %c0_129 = arith.constant 0 : index
    %c0_130 = arith.constant 0 : index
    %645 = vector.load %arg14[%c3_128, %c0_129, %c0_130] : memref<4x2x32xf32, #tpu.memory_space<vmem>>, vector<1x2x32xf32>
    %646 = vector.shape_cast %645 : vector<1x2x32xf32> to vector<2x32xf32>
    %647 = vector.shape_cast %633 : vector<2x32xf32> to vector<1x2x32xf32>
    tpu.vector_store %arg14[%c3_128, %c0_129, %c0_130], %647 {strides = array<i32>} : memref<4x2x32xf32, #tpu.memory_space<vmem>>, vector<1x2x32xf32>,
    %648 = tpu.concatenate %368, %635 in 1 : vector<2x32xf32>, vector<2x32xf32> -> vector<2x64xf32>
    %649 = tpu.concatenate %404, %599 in 1 : vector<2x32xf32>, vector<2x32xf32> -> vector<2x64xf32>
    %650 = tpu.concatenate %440, %563 in 1 : vector<2x32xf32>, vector<2x32xf32> -> vector<2x64xf32>
    %651 = tpu.concatenate %476, %527 in 1 : vector<2x32xf32>, vector<2x32xf32> -> vector<2x64xf32>
    %652 = tpu.concatenate %512, %491 in 1 : vector<2x32xf32>, vector<2x32xf32> -> vector<2x64xf32>
    %653 = tpu.concatenate %548, %455 in 1 : vector<2x32xf32>, vector<2x32xf32> -> vector<2x64xf32>
    %654 = tpu.concatenate %584, %419 in 1 : vector<2x32xf32>, vector<2x32xf32> -> vector<2x64xf32>
    %655 = tpu.concatenate %620, %383 in 1 : vector<2x32xf32>, vector<2x32xf32> -> vector<2x64xf32>
    %656 = vector.extract_strided_slice %648 {offsets = [0, 0], sizes = [1, 64], strides = [1, 1]} : vector<2x64xf32> to vector<1x64xf32>
    %657 = vector.extract_strided_slice %649 {offsets = [0, 0], sizes = [1, 64], strides = [1, 1]} : vector<2x64xf32> to vector<1x64xf32>
    %658 = vector.extract_strided_slice %650 {offsets = [0, 0], sizes = [1, 64], strides = [1, 1]} : vector<2x64xf32> to vector<1x64xf32>
    %659 = vector.extract_strided_slice %651 {offsets = [0, 0], sizes = [1, 64], strides = [1, 1]} : vector<2x64xf32> to vector<1x64xf32>
    %660 = vector.extract_strided_slice %652 {offsets = [0, 0], sizes = [1, 64], strides = [1, 1]} : vector<2x64xf32> to vector<1x64xf32>
    %661 = vector.extract_strided_slice %653 {offsets = [0, 0], sizes = [1, 64], strides = [1, 1]} : vector<2x64xf32> to vector<1x64xf32>
    %662 = vector.extract_strided_slice %654 {offsets = [0, 0], sizes = [1, 64], strides = [1, 1]} : vector<2x64xf32> to vector<1x64xf32>
    %663 = vector.extract_strided_slice %655 {offsets = [0, 0], sizes = [1, 64], strides = [1, 1]} : vector<2x64xf32> to vector<1x64xf32>
    %664 = tpu.concatenate %656, %657, %658, %659, %660, %661, %662, %663 in 0 : vector<1x64xf32>, vector<1x64xf32>, vector<1x64xf32>, vector<1x64xf32>, vector<1x64xf32>, vector<1x64xf32>, vector<1x64xf32>, vector<1x64xf32> -> vector<8x64xf32>
    %c0_131 = arith.constant 0 : index
    %c0_132 = arith.constant 0 : index
    %c0_133 = arith.constant 0 : index
    %665 = vector.load %arg12[%c0_131, %c0_132, %c0_133] : memref<2x8x64xf32, #tpu.memory_space<vmem>>, vector<1x8x64xf32>
    %666 = vector.shape_cast %665 : vector<1x8x64xf32> to vector<8x64xf32>
    %667 = vector.shape_cast %664 : vector<8x64xf32> to vector<1x8x64xf32>
    tpu.vector_store %arg12[%c0_131, %c0_132, %c0_133], %667 {strides = array<i32>} : memref<2x8x64xf32, #tpu.memory_space<vmem>>, vector<1x8x64xf32>,
    %668 = vector.extract_strided_slice %648 {offsets = [1, 0], sizes = [1, 64], strides = [1, 1]} : vector<2x64xf32> to vector<1x64xf32>
    %669 = vector.extract_strided_slice %649 {offsets = [1, 0], sizes = [1, 64], strides = [1, 1]} : vector<2x64xf32> to vector<1x64xf32>
    %670 = vector.extract_strided_slice %650 {offsets = [1, 0], sizes = [1, 64], strides = [1, 1]} : vector<2x64xf32> to vector<1x64xf32>
    %671 = vector.extract_strided_slice %651 {offsets = [1, 0], sizes = [1, 64], strides = [1, 1]} : vector<2x64xf32> to vector<1x64xf32>
    %672 = vector.extract_strided_slice %652 {offsets = [1, 0], sizes = [1, 64], strides = [1, 1]} : vector<2x64xf32> to vector<1x64xf32>
    %673 = vector.extract_strided_slice %653 {offsets = [1, 0], sizes = [1, 64], strides = [1, 1]} : vector<2x64xf32> to vector<1x64xf32>
    %674 = vector.extract_strided_slice %654 {offsets = [1, 0], sizes = [1, 64], strides = [1, 1]} : vector<2x64xf32> to vector<1x64xf32>
    %675 = vector.extract_strided_slice %655 {offsets = [1, 0], sizes = [1, 64], strides = [1, 1]} : vector<2x64xf32> to vector<1x64xf32>
    %676 = tpu.concatenate %668, %669, %670, %671, %672, %673, %674, %675 in 0 : vector<1x64xf32>, vector<1x64xf32>, vector<1x64xf32>, vector<1x64xf32>, vector<1x64xf32>, vector<1x64xf32>, vector<1x64xf32>, vector<1x64xf32> -> vector<8x64xf32>
    %c1_134 = arith.constant 1 : index
    %c0_135 = arith.constant 0 : index
    %c0_136 = arith.constant 0 : index
    %677 = vector.load %arg12[%c1_134, %c0_135, %c0_136] : memref<2x8x64xf32, #tpu.memory_space<vmem>>, vector<1x8x64xf32>
    %678 = vector.shape_cast %677 : vector<1x8x64xf32> to vector<8x64xf32>
    %679 = vector.shape_cast %676 : vector<8x64xf32> to vector<1x8x64xf32>
    tpu.vector_store %arg12[%c1_134, %c0_135, %c0_136], %679 {strides = array<i32>} : memref<2x8x64xf32, #tpu.memory_space<vmem>>, vector<1x8x64xf32>,
    %c0_137 = arith.constant 0 : index
    %c0_138 = arith.constant 0 : index
    %680 = vector.load %arg7[%c0_137, %c0_138] : memref<1x64xf32, #tpu.memory_space<vmem>>, vector<1x64xf32>
    %c0_139 = arith.constant 0 : index
    %681 = memref.load %arg8[%c0_139] : memref<1xf32, #tpu.memory_space<smem>>
    %682 = vector.broadcast %680 : vector<1x64xf32> to vector<2x64xf32>
    %683 = arith.mulf %648, %682 : vector<2x64xf32>
    %cst_140 = arith.constant dense<0.000000e+00> : vector<2xf32>
    %684 = vector.multi_reduction <add>, %683, %cst_140 [1] : vector<2x64xf32> to vector<2xf32>
    %685 = vector.shape_cast %684 : vector<2xf32> to vector<2x1xf32>
    %686 = vector.broadcast %681 : f32 to vector<2x1xf32>
    %687 = arith.addf %685, %686 : vector<2x1xf32>
    %688 = vector.broadcast %680 : vector<1x64xf32> to vector<2x64xf32>
    %689 = arith.mulf %649, %688 : vector<2x64xf32>
    %cst_141 = arith.constant dense<0.000000e+00> : vector<2xf32>
    %690 = vector.multi_reduction <add>, %689, %cst_141 [1] : vector<2x64xf32> to vector<2xf32>
    %691 = vector.shape_cast %690 : vector<2xf32> to vector<2x1xf32>
    %692 = vector.broadcast %681 : f32 to vector<2x1xf32>
    %693 = arith.addf %691, %692 : vector<2x1xf32>
    %694 = vector.broadcast %680 : vector<1x64xf32> to vector<2x64xf32>
    %695 = arith.mulf %650, %694 : vector<2x64xf32>
    %cst_142 = arith.constant dense<0.000000e+00> : vector<2xf32>
    %696 = vector.multi_reduction <add>, %695, %cst_142 [1] : vector<2x64xf32> to vector<2xf32>
    %697 = vector.shape_cast %696 : vector<2xf32> to vector<2x1xf32>
    %698 = vector.broadcast %681 : f32 to vector<2x1xf32>
    %699 = arith.addf %697, %698 : vector<2x1xf32>
    %700 = vector.broadcast %680 : vector<1x64xf32> to vector<2x64xf32>
    %701 = arith.mulf %651, %700 : vector<2x64xf32>
    %cst_143 = arith.constant dense<0.000000e+00> : vector<2xf32>
    %702 = vector.multi_reduction <add>, %701, %cst_143 [1] : vector<2x64xf32> to vector<2xf32>
    %703 = vector.shape_cast %702 : vector<2xf32> to vector<2x1xf32>
    %704 = vector.broadcast %681 : f32 to vector<2x1xf32>
    %705 = arith.addf %703, %704 : vector<2x1xf32>
    %706 = vector.broadcast %680 : vector<1x64xf32> to vector<2x64xf32>
    %707 = arith.mulf %652, %706 : vector<2x64xf32>
    %cst_144 = arith.constant dense<0.000000e+00> : vector<2xf32>
    %708 = vector.multi_reduction <add>, %707, %cst_144 [1] : vector<2x64xf32> to vector<2xf32>
    %709 = vector.shape_cast %708 : vector<2xf32> to vector<2x1xf32>
    %710 = vector.broadcast %681 : f32 to vector<2x1xf32>
    %711 = arith.addf %709, %710 : vector<2x1xf32>
    %712 = vector.broadcast %680 : vector<1x64xf32> to vector<2x64xf32>
    %713 = arith.mulf %653, %712 : vector<2x64xf32>
    %cst_145 = arith.constant dense<0.000000e+00> : vector<2xf32>
    %714 = vector.multi_reduction <add>, %713, %cst_145 [1] : vector<2x64xf32> to vector<2xf32>
    %715 = vector.shape_cast %714 : vector<2xf32> to vector<2x1xf32>
    %716 = vector.broadcast %681 : f32 to vector<2x1xf32>
    %717 = arith.addf %715, %716 : vector<2x1xf32>
    %718 = vector.broadcast %680 : vector<1x64xf32> to vector<2x64xf32>
    %719 = arith.mulf %654, %718 : vector<2x64xf32>
    %cst_146 = arith.constant dense<0.000000e+00> : vector<2xf32>
    %720 = vector.multi_reduction <add>, %719, %cst_146 [1] : vector<2x64xf32> to vector<2xf32>
    %721 = vector.shape_cast %720 : vector<2xf32> to vector<2x1xf32>
    %722 = vector.broadcast %681 : f32 to vector<2x1xf32>
    %723 = arith.addf %721, %722 : vector<2x1xf32>
    %724 = vector.broadcast %680 : vector<1x64xf32> to vector<2x64xf32>
    %725 = arith.mulf %655, %724 : vector<2x64xf32>
    %cst_147 = arith.constant dense<0.000000e+00> : vector<2xf32>
    %726 = vector.multi_reduction <add>, %725, %cst_147 [1] : vector<2x64xf32> to vector<2xf32>
    %727 = vector.shape_cast %726 : vector<2xf32> to vector<2x1xf32>
    %728 = vector.broadcast %681 : f32 to vector<2x1xf32>
    %729 = arith.addf %727, %728 : vector<2x1xf32>
    %730 = tpu.concatenate %687, %693, %699, %705, %711, %717, %723, %729 in 1 : vector<2x1xf32>, vector<2x1xf32>, vector<2x1xf32>, vector<2x1xf32>, vector<2x1xf32>, vector<2x1xf32>, vector<2x1xf32>, vector<2x1xf32> -> vector<2x8xf32>
    %731 = arith.negf %730 : vector<2x8xf32>
    %732 = math.exp %731 : vector<2x8xf32>
    %cst_148 = arith.constant 1.000000e+00 : f32
    %733 = vector.broadcast %cst_148 : f32 to vector<2x8xf32>
    %734 = arith.addf %733, %732 : vector<2x8xf32>
    %735 = arith.divf %733, %734 : vector<2x8xf32>
    %cst_149 = arith.constant dense<0.000000e+00> : vector<2xf32>
    %736 = vector.multi_reduction <add>, %735, %cst_149 [1] : vector<2x8xf32> to vector<2xf32>
    %737 = vector.shape_cast %736 : vector<2xf32> to vector<2x1xf32>
    %cst_150 = arith.constant 8.000000e+00 : f32
    %738 = vector.broadcast %cst_150 : f32 to vector<2x1xf32>
    %739 = arith.divf %737, %738 : vector<2x1xf32>
    %c0_151 = arith.constant 0 : index
    %c0_152 = arith.constant 0 : index
    %740 = vector.load %arg11[%c0_151, %c0_152] : memref<2x1xf32, #tpu.memory_space<vmem>>, vector<2x1xf32>
    tpu.vector_store %arg11[%c0_151, %c0_152], %739 {strides = array<i32>} : memref<2x1xf32, #tpu.memory_space<vmem>>, vector<2x1xf32>,
    return
  }
}

</mosaic_0001>

<bundles_post_ra>
// kernel: crnn_discriminator_forward.1
= control target key start
LH: loop header
LB: loop body
LE: loop exit
PB: predicated region body
PF: predicated region fallthrough
CT: control target
= control target key end

     0   :  { %21 = vsyncpa [#allocation4], 0  ;;  %s6301_s0 = inlined_call_operand.vmem [shape: f32[16,4], index: 0, kind: input, shape index: {}]   ;;  %s6302_s1 = inlined_call_operand.vmem [shape: f32[4,256], index: 1, kind: input, shape index: {}]   ;;  %s6303_s2 = inlined_call_operand.hbm [shape: f32[2,32,128], index: 2, kind: input, shape index: {}]   ;;  %s6304_s3 = inlined_call_operand.vmem [shape: f32[1,256], index: 3, kind: input, shape index: {}]   ;;  %s6305_s4 = inlined_call_operand.hbm [shape: f32[64,256], index: 4, kind: input, shape index: {}]   ;;  %s6306_s5 = inlined_call_operand.hbm [shape: f32[2,32,128], index: 5, kind: input, shape index: {}]   ;;  %s6307_s6 = inlined_call_operand.vmem [shape: f32[1,256], index: 6, kind: input, shape index: {}]   ;;  %s6308_s7 = inlined_call_operand.vmem [shape: f32[1,64], index: 7, kind: input, shape index: {}]   ;;  %s6309_s8 = inlined_call_operand.<no memory space> [shape: f32[1], index: 8, kind: input, shape index: {}]   ;;  %s6310_s9 = inlined_call_operand.vmem [shape: f32[4,2,32], index: 9, kind: input, shape index: {}]   ;;  %s6311_s10 = inlined_call_operand.vmem [shape: f32[4,2,32], index: 10, kind: input, shape index: {}]   ;;  %s6312_s11 = inlined_call_operand.vmem [shape: f32[2,1], index: 11, kind: output, shape index: {0}]   ;;  %s6313_s12 = inlined_call_operand.hbm [shape: f32[2,8,64], index: 12, kind: output, shape index: {1}]   ;;  %s6314_s13 = inlined_call_operand.hbm [shape: f32[4,2,32], index: 13, kind: output, shape index: {2}]   ;;  %s6315_s14 = inlined_call_operand.hbm [shape: f32[4,2,32], index: 14, kind: output, shape index: {3}]  }
   0x1   :  { %22 = vsyncpa [#allocation7], 0 }
   0x2   :  { %23 = vsyncpa [#allocation5], 0 }
   0x3   :  { %24 = vsyncpa [#allocation11], 0  ;;  %s5303_s29 = smov [#allocation6]   ;;  %s5163_s17 = scalar_lea.hbm %s6305_s4, 2048 }
   0x4   :  { %s48_s30 = sshll.u32 %s5303_s29, 4  ;;  %p5164_p0 = scmp.ne.s32.totalorder %s6305_s4, %s5163_s17  ;;  %s49_s30 = int_to_ptr.vmem [resolvable:$true] %s48_s30 }
   0x5   :  { %p5167_p1 = scmp.lt.u32.totalorder %s5163_s17, %s6305_s4 }
   0x7   :  { %p5169_p2 = pnand %p5167_p1, %p5164_p0 }
   0x9   :  { %5172 = shalt.err (!%p5169_p2)
}
   0xa   :  { %s5173_s22 = scalar_lea.vmem %s49_s30, 2048  ;;  %p5178_p4 = scmp.lt.s32.totalorder %s49_s30, %s49_s30 }
   0xb   :  { %p5174_p3 = scmp.ne.s32.totalorder %s49_s30, %s5173_s22  ;;  %p5179_p5 = scmp.lt.s32.totalorder %s5173_s22, %s5173_s22 }
   0xd   :  { %p5180_p6 = por %p5179_p5, %p5178_p4 }
   0xf   :  { %p5181_p7 = pnand %p5180_p6, %p5174_p3 }
  0x11   :  { %5184 = shalt.err (!%p5181_p7)
}
  0x12   :  { %s5304_s23 = smov 256   ;;  %s5305_s24 = smov 16  }
  0x13   :  { %54 = dma.hbm_to_vmem [thread:$0]  %s6305_s4, 2048, %s49_s30, [#allocation7], %s5304_s23, %s5304_s23, %s5305_s24  }
  0x14   :  { %s5306_s27 = smov [#allocation3]   ;;  %s5185_s16 = scalar_lea.hbm %s6303_s2, 1024 }
  0x15   :  { %s34_s28 = sshll.u32 %s5306_s27, 4  ;;  %p5186_p8 = scmp.ne.s32.totalorder %s6303_s2, %s5185_s16  ;;  %s35_s28 = int_to_ptr.vmem [resolvable:$true] %s34_s28 }
  0x16   :  { %p5189_p9 = scmp.lt.u32.totalorder %s5185_s16, %s6303_s2 }
  0x18   :  { %p5191_p10 = pnand %p5189_p9, %p5186_p8 }
  0x1a   :  { %5194 = shalt.err (!%p5191_p10)
}
  0x1b   :  { %s5195_s21 = scalar_lea.vmem %s35_s28, 1024  ;;  %p5200_p12 = scmp.lt.s32.totalorder %s35_s28, %s35_s28 }
  0x1c   :  { %p5196_p11 = scmp.ne.s32.totalorder %s35_s28, %s5195_s21  ;;  %p5201_p13 = scmp.lt.s32.totalorder %s5195_s21, %s5195_s21 }
  0x1e   :  { %p5202_p0 = por %p5201_p13, %p5200_p12 }
  0x20   :  { %p5203_p1 = pnand %p5202_p0, %p5196_p11 }
  0x22   :  { %5206 = shalt.err (!%p5203_p1)
}
  0x23   :  { %s5307_s4 = smov 128   ;;  %s5308_s30 = smov 8  }
  0x24   :  { %40 = dma.hbm_to_vmem [thread:$0]  %s6303_s2, 1024, %s35_s28, [#allocation4], %s5307_s4, %s5307_s4, %s5308_s30  }
  0x25   :  { %s5309_s24 = smov [#allocation8]   ;;  %s5207_s29 = scalar_lea.hbm %s6306_s5, 1024 }
  0x26   :  { %s60_s25 = sshll.u32 %s5309_s24, 4  ;;  %p5208_p2 = scmp.ne.s32.totalorder %s6306_s5, %s5207_s29  ;;  %s61_s25 = int_to_ptr.vmem [resolvable:$true] %s60_s25 }
  0x27   :  { %p5211_p3 = scmp.lt.u32.totalorder %s5207_s29, %s6306_s5 }
  0x29   :  { %p5213_p4 = pnand %p5211_p3, %p5208_p2 }
  0x2b   :  { %5216 = shalt.err (!%p5213_p4)
}
  0x2c   :  { %s5217_s19 = scalar_lea.vmem %s61_s25, 1024  ;;  %p5222_p6 = scmp.lt.s32.totalorder %s61_s25, %s61_s25 }
  0x2d   :  { %p5218_p5 = scmp.ne.s32.totalorder %s61_s25, %s5217_s19  ;;  %p5223_p7 = scmp.lt.s32.totalorder %s5217_s19, %s5217_s19 }
  0x2f   :  { %p5224_p8 = por %p5223_p7, %p5222_p6 }
  0x31   :  { %p5225_p9 = pnand %p5224_p8, %p5218_p5 }
  0x33   :  { %5228 = shalt.err (!%p5225_p9)
}
  0x34   :  { %66 = dma.hbm_to_vmem [thread:$0]  %s6306_s5, 1024, %s61_s25, [#allocation7], %s5307_s4, %s5307_s4, %s5308_s30  }
  0x35   :  { %5295 = dma.done.wait [#allocation4], 1024  }
  0x36   :  { %5296 = vsyncadd [#allocation4], 4294966272 }
  0x37   :  { %5297 = dma.done.wait [#allocation7], 3072  }
  0x38   :  { %5298 = vsyncadd [#allocation7], 4294964224  ;;  %v5310_v0 = vmov 0.0|0.0   ;;  %v5311_v1 = vmov 0.0   ;;  %vm5312_vm0 = vmmov 0   ;;  %v88_v2 = vld [vmem:[%s6302_s1] sm:$0xff]  ;;  %v91_v22 = vlaneseq }
  0x39   :  { %4677 = vmatprep.subr.bf16.mxu1 %v5310_v0  ;;  %179 = vmatprep.mubr.f32.mxu0 %v5311_v1  ;;  %vm110_vm1 = vcmask 1043456   ;;  %v192_v3 = vld [vmem:[#allocation3] sm:$0xff]  ;;  %v193_v4 = vld [vmem:[#allocation3 + $0x8] sm:$0xff]  ;;  %v102_v5 = vcombine.high %v88_v2, %v88_v2  ;;  %vm103_vm2 = vcmask 31744   ;;  %v194_v11 = vld [vmem:[#allocation3 + $0x10] sm:$0xff]  ;;  %vm207_vm3 = vcmask 261120  }
  0x3a   :  { %4333 = vmatprep.mubr.msk.f32.mxu1 %vm5312_vm0, %v5311_v1  ;;  %v5444_v6 = vpack.c.bf16 %v193_v4, %v192_v3  ;;  %v197_v7 = vld [vmem:[#allocation3 + $0x20] sm:$0xff]  ;;  %v198_v8 = vld [vmem:[#allocation3 + $0x28] sm:$0xff]  ;;  %v195_v12 = vld [vmem:[#allocation3 + $0x18] sm:$0xff]  ;;  %s5313_s29 = smov 32   ;;  %v5498_v23 = vshrl.u32 %v91_v22, 7  ;;  %vm1975_vm4 = vcmask 1041408  }
  0x3b   :  { %v86_v9 = vld [vmem:[%s6301_s0] sm:$0xff]  ;;  %v5449_v10 = vpack.c.bf16 %v198_v8, %v197_v7  ;;  %4087 = vmatprep.subr.msk.mxu0 %vm110_vm1, %v102_v5  ;;  %v5453_v13 = vpack.c.bf16 %v195_v12, %v194_v11  ;;  %v199_v14 = vld [vmem:[#allocation3 + $0x30] sm:$0xff]  ;;  %v200_v15 = vld [vmem:[#allocation3 + $0x38] sm:$0xff]  ;;  %vm1978_vm5 = vcmask 1045504   ;;  %vm2011_vm6 = vcmask 523264  }
  0x3c   :  { %4679 = vmatpush3.bf16.msra.mxu1 %v5444_v6  ;;  %4088 = vmatpush1.msk.msra.mxu0 %vm110_vm1, %v88_v2  ;;  %v4092_v16 = vld [vmem:[%s6311_s10 + $0x2] sm:$0x3]  ;;  %v87_v18 = vld [vmem:[%s6301_s0 + $0x8] sm:$0xff]  ;;  %v5467_v19 = vpack.c.bf16 %v200_v15, %v199_v14  ;;  %v201_v20 = vld [vmem:[%s6310_s9] sm:$0x3]  ;;  %v97_v24 = vsub.s32 1, %v5498_v23 }
  0x3d   :  { %4680 = vmatprep.subr.bf16.mxu1 %v5310_v0  ;;  %4089 = vmatmul.mubr.msk.f32.vlgmr.msra.gmra.mrb[0].mxu0 %vm103_vm2, %v86_v9  ;;  %v395_v17 = vrot.slane %v4092_v16, 2  ;;  %v4091_v21 = vld [vmem:[%s6310_s9 + $0x2] sm:$0x3]  ;;  %v89_v25 = vld [vmem:[%s6304_s3] sm:$0x3]  ;;  %v93_v27 = vsub.s32 0, %v5498_v23 }
  0x3e   :  { %4683 = vmatprep.subr.bf16.mxu0 %v5310_v0  ;;  %185 = vmatprep.mubr.f32.mxu0 %v5311_v1  ;;  %v98_v26 = vrot.slane %v89_v25, %v97_v24  ;;  %s5314_s3 = smov 64   ;;  %v202_v46 = vld [vmem:[%s6311_s10] sm:$0x3]  ;;  %vm1906_vm7 = vcmask 261126   ;;  %vm3958_vm8 = vcmask 521220   ;;  %vm3952_vm9 = vcmask 519170  }
  0x3f   :  { %4685 = vmatpush3.bf16.msra.mxu0 %v5449_v10  ;;  %396 = vrot.lane.b32.xlu1 %v395_v17, %s5313_s29  ;;  %v94_v31 = vrot.slane %v89_v25, %v93_v27  ;;  %vm3964_vm10 = vcmask 523270   ;;  %vm3945_vm11 = vcmask 517120   ;;  %vm3900_vm12 = vcmask 1040384  }
  0x40   :  { %4682 = vmatpush3.bf16.msra.mxu1 %v5453_v13  ;;  %4686 = vmatprep.subr.bf16.mxu0 %v5310_v0  ;;  %vm3903_vm13 = vcmask 1042432   ;;  %vm3906_vm14 = vcmask 1044480   ;;  %vm3909_vm15 = vcmask 1046528  }
  0x41   :  { %4689 = vmatprep.subr.bf16.mxu1 %v5310_v0  ;;  %4090 = vmatmul.mubr.msk.f32.gmra.mrb[2].mxu0 %vm103_vm2, %v87_v18 }
  0x42   :  { %4344 = vmatprep.mubr.msk.f32.mxu0 %vm5312_vm0, %v5311_v1 }
  0x43   :  { %4334 = vmatmul.mubr.msk.f32.vlgmr.msra.gmra.mrb[0].mxu1 %vm207_vm3, %v201_v20  ;;  %4688 = vmatpush3.bf16.msra.mxu0 %v5467_v19 }
  0x44   :  { %4695 = vmatprep.subr.bf16.mxu0 %v5310_v0  ;;  %4691 = vmatpush3.bf16.msra.mxu1 %v5444_v6 }
  0x45   :  { %4355 = vmatprep.mubr.msk.f32.mxu1 %vm5312_vm0, %v5311_v1  ;;  %4692 = vmatprep.subr.bf16.mxu1 %v5310_v0 }
  0x46   :  { %4345 = vmatmul.mubr.msk.f32.vlgmr.msra.gmra.mrb[4].mxu0 %vm207_vm3, %v4091_v21 }
  0x47   :  { %4697 = vmatpush3.bf16.msra.mxu0 %v5449_v10  ;;  %4366 = vmatprep.mubr.msk.f32.mxu0 %vm5312_vm0, %v5311_v1 }
  0x48   :  { %4698 = vmatprep.subr.bf16.mxu0 %v5310_v0  ;;  %4694 = vmatpush3.bf16.msra.mxu1 %v5453_v13 }
  0x49   :  { %4701 = vmatprep.subr.bf16.mxu1 %v5310_v0 }
  0x4b   :  { %4700 = vmatpush3.bf16.msra.mxu0 %v5467_v19 }
  0x4c   :  { %4707 = vmatprep.subr.bf16.mxu0 %v5310_v0 }
  0xb1   :  { %v397_v59 = vpop.permute.xlu1 %396 }
 0x110   :  { %v181_v28 = vpop.f32.mrb[0].mxu0 }
 0x111   :  { %v183_v29 = vpop.f32.mrb[1].mxu0  ;;  %v5515_v41 = vadd.f32 %v181_v28, %v94_v31 }
 0x112   :  { %v5507_v30 = vadd.f32 %v183_v29, %v98_v26 }
 0x114   :  { %v187_v32 = vpop.f32.mrb[2].mxu0 }
 0x115   :  { %v5511_v33 = vadd.f32 %v187_v32, %v94_v31  ;;  %v189_v34 = vpop.f32.mrb[3].mxu0 }
 0x116   :  { %v277_v35 = vpop.f32.mrb[0].mxu1  ;;  %v5513_v38 = vadd.f32 %v189_v34, %v98_v26 }
 0x117   :  { %v4335_v36 = vpop.f32.mrb[1].mxu1  ;;  %v281_v43 = vadd.f32 %v277_v35, %v5515_v41 }
 0x119   :  { %v351_v37 = vpop.f32.mrb[4].mxu0  ;;  %v4095_v48 = vmul.f32 -1.442695, %v281_v43 }
 0x11a   :  { %v356_v39 = vrot.slane %v351_v37, 2  ;;  %v4346_v40 = vpop.f32.mrb[5].mxu0 }
 0x11c   :  { %v358_v42 = vadd.f32 %v356_v39, %v5513_v38 }
 0x11e   :  { %4903 = vtanh.f32 %v358_v42  ;;  %v4096_v47 = vmul.f32 -1.442695, %v358_v42 }
 0x11f   :  { %4905 = vtanh.f32 %v281_v43 }
 0x120   :  { %4907 = vpow2.f32 %v4096_v47 }
 0x121   :  { %4909 = vpow2.f32 %v4095_v48 }
 0x128   :  { %v4904_v44 = vpop.eup %4903 }
 0x129   :  { %401 = vrot.lane.b32.xlu0 %v4904_v44, %s5314_s3  ;;  %v4906_v45 = vpop.eup %4905 }
 0x12a   :  { %v4908_v49 = vpop.eup %4907 }
 0x12b   :  { %v390_v50 = vadd.f32 1.0, %v4908_v49  ;;  %v4910_v51 = vpop.eup %4909 }
 0x12c   :  { %v362_v52 = vadd.f32 1.0, %v4910_v51 }
 0x12d   :  { %372 = vrot.lane.b32.xlu0 %v4906_v45, %s5314_s3  ;;  %4911 = vrcp.f32 %v390_v50 }
 0x12e   :  { %4913 = vrcp.f32 %v362_v52 }
 0x131   :  { %367 = vrot.lane.b32.xlu0 %v202_v46, %s5313_s29 }
 0x137   :  { %v4912_v53 = vpop.eup %4911 }
 0x138   :  { %v4914_v56 = vpop.eup %4913  ;;  %v399_v60 = vmul.f32 %v4912_v53, %v397_v59 }
 0x19b   :  { %v402_v54 = vpop.permute.xlu0 %401 }
 0x19c   :  { %v404_v55 = vmul.f32 %v4912_v53, %v402_v54 }
 0x19e   :  { %406 = vrot.lane.b32.xlu1 %v404_v55, %s5313_s29 }
 0x19f   :  { %v373_v57 = vpop.permute.xlu0 %372 }
 0x1a0   :  { %v375_v58 = vmul.f32 %v4914_v56, %v373_v57 }
 0x1a2   :  { %377 = vrot.lane.b32.xlu1 %v375_v58, %s5313_s29 }
 0x1a3   :  { %v368_v61 = vpop.permute.xlu0 %367 }
 0x1a4   :  { %v370_v2 = vmul.f32 %v4914_v56, %v368_v61 }
 0x210   :  { %v407_v62 = vpop.permute.xlu1 %406 }
 0x211   :  { %v5527_v63 = vadd.f32 %v407_v62, %v399_v60 }
 0x213   :  { %4915 = vtanh.f32 %v5527_v63  ;;  %v610_v47 = vrot.slane %v5527_v63, 2 }
 0x214   :  { %v378_v3 = vpop.permute.xlu1 %377 }
 0x215   :  { %v5530_v4 = vadd.f32 %v378_v3, %v370_v2 }
 0x217   :  { %4917 = vtanh.f32 %v5530_v4  ;;  %v583_v49 = vrot.slane %v5530_v4, 6 }
 0x21d   :  { %v4916_v5 = vpop.eup %4915 }
 0x21e   :  { %412 = vrot.lane.b32.xlu0 %v4916_v5, %s5314_s3 }
 0x221   :  { %v4918_v7 = vpop.eup %4917 }
 0x222   :  { %383 = vrot.lane.b32.xlu1 %v4918_v7, %s5314_s3 }
 0x290   :  { %v413_v8 = vpop.permute.xlu0 %412 }
 0x291   :  { %v5535_v9 = vmul.f32 %v4912_v53, %v413_v8 }
 0x293   :  { %v496_v11 = vrot.slane %v5535_v9, 6 }
 0x294   :  { %v384_v12 = vpop.permute.xlu1 %383 }
 0x295   :  { %v386_v14 = vmul.f32 %v4914_v56, %v384_v12  ;;  %497 = vrot.lane.b32.xlu0 %v496_v11, %s5313_s29 }
 0x297   :  { %417 = vrot.lane.b32.xlu1 %v386_v14, %s5313_s29 }
 0x307   :  { %v498_v15 = vpop.permute.xlu0 %497 }
 0x308   :  { %4367 = vmatmul.mubr.msk.f32.vlgmr.msra.gmra.mrb[6].mxu0 %vm207_vm3, %v498_v15 }
 0x309   :  { %v5541_v16 = vpop.permute.xlu1 %417  ;;  %4709 = vmatpush3.bf16.msra.mxu0 %v5449_v10  ;;  %4388 = vmatprep.mubr.msk.f32.mxu0 %vm5312_vm0, %v5311_v1 }
 0x30a   :  { %4356 = vmatmul.mubr.msk.f32.vlgmr.msra.gmra.mrb[2].mxu1 %vm207_vm3, %v5541_v16  ;;  %4710 = vmatprep.subr.bf16.mxu0 %v5310_v0 }
 0x30b   :  { %4703 = vmatpush3.bf16.msra.mxu1 %v5444_v6  ;;  %4377 = vmatprep.mubr.msk.f32.mxu1 %vm5312_vm0, %v5311_v1 }
 0x30c   :  { %4704 = vmatprep.subr.bf16.mxu1 %v5310_v0 }
 0x30d   :  { %4712 = vmatpush3.bf16.msra.mxu0 %v5467_v19 }
 0x30e   :  { %4719 = vmatprep.subr.bf16.mxu0 %v5310_v0 }
 0x30f   :  { %4706 = vmatpush3.bf16.msra.mxu1 %v5453_v13 }
 0x310   :  { %4713 = vmatprep.subr.bf16.mxu1 %v5310_v0 }
 0x3db   :  { %v567_v17 = vpop.f32.mrb[6].mxu0 }
 0x3dc   :  { %v572_v18 = vrot.slane %v567_v17, 4  ;;  %v4368_v20 = vpop.f32.mrb[7].mxu0 }
 0x3dd   :  { %v487_v21 = vpop.f32.mrb[2].mxu1 }
 0x3de   :  { %v574_v22 = vadd.f32 %v572_v18, %v5513_v38  ;;  %v492_v25 = vrot.slane %v487_v21, 6  ;;  %v4357_v26 = vpop.f32.mrb[3].mxu1 }
 0x3e0   :  { %4919 = vtanh.f32 %v574_v22  ;;  %v494_v28 = vadd.f32 %v492_v25, %v5515_v41  ;;  %v4100_v32 = vmul.f32 -1.442695, %v574_v22 }
 0x3e2   :  { %4921 = vtanh.f32 %v494_v28  ;;  %v4099_v34 = vmul.f32 -1.442695, %v494_v28 }
 0x3e3   :  { %4923 = vpow2.f32 %v4100_v32 }
 0x3e4   :  { %4925 = vpow2.f32 %v4099_v34 }
 0x3ea   :  { %v4920_v29 = vpop.eup %4919 }
 0x3eb   :  { %614 = vrot.lane.b32.xlu0 %v4920_v29, %s5314_s3 }
 0x3ec   :  { %v4922_v31 = vpop.eup %4921 }
 0x3ed   :  { %587 = vrot.lane.b32.xlu1 %v4922_v31, %s5314_s3  ;;  %v4924_v35 = vpop.eup %4923 }
 0x3ee   :  { %v4926_v36 = vpop.eup %4925  ;;  %v605_v37 = vadd.f32 1.0, %v4924_v35 }
 0x3ef   :  { %v578_v39 = vadd.f32 1.0, %v4926_v36 }
 0x3f0   :  { %4927 = vrcp.f32 %v605_v37 }
 0x3f1   :  { %4929 = vrcp.f32 %v578_v39 }
 0x3fa   :  { %v4928_v40 = vpop.eup %4927 }
 0x3fb   :  { %v4930_v44 = vpop.eup %4929  ;;  %v612_v48 = vmul.f32 %v4928_v40, %v610_v47 }
 0x3fc   :  { %v585_v52 = vmul.f32 %v4930_v44, %v583_v49 }
 0x45d   :  { %v615_v42 = vpop.permute.xlu0 %614 }
 0x45e   :  { %v617_v43 = vmul.f32 %v4928_v40, %v615_v42 }
 0x45f   :  { %v588_v45 = vpop.permute.xlu1 %587 }
 0x460   :  { %619 = vrot.lane.b32.xlu0 %v617_v43, %s5313_s29  ;;  %v590_v46 = vmul.f32 %v4930_v44, %v588_v45 }
 0x462   :  { %592 = vrot.lane.b32.xlu1 %v590_v46, %s5313_s29 }
 0x4d2   :  { %v620_v50 = vpop.permute.xlu0 %619 }
 0x4d3   :  { %v5565_v51 = vadd.f32 %v620_v50, %v612_v48 }
 0x4d4   :  { %v593_v53 = vpop.permute.xlu1 %592 }
 0x4d5   :  { %4931 = vtanh.f32 %v5565_v51  ;;  %v5568_v54 = vadd.f32 %v593_v53, %v585_v52  ;;  %v824_v36 = vrot.slane %v5565_v51, 2 }
 0x4d7   :  { %4933 = vtanh.f32 %v5568_v54  ;;  %v797_v39 = vrot.slane %v5568_v54, 6 }
 0x4df   :  { %v4932_v55 = vpop.eup %4931 }
 0x4e0   :  { %625 = vrot.lane.b32.xlu0 %v4932_v55, %s5314_s3 }
 0x4e1   :  { %v4934_v56 = vpop.eup %4933 }
 0x4e2   :  { %598 = vrot.lane.b32.xlu1 %v4934_v56, %s5314_s3 }
 0x552   :  { %v626_v57 = vpop.permute.xlu0 %625 }
 0x553   :  { %v5573_v58 = vmul.f32 %v4928_v40, %v626_v57 }
 0x554   :  { %v599_v60 = vpop.permute.xlu1 %598 }
 0x555   :  { %v710_v59 = vrot.slane %v5573_v58, 4  ;;  %v5576_v61 = vmul.f32 %v4930_v44, %v599_v60 }
 0x557   :  { %711 = vrot.lane.b32.xlu0 %v710_v59, %s5313_s29  ;;  %v630_v62 = vrot.slane %v5576_v61, 2 }
 0x559   :  { %631 = vrot.lane.b32.xlu1 %v630_v62, %s5313_s29 }
 0x5c9   :  { %v712_v63 = vpop.permute.xlu0 %711 }
 0x5ca   :  { %4389 = vmatmul.mubr.msk.f32.vlgmr.msra.gmra.mrb[8].mxu0 %vm207_vm3, %v712_v63 }
 0x5cb   :  { %4721 = vmatpush3.bf16.msra.mxu0 %v5449_v10  ;;  %4410 = vmatprep.mubr.msk.f32.mxu0 %vm5312_vm0, %v5311_v1  ;;  %v632_v2 = vpop.permute.xlu1 %631 }
 0x5cc   :  { %4722 = vmatprep.subr.bf16.mxu0 %v5310_v0  ;;  %4378 = vmatmul.mubr.msk.f32.vlgmr.msra.gmra.mrb[4].mxu1 %vm207_vm3, %v632_v2 }
 0x5cd   :  { %4715 = vmatpush3.bf16.msra.mxu1 %v5444_v6  ;;  %4399 = vmatprep.mubr.msk.f32.mxu1 %vm5312_vm0, %v5311_v1 }
 0x5ce   :  { %4716 = vmatprep.subr.bf16.mxu1 %v5310_v0 }
 0x5cf   :  { %4724 = vmatpush3.bf16.msra.mxu0 %v5467_v19 }
 0x5d0   :  { %4731 = vmatprep.subr.bf16.mxu0 %v5310_v0 }
 0x5d1   :  { %4718 = vmatpush3.bf16.msra.mxu1 %v5453_v13 }
 0x5d2   :  { %4725 = vmatprep.subr.bf16.mxu1 %v5310_v0 }
 0x69d   :  { %v781_v3 = vpop.f32.mrb[8].mxu0 }
 0x69e   :  { %v786_v4 = vrot.slane %v781_v3, 6  ;;  %v4390_v5 = vpop.f32.mrb[9].mxu0 }
 0x69f   :  { %v701_v8 = vpop.f32.mrb[4].mxu1 }
 0x6a0   :  { %v788_v7 = vadd.f32 %v786_v4, %v5513_v38  ;;  %v706_v11 = vrot.slane %v701_v8, 4  ;;  %v4379_v12 = vpop.f32.mrb[5].mxu1 }
 0x6a2   :  { %4935 = vtanh.f32 %v788_v7  ;;  %v708_v14 = vadd.f32 %v706_v11, %v5515_v41  ;;  %v4104_v18 = vmul.f32 -1.442695, %v788_v7 }
 0x6a4   :  { %4937 = vtanh.f32 %v708_v14  ;;  %v4103_v20 = vmul.f32 -1.442695, %v708_v14 }
 0x6a5   :  { %4939 = vpow2.f32 %v4104_v18 }
 0x6a6   :  { %4941 = vpow2.f32 %v4103_v20 }
 0x6ac   :  { %v4936_v15 = vpop.eup %4935 }
 0x6ad   :  { %828 = vrot.lane.b32.xlu0 %v4936_v15, %s5314_s3 }
 0x6ae   :  { %v4938_v17 = vpop.eup %4937 }
 0x6af   :  { %801 = vrot.lane.b32.xlu1 %v4938_v17, %s5314_s3  ;;  %v4940_v21 = vpop.eup %4939 }
 0x6b0   :  { %v4942_v22 = vpop.eup %4941  ;;  %v819_v25 = vadd.f32 1.0, %v4940_v21 }
 0x6b1   :  { %v792_v26 = vadd.f32 1.0, %v4942_v22 }
 0x6b2   :  { %4943 = vrcp.f32 %v819_v25 }
 0x6b3   :  { %4945 = vrcp.f32 %v792_v26 }
 0x6bc   :  { %v4944_v28 = vpop.eup %4943 }
 0x6bd   :  { %v4946_v32 = vpop.eup %4945  ;;  %v826_v37 = vmul.f32 %v4944_v28, %v824_v36 }
 0x6be   :  { %v799_v43 = vmul.f32 %v4946_v32, %v797_v39 }
 0x71f   :  { %v829_v29 = vpop.permute.xlu0 %828 }
 0x720   :  { %v831_v31 = vmul.f32 %v4944_v28, %v829_v29 }
 0x721   :  { %v802_v34 = vpop.permute.xlu1 %801 }
 0x722   :  { %833 = vrot.lane.b32.xlu0 %v831_v31, %s5313_s29  ;;  %v804_v35 = vmul.f32 %v4946_v32, %v802_v34 }
 0x724   :  { %806 = vrot.lane.b32.xlu1 %v804_v35, %s5313_s29 }
 0x794   :  { %v834_v40 = vpop.permute.xlu0 %833 }
 0x795   :  { %v5603_v42 = vadd.f32 %v834_v40, %v826_v37 }
 0x796   :  { %v807_v44 = vpop.permute.xlu1 %806 }
 0x797   :  { %4947 = vtanh.f32 %v5603_v42  ;;  %v5606_v45 = vadd.f32 %v807_v44, %v799_v43  ;;  %v1035_v21 = vrot.slane %v5603_v42, 2 }
 0x799   :  { %4949 = vtanh.f32 %v5606_v45 }
 0x7a1   :  { %v4948_v46 = vpop.eup %4947 }
 0x7a2   :  { %839 = vrot.lane.b32.xlu0 %v4948_v46, %s5314_s3 }
 0x7a3   :  { %v4950_v47 = vpop.eup %4949 }
 0x7a4   :  { %812 = vrot.lane.b32.xlu1 %v4950_v47, %s5314_s3 }
 0x814   :  { %v840_v48 = vpop.permute.xlu0 %839 }
 0x815   :  { %v5611_v49 = vmul.f32 %v4944_v28, %v840_v48  ;;  %v1008_v28 = vrot.slane %v5606_v45, 6 }
 0x816   :  { %v813_v51 = vpop.permute.xlu1 %812 }
 0x817   :  { %v924_v50 = vrot.slane %v5611_v49, 2  ;;  %v5614_v52 = vmul.f32 %v4946_v32, %v813_v51 }
 0x819   :  { %925 = vrot.lane.b32.xlu0 %v924_v50, %s5313_s29  ;;  %v844_v53 = vrot.slane %v5614_v52, 4 }
 0x81b   :  { %845 = vrot.lane.b32.xlu1 %v844_v53, %s5313_s29 }
 0x88b   :  { %v926_v54 = vpop.permute.xlu0 %925 }
 0x88c   :  { %4411 = vmatmul.mubr.msk.f32.vlgmr.msra.gmra.mrb[10].mxu0 %vm207_vm3, %v926_v54 }
 0x88d   :  { %4733 = vmatpush3.bf16.msra.mxu0 %v5449_v10  ;;  %4432 = vmatprep.mubr.msk.f32.mxu0 %vm5312_vm0, %v5311_v1  ;;  %v846_v55 = vpop.permute.xlu1 %845 }
 0x88e   :  { %4734 = vmatprep.subr.bf16.mxu0 %v5310_v0  ;;  %4400 = vmatmul.mubr.msk.f32.vlgmr.msra.gmra.mrb[6].mxu1 %vm207_vm3, %v846_v55 }
 0x88f   :  { %4727 = vmatpush3.bf16.msra.mxu1 %v5444_v6  ;;  %4421 = vmatprep.mubr.msk.f32.mxu1 %vm5312_vm0, %v5311_v1 }
 0x890   :  { %4728 = vmatprep.subr.bf16.mxu1 %v5310_v0 }
 0x891   :  { %4736 = vmatpush3.bf16.msra.mxu0 %v5467_v19 }
 0x892   :  { %4743 = vmatprep.subr.bf16.mxu0 %v5310_v0 }
 0x893   :  { %4730 = vmatpush3.bf16.msra.mxu1 %v5453_v13 }
 0x894   :  { %4737 = vmatprep.subr.bf16.mxu1 %v5310_v0 }
 0x95f   :  { %v995_v56 = vpop.f32.mrb[10].mxu0 }
 0x960   :  { %v999_v57 = vadd.f32 %v995_v56, %v5513_v38  ;;  %v4412_v59 = vpop.f32.mrb[11].mxu0 }
 0x961   :  { %v915_v60 = vpop.f32.mrb[6].mxu1 }
 0x962   :  { %4951 = vtanh.f32 %v999_v57  ;;  %v920_v62 = vrot.slane %v915_v60, 2  ;;  %v4401_v63 = vpop.f32.mrb[7].mxu1  ;;  %v4108_v5 = vmul.f32 -1.442695, %v999_v57 }
 0x964   :  { %v922_v2 = vadd.f32 %v920_v62, %v5515_v41 }
 0x966   :  { %4953 = vtanh.f32 %v922_v2  ;;  %v4107_v7 = vmul.f32 -1.442695, %v922_v2 }
 0x967   :  { %4955 = vpow2.f32 %v4108_v5 }
 0x968   :  { %4957 = vpow2.f32 %v4107_v7 }
 0x96c   :  { %v4952_v3 = vpop.eup %4951 }
 0x96d   :  { %1039 = vrot.lane.b32.xlu0 %v4952_v3, %s5314_s3 }
 0x970   :  { %v4954_v4 = vpop.eup %4953 }
 0x971   :  { %1012 = vrot.lane.b32.xlu1 %v4954_v4, %s5314_s3  ;;  %v4956_v8 = vpop.eup %4955 }
 0x972   :  { %v1030_v38 = vadd.f32 1.0, %v4956_v8  ;;  %v4958_v11 = vpop.eup %4957 }
 0x973   :  { %v1003_v12 = vadd.f32 1.0, %v4958_v11 }
 0x974   :  { %4959 = vrcp.f32 %v1030_v38 }
 0x975   :  { %4961 = vrcp.f32 %v1003_v12 }
 0x97e   :  { %v4960_v14 = vpop.eup %4959 }
 0x97f   :  { %v4962_v17 = vpop.eup %4961  ;;  %v1037_v22 = vmul.f32 %v4960_v14, %v1035_v21 }
 0x980   :  { %v1010_v29 = vmul.f32 %v4962_v17, %v1008_v28 }
 0x9df   :  { %v1040_v15 = vpop.permute.xlu0 %1039 }
 0x9e0   :  { %v1042_v41 = vmul.f32 %v4960_v14, %v1040_v15 }
 0x9e2   :  { %1044 = vrot.lane.b32.xlu0 %v1042_v41, %s5313_s29 }
 0x9e3   :  { %v1013_v18 = vpop.permute.xlu1 %1012 }
 0x9e4   :  { %v1015_v20 = vmul.f32 %v4962_v17, %v1013_v18 }
 0x9e6   :  { %1017 = vrot.lane.b32.xlu1 %v1015_v20, %s5313_s29 }
 0xa54   :  { %v1045_v25 = vpop.permute.xlu0 %1044 }
 0xa55   :  { %v5640_v26 = vadd.f32 %v1045_v25, %v1037_v22 }
 0xa57   :  { %4963 = vtanh.f32 %v5640_v26  ;;  %v1245_v38 = vrot.slane %v5640_v26, 2 }
 0xa58   :  { %v1018_v31 = vpop.permute.xlu1 %1017 }
 0xa59   :  { %v5644_v32 = vadd.f32 %v1018_v31, %v1010_v29 }
 0xa5b   :  { %4965 = vtanh.f32 %v5644_v32  ;;  %v1218_v15 = vrot.slane %v5644_v32, 6 }
 0xa61   :  { %v4964_v34 = vpop.eup %4963 }
 0xa62   :  { %1050 = vrot.lane.b32.xlu0 %v4964_v34, %s5314_s3 }
 0xa65   :  { %v4966_v35 = vpop.eup %4965 }
 0xa66   :  { %1023 = vrot.lane.b32.xlu1 %v4966_v35, %s5314_s3 }
 0xad4   :  { %v1051_v36 = vpop.permute.xlu0 %1050 }
 0xad5   :  { %v5649_v37 = vmul.f32 %v4960_v14, %v1051_v36 }
 0xad7   :  { %1132 = vrot.lane.b32.xlu0 %v5649_v37, %s5313_s29 }
 0xad8   :  { %v1024_v39 = vpop.permute.xlu1 %1023 }
 0xad9   :  { %v5653_v40 = vmul.f32 %v4962_v17, %v1024_v39 }
 0xadb   :  { %v1055_v42 = vrot.slane %v5653_v40, 6 }
 0xadd   :  { %1056 = vrot.lane.b32.xlu1 %v1055_v42, %s5313_s29 }
 0xb49   :  { %v1133_v43 = vpop.permute.xlu0 %1132 }
 0xb4a   :  { %4433 = vmatmul.mubr.msk.f32.vlgmr.msra.gmra.mrb[12].mxu0 %vm207_vm3, %v1133_v43 }
 0xb4b   :  { %4745 = vmatpush3.bf16.msra.mxu0 %v5449_v10  ;;  %4454 = vmatprep.mubr.msk.f32.mxu0 %vm5312_vm0, %v5311_v1 }
 0xb4c   :  { %4746 = vmatprep.subr.bf16.mxu0 %v5310_v0 }
 0xb4f   :  { %4748 = vmatpush3.bf16.msra.mxu0 %v5467_v19  ;;  %v1057_v44 = vpop.permute.xlu1 %1056 }
 0xb50   :  { %4755 = vmatprep.subr.bf16.mxu0 %v5310_v0  ;;  %4422 = vmatmul.mubr.msk.f32.vlgmr.msra.gmra.mrb[8].mxu1 %vm207_vm3, %v1057_v44 }
 0xb51   :  { %4739 = vmatpush3.bf16.msra.mxu1 %v5444_v6  ;;  %4443 = vmatprep.mubr.msk.f32.mxu1 %vm5312_vm0, %v5311_v1 }
 0xb52   :  { %4740 = vmatprep.subr.bf16.mxu1 %v5310_v0 }
 0xb55   :  { %4742 = vmatpush3.bf16.msra.mxu1 %v5453_v13 }
 0xb56   :  { %4749 = vmatprep.subr.bf16.mxu1 %v5310_v0 }
 0xc1d   :  { %v1202_v45 = vpop.f32.mrb[12].mxu0 }
 0xc1e   :  { %v1207_v46 = vrot.slane %v1202_v45, 2  ;;  %v4434_v47 = vpop.f32.mrb[13].mxu0 }
 0xc20   :  { %v1209_v48 = vadd.f32 %v1207_v46, %v5507_v30 }
 0xc22   :  { %4967 = vtanh.f32 %v1209_v48  ;;  %v4112_v56 = vmul.f32 -1.442695, %v1209_v48 }
 0xc23   :  { %v1126_v50 = vpop.f32.mrb[8].mxu1 }
 0xc24   :  { %v1130_v51 = vadd.f32 %v1126_v50, %v5511_v33  ;;  %v4423_v53 = vpop.f32.mrb[9].mxu1 }
 0xc26   :  { %4969 = vtanh.f32 %v1130_v51  ;;  %v4111_v57 = vmul.f32 -1.442695, %v1130_v51 }
 0xc27   :  { %4971 = vpow2.f32 %v4112_v56 }
 0xc28   :  { %4973 = vpow2.f32 %v4111_v57 }
 0xc2c   :  { %v4968_v54 = vpop.eup %4967 }
 0xc2d   :  { %1249 = vrot.lane.b32.xlu0 %v4968_v54, %s5314_s3 }
 0xc30   :  { %v4970_v55 = vpop.eup %4969 }
 0xc31   :  { %1222 = vrot.lane.b32.xlu1 %v4970_v55, %s5314_s3  ;;  %v4972_v59 = vpop.eup %4971 }
 0xc32   :  { %v1240_v60 = vadd.f32 1.0, %v4972_v59  ;;  %v4974_v62 = vpop.eup %4973 }
 0xc33   :  { %v1213_v63 = vadd.f32 1.0, %v4974_v62 }
 0xc34   :  { %4975 = vrcp.f32 %v1240_v60 }
 0xc35   :  { %4977 = vrcp.f32 %v1213_v63 }
 0xc3e   :  { %v4976_v2 = vpop.eup %4975 }
 0xc3f   :  { %v4978_v5 = vpop.eup %4977  ;;  %v1247_v11 = vmul.f32 %v4976_v2, %v1245_v38 }
 0xc40   :  { %v1220_v41 = vmul.f32 %v4978_v5, %v1218_v15 }
 0xc9f   :  { %v1250_v3 = vpop.permute.xlu0 %1249 }
 0xca0   :  { %v1252_v4 = vmul.f32 %v4976_v2, %v1250_v3 }
 0xca2   :  { %1254 = vrot.lane.b32.xlu0 %v1252_v4, %s5313_s29 }
 0xca3   :  { %v1223_v7 = vpop.permute.xlu1 %1222 }
 0xca4   :  { %v1225_v8 = vmul.f32 %v4978_v5, %v1223_v7 }
 0xca6   :  { %1227 = vrot.lane.b32.xlu1 %v1225_v8, %s5313_s29 }
 0xd14   :  { %v1255_v12 = vpop.permute.xlu0 %1254 }
 0xd15   :  { %v5678_v14 = vadd.f32 %v1255_v12, %v1247_v11 }
 0xd17   :  { %4979 = vtanh.f32 %v5678_v14 }
 0xd18   :  { %v1228_v17 = vpop.permute.xlu1 %1227 }
 0xd19   :  { %v5682_v18 = vadd.f32 %v1228_v17, %v1220_v41 }
 0xd1b   :  { %4981 = vtanh.f32 %v5682_v18  ;;  %v1431_v4 = vrot.slane %v5682_v18, 6 }
 0xd21   :  { %v4980_v20 = vpop.eup %4979 }
 0xd22   :  { %1260 = vrot.lane.b32.xlu0 %v4980_v20, %s5314_s3 }
 0xd25   :  { %v4982_v21 = vpop.eup %4981 }
 0xd26   :  { %1233 = vrot.lane.b32.xlu1 %v4982_v21, %s5314_s3 }
 0xd94   :  { %v1261_v22 = vpop.permute.xlu0 %1260 }
 0xd95   :  { %v5687_v25 = vmul.f32 %v4976_v2, %v1261_v22  ;;  %v1458_v2 = vrot.slane %v5678_v14, 2 }
 0xd97   :  { %v1344_v26 = vrot.slane %v5687_v25, 6 }
 0xd98   :  { %v1234_v28 = vpop.permute.xlu1 %1233 }
 0xd99   :  { %1345 = vrot.lane.b32.xlu0 %v1344_v26, %s5313_s29  ;;  %v1236_v29 = vmul.f32 %v4978_v5, %v1234_v28 }
 0xd9b   :  { %1265 = vrot.lane.b32.xlu1 %v1236_v29, %s5313_s29 }
 0xe0b   :  { %v1346_v31 = vpop.permute.xlu0 %1345 }
 0xe0c   :  { %4455 = vmatmul.mubr.msk.f32.vlgmr.msra.gmra.mrb[14].mxu0 %vm207_vm3, %v1346_v31 }
 0xe0d   :  { %4757 = vmatpush3.bf16.msra.mxu0 %v5449_v10  ;;  %4476 = vmatprep.mubr.msk.f32.mxu0 %vm5312_vm0, %v5311_v1  ;;  %v5696_v32 = vpop.permute.xlu1 %1265 }
 0xe0e   :  { %4758 = vmatprep.subr.bf16.mxu0 %v5310_v0  ;;  %4444 = vmatmul.mubr.msk.f32.vlgmr.msra.gmra.mrb[10].mxu1 %vm207_vm3, %v5696_v32 }
 0xe0f   :  { %4751 = vmatpush3.bf16.msra.mxu1 %v5444_v6  ;;  %4465 = vmatprep.mubr.msk.f32.mxu1 %vm5312_vm0, %v5311_v1 }
 0xe10   :  { %4752 = vmatprep.subr.bf16.mxu1 %v5310_v0 }
 0xe11   :  { %4760 = vmatpush3.bf16.msra.mxu0 %v5467_v19 }
 0xe12   :  { %4767 = vmatprep.subr.bf16.mxu0 %v5310_v0 }
 0xe13   :  { %4754 = vmatpush3.bf16.msra.mxu1 %v5453_v13 }
 0xe14   :  { %4761 = vmatprep.subr.bf16.mxu1 %v5310_v0 }
 0xedf   :  { %v1415_v34 = vpop.f32.mrb[14].mxu0 }
 0xee0   :  { %v1420_v35 = vrot.slane %v1415_v34, 4  ;;  %v4456_v36 = vpop.f32.mrb[15].mxu0 }
 0xee1   :  { %v1335_v42 = vpop.f32.mrb[10].mxu1 }
 0xee2   :  { %v1422_v39 = vadd.f32 %v1420_v35, %v5507_v30  ;;  %v1340_v43 = vrot.slane %v1335_v42, 6  ;;  %v4445_v44 = vpop.f32.mrb[11].mxu1 }
 0xee4   :  { %4983 = vtanh.f32 %v1422_v39  ;;  %v1342_v45 = vadd.f32 %v1340_v43, %v5511_v33  ;;  %v4116_v48 = vmul.f32 -1.442695, %v1422_v39 }
 0xee6   :  { %4985 = vtanh.f32 %v1342_v45  ;;  %v4115_v50 = vmul.f32 -1.442695, %v1342_v45 }
 0xee7   :  { %4987 = vpow2.f32 %v4116_v48 }
 0xee8   :  { %4989 = vpow2.f32 %v4115_v50 }
 0xeee   :  { %v4984_v46 = vpop.eup %4983 }
 0xeef   :  { %1462 = vrot.lane.b32.xlu0 %v4984_v46, %s5314_s3 }
 0xef0   :  { %v4986_v47 = vpop.eup %4985 }
 0xef1   :  { %1435 = vrot.lane.b32.xlu1 %v4986_v47, %s5314_s3  ;;  %v4988_v51 = vpop.eup %4987 }
 0xef2   :  { %v4990_v53 = vpop.eup %4989  ;;  %v1453_v54 = vadd.f32 1.0, %v4988_v51 }
 0xef3   :  { %v1426_v55 = vadd.f32 1.0, %v4990_v53 }
 0xef4   :  { %4991 = vrcp.f32 %v1453_v54 }
 0xef5   :  { %4993 = vrcp.f32 %v1426_v55 }
 0xefe   :  { %v4992_v56 = vpop.eup %4991 }
 0xeff   :  { %v4994_v60 = vpop.eup %4993  ;;  %v1460_v3 = vmul.f32 %v4992_v56, %v1458_v2 }
 0xf00   :  { %v1433_v8 = vmul.f32 %v4994_v60, %v1431_v4 }
 0xf61   :  { %v1463_v57 = vpop.permute.xlu0 %1462 }
 0xf62   :  { %v1465_v59 = vmul.f32 %v4992_v56, %v1463_v57 }
 0xf63   :  { %v1436_v62 = vpop.permute.xlu1 %1435 }
 0xf64   :  { %1467 = vrot.lane.b32.xlu0 %v1465_v59, %s5313_s29  ;;  %v1438_v63 = vmul.f32 %v4994_v60, %v1436_v62 }
 0xf66   :  { %1440 = vrot.lane.b32.xlu1 %v1438_v63, %s5313_s29 }
 0xfd6   :  { %v1468_v5 = vpop.permute.xlu0 %1467 }
 0xfd7   :  { %v5717_v7 = vadd.f32 %v1468_v5, %v1460_v3 }
 0xfd8   :  { %v1441_v38 = vpop.permute.xlu1 %1440 }
 0xfd9   :  { %4995 = vtanh.f32 %v5717_v7  ;;  %v5720_v11 = vadd.f32 %v1441_v38, %v1433_v8  ;;  %v1672_v55 = vrot.slane %v5717_v7, 2 }
 0xfdb   :  { %4997 = vtanh.f32 %v5720_v11  ;;  %v1645_v57 = vrot.slane %v5720_v11, 6 }
 0xfe3   :  { %v4996_v12 = vpop.eup %4995 }
 0xfe4   :  { %1473 = vrot.lane.b32.xlu0 %v4996_v12, %s5314_s3 }
 0xfe5   :  { %v4998_v15 = vpop.eup %4997 }
 0xfe6   :  { %1446 = vrot.lane.b32.xlu1 %v4998_v15, %s5314_s3 }
0x1056   :  { %v1474_v14 = vpop.permute.xlu0 %1473 }
0x1057   :  { %v5725_v41 = vmul.f32 %v4992_v56, %v1474_v14 }
0x1058   :  { %v1447_v18 = vpop.permute.xlu1 %1446 }
0x1059   :  { %v1558_v17 = vrot.slane %v5725_v41, 4  ;;  %v5728_v20 = vmul.f32 %v4994_v60, %v1447_v18 }
0x105b   :  { %1559 = vrot.lane.b32.xlu0 %v1558_v17, %s5313_s29  ;;  %v1478_v21 = vrot.slane %v5728_v20, 2 }
0x105d   :  { %1479 = vrot.lane.b32.xlu1 %v1478_v21, %s5313_s29 }
0x10cd   :  { %v1560_v22 = vpop.permute.xlu0 %1559 }
0x10ce   :  { %4477 = vmatmul.mubr.msk.f32.vlgmr.msra.gmra.mrb[16].mxu0 %vm207_vm3, %v1560_v22 }
0x10cf   :  { %4769 = vmatpush3.bf16.msra.mxu0 %v5449_v10  ;;  %4498 = vmatprep.mubr.msk.f32.mxu0 %vm5312_vm0, %v5311_v1  ;;  %v1480_v26 = vpop.permute.xlu1 %1479 }
0x10d0   :  { %4770 = vmatprep.subr.bf16.mxu0 %v5310_v0  ;;  %4466 = vmatmul.mubr.msk.f32.vlgmr.msra.gmra.mrb[12].mxu1 %vm207_vm3, %v1480_v26 }
0x10d1   :  { %4763 = vmatpush3.bf16.msra.mxu1 %v5444_v6  ;;  %4487 = vmatprep.mubr.msk.f32.mxu1 %vm5312_vm0, %v5311_v1 }
0x10d2   :  { %4764 = vmatprep.subr.bf16.mxu1 %v5310_v0 }
0x10d3   :  { %4772 = vmatpush3.bf16.msra.mxu0 %v5467_v19 }
0x10d4   :  { %4789 = vmatprep.subr.bf16.mxu0 %v5310_v0 }
0x10d5   :  { %4766 = vmatpush3.bf16.msra.mxu1 %v5453_v13 }
0x11a1   :  { %v1629_v10 = vpop.f32.mrb[16].mxu0 }
0x11a2   :  { %v1634_v28 = vrot.slane %v1629_v10, 6  ;;  %v4478_v29 = vpop.f32.mrb[17].mxu0 }
0x11a3   :  { %v1549_v34 = vpop.f32.mrb[12].mxu1 }
0x11a4   :  { %v1636_v31 = vadd.f32 %v1634_v28, %v5507_v30  ;;  %v1554_v35 = vrot.slane %v1549_v34, 4  ;;  %v4467_v36 = vpop.f32.mrb[13].mxu1 }
0x11a6   :  { %4999 = vtanh.f32 %v1636_v31  ;;  %v1556_v6 = vadd.f32 %v1554_v35, %v5511_v33  ;;  %v4120_v42 = vmul.f32 -1.442695, %v1636_v31 }
0x11a8   :  { %5001 = vtanh.f32 %v1556_v6  ;;  %v4119_v13 = vmul.f32 -1.442695, %v1556_v6 }
0x11a9   :  { %5003 = vpow2.f32 %v4120_v42 }
0x11aa   :  { %5005 = vpow2.f32 %v4119_v13 }
0x11b0   :  { %v5000_v39 = vpop.eup %4999 }
0x11b1   :  { %1676 = vrot.lane.b32.xlu0 %v5000_v39, %s5314_s3 }
0x11b2   :  { %v5002_v19 = vpop.eup %5001 }
0x11b3   :  { %1649 = vrot.lane.b32.xlu1 %v5002_v19, %s5314_s3  ;;  %v5004_v43 = vpop.eup %5003 }
0x11b4   :  { %v5006_v44 = vpop.eup %5005  ;;  %v1667_v45 = vadd.f32 1.0, %v5004_v43 }
0x11b5   :  { %v1640_v46 = vadd.f32 1.0, %v5006_v44 }
0x11b6   :  { %5007 = vrcp.f32 %v1667_v45 }
0x11b7   :  { %5009 = vrcp.f32 %v1640_v46 }
0x11c0   :  { %v5008_v47 = vpop.eup %5007 }
0x11c1   :  { %v5010_v51 = vpop.eup %5009  ;;  %v1674_v56 = vmul.f32 %v5008_v47, %v1672_v55 }
0x11c2   :  { %v1647_v62 = vmul.f32 %v5010_v51, %v1645_v57  ;;  %v1984_v57 = vld [vmem:[#allocation6 + $0x8] sm:$0xff] }
0x1223   :  { %v1677_v48 = vpop.permute.xlu0 %1676 }
0x1224   :  { %v1679_v50 = vmul.f32 %v5008_v47, %v1677_v48 }
0x1225   :  { %v1650_v53 = vpop.permute.xlu1 %1649 }
0x1226   :  { %1681 = vrot.lane.b32.xlu0 %v1679_v50, %s5313_s29  ;;  %v1652_v54 = vmul.f32 %v5010_v51, %v1650_v53 }
0x1228   :  { %1654 = vrot.lane.b32.xlu1 %v1652_v54, %s5313_s29 }
0x1298   :  { %v1682_v59 = vpop.permute.xlu0 %1681 }
0x1299   :  { %v1684_v60 = vadd.f32 %v1682_v59, %v1674_v56  ;;  %v1986_v59 = vld [vmem:[#allocation6 + $0x18] sm:$0xff] }
0x129a   :  { %v1655_v63 = vpop.permute.xlu1 %1654 }
0x129b   :  { %5011 = vtanh.f32 %v1684_v60  ;;  %v1657_v2 = vadd.f32 %v1655_v63, %v1647_v62  ;;  %v1883_v45 = vrot.slane %v1684_v60, 2  ;;  %v1983_v60 = vld [vmem:[#allocation6] sm:$0xff]  ;;  %v4773_v62 = vpack.c.bf16 %v1986_v59, %v1984_v57  ;;  %v1988_v63 = vld [vmem:[#allocation6 + $0x28] sm:$0xff] }
0x129d   :  { %5013 = vtanh.f32 %v1657_v2  ;;  %v1856_v50 = vrot.slane %v1657_v2, 6  ;;  %v1990_v2 = vld [vmem:[#allocation6 + $0x38] sm:$0xff]  ;;  %4774 = vmatprep.subr.bf16.mxu1 %v4773_v62 }
0x12a5   :  { %v5012_v3 = vpop.eup %5011 }
0x12a6   :  { %1687 = vrot.lane.b32.xlu0 %v5012_v3, %s5314_s3  ;;  %v1987_v3 = vld [vmem:[#allocation6 + $0x20] sm:$0xff] }
0x12a7   :  { %v5014_v4 = vpop.eup %5013 }
0x12a8   :  { %1660 = vrot.lane.b32.xlu1 %v5014_v4, %s5314_s3  ;;  %v1992_v4 = vld [vmem:[#allocation6 + $0x48] sm:$0xff] }
0x1318   :  { %v1688_v5 = vpop.permute.xlu0 %1687 }
0x1319   :  { %v1690_v8 = vmul.f32 %v5008_v47, %v1688_v5  ;;  %v2095_v5 = vld [vmem:[#allocation8] sm:$0xff] }
0x131a   :  { %v1661_v7 = vpop.permute.xlu1 %1660 }
0x131b   :  { %v1772_v38 = vrot.slane %v1690_v8, 2  ;;  %v5756_v12 = vmul.f32 %v5010_v51, %v1661_v7 }
0x131d   :  { %1773 = vrot.lane.b32.xlu0 %v1772_v38, %s5313_s29  ;;  %v1692_v11 = vrot.slane %v5756_v12, 4 }
0x131f   :  { %1693 = vrot.lane.b32.xlu1 %v1692_v11, %s5313_s29  ;;  %v1991_v11 = vld [vmem:[#allocation6 + $0x40] sm:$0xff] }
0x138f   :  { %v1774_v15 = vpop.permute.xlu0 %1773 }
0x1390   :  { %4499 = vmatmul.mubr.msk.f32.vlgmr.msra.gmra.mrb[18].mxu0 %vm207_vm3, %v1774_v15  ;;  %v1993_v15 = vld [vmem:[#allocation6 + $0x50] sm:$0xff] }
0x1391   :  { %4509 = vmatprep.mubr.msk.f32.mxu0 %vm5312_vm0, %v5311_v1  ;;  %v1694_v14 = vpop.permute.xlu1 %1693 }
0x1392   :  { %4488 = vmatmul.mubr.msk.f32.vlgmr.msra.gmra.mrb[14].mxu1 %vm207_vm3, %v1694_v14  ;;  %v2097_v14 = vld [vmem:[#allocation8 + $0x10] sm:$0xff] }
0x1393   :  { %2082 = vmatprep.mubr.f32.mxu1 %v5311_v1 }
0x1463   :  { %v1843_v17 = vpop.f32.mrb[18].mxu0 }
0x1464   :  { %v1847_v18 = vadd.f32 %v1843_v17, %v5507_v30  ;;  %v4500_v21 = vpop.f32.mrb[19].mxu0  ;;  %v2098_v17 = vld [vmem:[#allocation8 + $0x18] sm:$0xff] }
0x1465   :  { %v1763_v22 = vpop.f32.mrb[14].mxu1  ;;  %v1998_v21 = vld [vmem:[#allocation6 + $0x78] sm:$0xff] }
0x1466   :  { %5015 = vtanh.f32 %v1847_v18  ;;  %v1768_v26 = vrot.slane %v1763_v22, 2  ;;  %v4489_v10 = vpop.f32.mrb[15].mxu1  ;;  %v4124_v34 = vmul.f32 -1.442695, %v1847_v18  ;;  %v1996_v18 = vld [vmem:[#allocation6 + $0x68] sm:$0xff]  ;;  %v5813_v22 = vpack.c.bf16 %v2098_v17, %v2097_v14 }
0x1467   :  { %v1997_v10 = vld [vmem:[#allocation6 + $0x70] sm:$0xff] }
0x1468   :  { %v1770_v28 = vadd.f32 %v1768_v26, %v5511_v33  ;;  %v1995_v26 = vld [vmem:[#allocation6 + $0x60] sm:$0xff] }
0x146a   :  { %5017 = vtanh.f32 %v1770_v28  ;;  %v4123_v35 = vmul.f32 -1.442695, %v1770_v28  ;;  %v4787_v28 = vpack.c.bf16 %v1997_v10, %v1995_v26 }
0x146b   :  { %5019 = vpow2.f32 %v4124_v34  ;;  %v2102_v34 = vld [vmem:[#allocation8 + $0x30] sm:$0xff] }
0x146c   :  { %5021 = vpow2.f32 %v4123_v35  ;;  %v2103_v35 = vld [vmem:[#allocation8 + $0x38] sm:$0xff] }
0x1470   :  { %v5016_v29 = vpop.eup %5015 }
0x1471   :  { %1887 = vrot.lane.b32.xlu0 %v5016_v29, %s5314_s3  ;;  %v2101_v29 = vld [vmem:[#allocation8 + $0x28] sm:$0xff] }
0x1474   :  { %v5018_v31 = vpop.eup %5017 }
0x1475   :  { %1860 = vrot.lane.b32.xlu1 %v5018_v31, %s5314_s3  ;;  %v5020_v36 = vpop.eup %5019 }
0x1476   :  { %v1878_v30 = vadd.f32 1.0, %v5020_v36  ;;  %v5022_v6 = vpop.eup %5021  ;;  %v5828_v36 = vpack.c.bf16 %v2103_v35, %v2102_v34  ;;  %v4128_v35 = vld [vmem:[%s6311_s10 + $0x4] sm:$0x3] }
0x1477   :  { %v1851_v39 = vadd.f32 1.0, %v5022_v6  ;;  %v4129_v6 = vld [vmem:[%s6310_s9 + $0x6] sm:$0x3] }
0x1478   :  { %5023 = vrcp.f32 %v1878_v30 }
0x1479   :  { %5025 = vrcp.f32 %v1851_v39 }
0x1482   :  { %v5770_v19 = vpop.eup %5023 }
0x1483   :  { %v5774_v13 = vpop.eup %5025  ;;  %v1885_v46 = vmul.f32 %v5770_v19, %v1883_v45 }
0x1484   :  { %v1858_v51 = vmul.f32 %v5774_v13, %v1856_v50 }
0x14e3   :  { %v1888_v33 = vpop.permute.xlu0 %1887 }
0x14e4   :  { %v1890_v42 = vmul.f32 %v5770_v19, %v1888_v33 }
0x14e6   :  { %1892 = vrot.lane.b32.xlu0 %v1890_v42, %s5313_s29 }
0x14e7   :  { %v1861_v43 = vpop.permute.xlu1 %1860 }
0x14e8   :  { %v1863_v44 = vmul.f32 %v5774_v13, %v1861_v43 }
0x14ea   :  { %1865 = vrot.lane.b32.xlu1 %v1863_v44, %s5313_s29 }
0x1558   :  { %v1893_v47 = vpop.permute.xlu0 %1892 }
0x1559   :  { %v5779_v48 = vadd.f32 %v1893_v47, %v1885_v46 }
0x155b   :  { %5027 = vtanh.f32 %v5779_v48 }
0x155c   :  { %v1866_v53 = vpop.permute.xlu1 %1865 }
0x155d   :  { %v5783_v54 = vadd.f32 %v1866_v53, %v1858_v51 }
0x155f   :  { %5029 = vtanh.f32 %v5783_v54 }
0x1565   :  { %v5028_v55 = vpop.eup %5027 }
0x1566   :  { %1898 = vrot.lane.b32.xlu0 %v5028_v55, %s5314_s3 }
0x1569   :  { %v5030_v56 = vpop.eup %5029 }
0x156a   :  { %1934 = vrot.lane.b32.xlu0 %v1690_v8, %s5314_s3  ;;  %1871 = vrot.lane.b32.xlu1 %v5030_v56, %s5314_s3  ;;  %v2096_v8 = vld [vmem:[#allocation8 + $0x8] sm:$0xff] }
0x156b   :  { %v5803_v38 = vpack.c.bf16 %v2096_v8, %v2095_v5 }
0x156d   :  { %4791 = vmatpush3.bf16.msra.mxu0 %v5803_v38 }
0x156e   :  { %1941 = vrot.lane.b32.xlu0 %v5725_v41, %s5314_s3  ;;  %1931 = vrot.lane.b32.xlu1 %v5576_v61, %s5313_s29  ;;  %v1985_v41 = vld [vmem:[#allocation6 + $0x10] sm:$0xff] }
0x156f   :  { %v4775_v61 = vpack.c.bf16 %v1985_v41, %v1983_v60  ;;  %4792 = vmatprep.subr.bf16.mxu0 %v5310_v0 }
0x1571   :  { %4776 = vmatpush1.bf16.msra.mxu1 %v4775_v61  ;;  %4794 = vmatpush3.bf16.msra.mxu0 %v5813_v22 }
0x1572   :  { %1948 = vrot.lane.b32.xlu0 %v5687_v25, %s5314_s3  ;;  %1938 = vrot.lane.b32.xlu1 %v5614_v52, %s5313_s29  ;;  %v4777_v25 = vpack.c.bf16 %v1990_v2, %v1988_v63  ;;  %v1989_v52 = vld [vmem:[#allocation6 + $0x30] sm:$0xff] }
0x1573   :  { %4795 = vmatprep.subr.bf16.mxu0 %v5310_v0 }
0x1574   :  { %4778 = vmatprep.subr.bf16.mxu1 %v4777_v25 }
0x1576   :  { %1957 = vrot.lane.b32.xlu0 %v5728_v20, %s5313_s29  ;;  %1945 = vrot.lane.b32.xlu1 %v5653_v40, %s5313_s29  ;;  %v1994_v20 = vld [vmem:[#allocation6 + $0x58] sm:$0xff]  ;;  %v4779_v40 = vpack.c.bf16 %v1989_v52, %v1987_v3 }
0x1577   :  { %v4781_v7 = vpack.c.bf16 %v1994_v20, %v1992_v4 }
0x1578   :  { %4780 = vmatpush1.bf16.msra.mxu1 %v4779_v40 }
0x1579   :  { %4782 = vmatprep.subr.bf16.mxu1 %v4781_v7 }
0x157a   :  { %1953 = vrot.lane.b32.xlu1 %v5649_v37, %s5314_s3  ;;  %v4783_v37 = vpack.c.bf16 %v1993_v15, %v1991_v11  ;;  %v1999_v11 = vld [vmem:[%s6307_s6] sm:$0x3] }
0x157b   :  { %v2004_v15 = vrot.slane %v1999_v11, %v93_v27 }
0x157c   :  { %4784 = vmatpush1.bf16.msra.mxu1 %v4783_v37  ;;  %v2008_v37 = vrot.slane %v1999_v11, %v97_v24  ;;  %v4130_v24 = vld [vmem:[%s6311_s10 + $0x6] sm:$0x3] }
0x157d   :  { %v2299_v34 = vrot.slane %v4130_v24, 2 }
0x157e   :  { %1960 = vrot.lane.b32.xlu1 %v5611_v49, %s5314_s3  ;;  %v4785_v49 = vpack.c.bf16 %v1998_v21, %v1996_v18 }
0x1580   :  { %4786 = vmatprep.subr.bf16.mxu1 %v4785_v49 }
0x1581   :  { %4788 = vmatpush1.bf16.msra.mxu1 %v4787_v28 }
0x1582   :  { %1967 = vrot.lane.b32.xlu1 %v5573_v58, %s5314_s3  ;;  %v2100_v58 = vld [vmem:[#allocation8 + $0x20] sm:$0xff]  ;;  %4801 = vmatprep.subr.bf16.mxu1 %v5310_v0 }
0x1583   :  { %v5817_v31 = vpack.c.bf16 %v2101_v29, %v2100_v58 }
0x1586   :  { %1971 = vrot.lane.b32.xlu1 %v5535_v9, %s5314_s3  ;;  %v4127_v9 = vld [vmem:[%s6310_s9 + $0x4] sm:$0x3] }
0x1587   :  { %4510 = vmatmul.mubr.msk.f32.vlgmr.msra.gmra.mrb[20].mxu0 %vm207_vm3, %v4127_v9 }
0x1588   :  { %4797 = vmatpush3.bf16.msra.mxu0 %v5817_v31  ;;  %4520 = vmatprep.mubr.msk.f32.mxu0 %vm5312_vm0, %v5311_v1 }
0x1589   :  { %4798 = vmatprep.subr.bf16.mxu0 %v5310_v0 }
0x158c   :  { %4800 = vmatpush3.bf16.msra.mxu0 %v5828_v36 }
0x158d   :  { %4807 = vmatprep.subr.bf16.mxu0 %v5310_v0 }
0x158f   :  { %4521 = vmatmul.mubr.msk.f32.vlgmr.msra.gmra.mrb[22].mxu0 %vm207_vm3, %v4129_v6 }
0x1590   :  { %4809 = vmatpush3.bf16.msra.mxu0 %v5817_v31  ;;  %4542 = vmatprep.mubr.msk.f32.mxu0 %vm5312_vm0, %v5311_v1 }
0x1591   :  { %4810 = vmatprep.subr.bf16.mxu0 %v5310_v0 }
0x1594   :  { %4812 = vmatpush3.bf16.msra.mxu0 %v5828_v36 }
0x1595   :  { %4819 = vmatprep.subr.bf16.mxu0 %v5310_v0 }
0x15d8   :  { %v1899_v30 = vpop.permute.xlu0 %1898 }
0x15d9   :  { %v5836_v39 = vmul.f32 %v5770_v19, %v1899_v30 }
0x15db   :  { %1927 = vrot.lane.b32.xlu0 %v5836_v39, %s5314_s3 }
0x15dc   :  { %v1872_v33 = vpop.permute.xlu1 %1871  ;;  %v1935_v43 = vpop.permute.xlu0 %1934 }
0x15dd   :  { %v1874_v19 = vmul.f32 %v5774_v13, %v1872_v33 }
0x15df   :  { %1964 = vrot.lane.b32.xlu0 %v5756_v12, %s5313_s29 }
0x15e0   :  { %v1932_v42 = vpop.permute.xlu1 %1931  ;;  %v1942_v45 = vpop.permute.xlu0 %1941 }
0x15e1   :  { %v1937_v12 = vsel %vm207_vm3, %v1932_v42, %v1935_v43 }
0x15e3   :  { %1903 = vrot.lane.b32.xlu0 %v1874_v19, %s5313_s29 }
0x15e4   :  { %v1939_v44 = vpop.permute.xlu1 %1938  ;;  %v1949_v47 = vpop.permute.xlu0 %1948 }
0x15e5   :  { %v1944_v13 = vsel %vm207_vm3, %v1939_v44, %v1942_v45 }
0x15e8   :  { %v1946_v46 = vpop.permute.xlu1 %1945  ;;  %v1958_v51 = vpop.permute.xlu0 %1957 }
0x15e9   :  { %v1951_v60 = vsel %vm207_vm3, %v1946_v46, %v1949_v47 }
0x15ec   :  { %v1954_v50 = vpop.permute.xlu1 %1953 }
0x15ed   :  { %v1956_v61 = vsel %vm207_vm3, %v5696_v32, %v1954_v50 }
0x15f0   :  { %v1961_v53 = vpop.permute.xlu1 %1960 }
0x15f1   :  { %v1963_v2 = vsel %vm207_vm3, %v1958_v51, %v1961_v53 }
0x15f2   :  { %v1980_v25 = vsel %vm1975_vm4, %v1956_v61, %v1963_v2 }
0x15f4   :  { %v1968_v57 = vpop.permute.xlu1 %1967 }
0x15f8   :  { %v1972_v3 = vpop.permute.xlu1 %1971 }
0x164d   :  { %v1928_v55 = vpop.permute.xlu0 %1927 }
0x164e   :  { %v1930_v56 = vsel %vm207_vm3, %v5541_v16, %v1928_v55 }
0x164f   :  { %v1976_v59 = vsel %vm1975_vm4, %v1930_v56, %v1937_v12 }
0x1650   :  { %v1977_v62 = vsel %vm110_vm1, %v1976_v59, %v1944_v13 }
0x1651   :  { %v1965_v41 = vpop.permute.xlu0 %1964  ;;  %v1979_v63 = vsel %vm1978_vm5, %v1977_v62, %v1951_v60 }
0x1652   :  { %4125 = vmatmul.mubr.msk.f32.vlgmr.msra.gmra.mrb[16].mxu1 %vm2011_vm6, %v1979_v63  ;;  %v1970_v16 = vsel %vm207_vm3, %v1965_v41, %v1968_v57 }
0x1653   :  { %2088 = vmatprep.mubr.f32.mxu1 %v5311_v1  ;;  %4803 = vmatpush3.bf16.msra.mxu1 %v5803_v38  ;;  %v1981_v4 = vsel %vm110_vm1, %v1980_v25, %v1970_v16 }
0x1654   :  { %4804 = vmatprep.subr.bf16.mxu1 %v5310_v0 }
0x1655   :  { %v1904_v52 = vpop.permute.xlu0 %1903 }
0x1656   :  { %1907 = vst.msk [vmem:[#allocation10 - $0x6] sm:$0xc0] %vm1906_vm7, %v1904_v52  ;;  %v1974_v20 = vsel %vm207_vm3, %v1904_v52, %v1972_v3 }
0x1657   :  { %v1982_v5 = vsel %vm1978_vm5, %v1981_v4, %v1974_v20  ;;  %4806 = vmatpush3.bf16.msra.mxu1 %v5813_v22 }
0x1658   :  { %4126 = vmatmul.mubr.msk.f32.gmra.mrb[18].mxu1 %vm2011_vm6, %v1982_v5  ;;  %4813 = vmatprep.subr.bf16.mxu1 %v5310_v0 }
0x1659   :  { %4531 = vmatprep.mubr.msk.f32.mxu1 %vm5312_vm0, %v5311_v1 }
0x165a   :  { %v2181_v32 = vpop.f32.mrb[20].mxu0 }
0x165b   :  { %v4511_v8 = vpop.f32.mrb[21].mxu0 }
0x1662   :  { %v2255_v40 = vpop.f32.mrb[22].mxu0 }
0x1663   :  { %v4522_v7 = vpop.f32.mrb[23].mxu0  ;;  %v2260_v10 = vrot.slane %v2255_v40, 2 }
0x1725   :  { %v2084_v14 = vpop.f32.mrb[16].mxu1 }
0x1726   :  { %v5884_v17 = vadd.f32 %v2084_v14, %v2004_v15  ;;  %v2086_v18 = vpop.f32.mrb[17].mxu1 }
0x1727   :  { %v5886_v21 = vadd.f32 %v2086_v18, %v2008_v37 }
0x1728   :  { %v2185_v49 = vadd.f32 %v2181_v32, %v5884_v17 }
0x172a   :  { %5031 = vtanh.f32 %v2185_v49  ;;  %v4133_v6 = vmul.f32 -1.442695, %v2185_v49 }
0x172b   :  { %v2090_v26 = vpop.f32.mrb[18].mxu1 }
0x172c   :  { %v5889_v28 = vadd.f32 %v2090_v26, %v2004_v15  ;;  %v2092_v58 = vpop.f32.mrb[19].mxu1 }
0x172d   :  { %v5891_v29 = vadd.f32 %v2092_v58, %v2008_v37 }
0x172f   :  { %v2262_v27 = vadd.f32 %v2260_v10, %v5891_v29 }
0x1731   :  { %5033 = vtanh.f32 %v2262_v27  ;;  %v4134_v30 = vmul.f32 -1.442695, %v2262_v27 }
0x1733   :  { %5035 = vpow2.f32 %v4134_v30 }
0x1734   :  { %v5032_v23 = vpop.eup %5031  ;;  %5037 = vpow2.f32 %v4133_v6 }
0x1735   :  { %2276 = vrot.lane.b32.xlu1 %v5032_v23, %s5314_s3 }
0x173b   :  { %v5034_v9 = vpop.eup %5033 }
0x173c   :  { %2305 = vrot.lane.b32.xlu0 %v5034_v9, %s5314_s3 }
0x173d   :  { %v5036_v33 = vpop.eup %5035 }
0x173e   :  { %v2294_v19 = vadd.f32 1.0, %v5036_v33  ;;  %v5038_v42 = vpop.eup %5037 }
0x173f   :  { %v2266_v43 = vadd.f32 1.0, %v5038_v42 }
0x1740   :  { %2300 = vrot.lane.b32.xlu0 %v2299_v34, %s5313_s29  ;;  %5039 = vrcp.f32 %v2294_v19 }
0x1741   :  { %5041 = vrcp.f32 %v2266_v43 }
0x1744   :  { %2271 = vrot.lane.b32.xlu0 %v4128_v35, %s5313_s29 }
0x174a   :  { %v5040_v44 = vpop.eup %5039 }
0x174b   :  { %v5042_v50 = vpop.eup %5041 }
0x17a7   :  { %v2277_v47 = vpop.permute.xlu1 %2276 }
0x17a8   :  { %v2279_v51 = vmul.f32 %v5042_v50, %v2277_v47 }
0x17ae   :  { %v2306_v45 = vpop.permute.xlu0 %2305 }
0x17af   :  { %v2308_v46 = vmul.f32 %v5040_v44, %v2306_v45 }
0x17b1   :  { %2310 = vrot.lane.b32.xlu1 %v2308_v46, %s5313_s29 }
0x17b2   :  { %v2301_v53 = vpop.permute.xlu0 %2300 }
0x17b3   :  { %v2303_v55 = vmul.f32 %v5040_v44, %v2301_v53 }
0x17b5   :  { %2281 = vrot.lane.b32.xlu1 %v2279_v51, %s5313_s29 }
0x17b6   :  { %v2272_v12 = vpop.permute.xlu0 %2271 }
0x17b7   :  { %v2274_v57 = vmul.f32 %v5042_v50, %v2272_v12 }
0x1823   :  { %v2311_v56 = vpop.permute.xlu1 %2310 }
0x1824   :  { %v5906_v13 = vadd.f32 %v2311_v56, %v2303_v55 }
0x1826   :  { %5043 = vtanh.f32 %v5906_v13  ;;  %v2514_v30 = vrot.slane %v5906_v13, 2 }
0x1827   :  { %v2282_v59 = vpop.permute.xlu1 %2281 }
0x1828   :  { %v5909_v60 = vadd.f32 %v2282_v59, %v2274_v57 }
0x182a   :  { %5045 = vtanh.f32 %v5909_v60  ;;  %v2487_v33 = vrot.slane %v5909_v60, 6 }
0x1830   :  { %v5044_v62 = vpop.eup %5043 }
0x1831   :  { %2316 = vrot.lane.b32.xlu0 %v5044_v62, %s5314_s3 }
0x1834   :  { %v5046_v41 = vpop.eup %5045 }
0x1835   :  { %2287 = vrot.lane.b32.xlu1 %v5046_v41, %s5314_s3 }
0x18a3   :  { %v2317_v63 = vpop.permute.xlu0 %2316 }
0x18a4   :  { %v5914_v2 = vmul.f32 %v5040_v44, %v2317_v63 }
0x18a6   :  { %v2400_v16 = vrot.slane %v5914_v2, 6 }
0x18a7   :  { %v2288_v61 = vpop.permute.xlu1 %2287 }
0x18a8   :  { %v2290_v25 = vmul.f32 %v5042_v50, %v2288_v61  ;;  %2401 = vrot.lane.b32.xlu0 %v2400_v16, %s5313_s29 }
0x18aa   :  { %2321 = vrot.lane.b32.xlu1 %v2290_v25, %s5313_s29 }
0x191a   :  { %v2402_v3 = vpop.permute.xlu0 %2401 }
0x191b   :  { %4543 = vmatmul.mubr.msk.f32.vlgmr.msra.gmra.mrb[24].mxu0 %vm207_vm3, %v2402_v3 }
0x191c   :  { %v5920_v52 = vpop.permute.xlu1 %2321  ;;  %4821 = vmatpush3.bf16.msra.mxu0 %v5817_v31  ;;  %4564 = vmatprep.mubr.msk.f32.mxu0 %vm5312_vm0, %v5311_v1 }
0x191d   :  { %4532 = vmatmul.mubr.msk.f32.vlgmr.msra.gmra.mrb[20].mxu1 %vm207_vm3, %v5920_v52  ;;  %4822 = vmatprep.subr.bf16.mxu0 %v5310_v0 }
0x191e   :  { %4815 = vmatpush3.bf16.msra.mxu1 %v5803_v38  ;;  %4553 = vmatprep.mubr.msk.f32.mxu1 %vm5312_vm0, %v5311_v1 }
0x191f   :  { %4816 = vmatprep.subr.bf16.mxu1 %v5310_v0 }
0x1920   :  { %4824 = vmatpush3.bf16.msra.mxu0 %v5828_v36 }
0x1921   :  { %4831 = vmatprep.subr.bf16.mxu0 %v5310_v0 }
0x1922   :  { %4818 = vmatpush3.bf16.msra.mxu1 %v5813_v22 }
0x1923   :  { %4825 = vmatprep.subr.bf16.mxu1 %v5310_v0 }
0x19ee   :  { %v2471_v4 = vpop.f32.mrb[24].mxu0 }
0x19ef   :  { %v2476_v20 = vrot.slane %v2471_v4, 4  ;;  %v4544_v5 = vpop.f32.mrb[25].mxu0 }
0x19f0   :  { %v2391_v32 = vpop.f32.mrb[20].mxu1 }
0x19f1   :  { %v2478_v8 = vadd.f32 %v2476_v20, %v5891_v29  ;;  %v2396_v40 = vrot.slane %v2391_v32, 6  ;;  %v4533_v7 = vpop.f32.mrb[21].mxu1 }
0x19f3   :  { %5047 = vtanh.f32 %v2478_v8  ;;  %v2398_v11 = vadd.f32 %v2396_v40, %v5884_v17  ;;  %v4138_v14 = vmul.f32 -1.442695, %v2478_v8 }
0x19f5   :  { %5049 = vtanh.f32 %v2398_v11  ;;  %v4137_v18 = vmul.f32 -1.442695, %v2398_v11 }
0x19f6   :  { %5051 = vpow2.f32 %v4138_v14 }
0x19f7   :  { %5053 = vpow2.f32 %v4137_v18 }
0x19fd   :  { %v5048_v15 = vpop.eup %5047 }
0x19fe   :  { %2518 = vrot.lane.b32.xlu0 %v5048_v15, %s5314_s3 }
0x19ff   :  { %v5050_v37 = vpop.eup %5049 }
0x1a00   :  { %2491 = vrot.lane.b32.xlu1 %v5050_v37, %s5314_s3  ;;  %v5052_v49 = vpop.eup %5051 }
0x1a01   :  { %v5054_v26 = vpop.eup %5053  ;;  %v2509_v10 = vadd.f32 1.0, %v5052_v49 }
0x1a02   :  { %v2482_v58 = vadd.f32 1.0, %v5054_v26 }
0x1a03   :  { %5055 = vrcp.f32 %v2509_v10 }
0x1a04   :  { %5057 = vrcp.f32 %v2482_v58 }
0x1a0d   :  { %v5056_v27 = vpop.eup %5055 }
0x1a0e   :  { %v5058_v9 = vpop.eup %5057  ;;  %v2516_v6 = vmul.f32 %v5056_v27, %v2514_v30 }
0x1a0f   :  { %v2489_v43 = vmul.f32 %v5058_v9, %v2487_v33 }
0x1a70   :  { %v2519_v23 = vpop.permute.xlu0 %2518 }
0x1a71   :  { %v2521_v24 = vmul.f32 %v5056_v27, %v2519_v23 }
0x1a72   :  { %v2492_v34 = vpop.permute.xlu1 %2491 }
0x1a73   :  { %2523 = vrot.lane.b32.xlu0 %v2521_v24, %s5313_s29  ;;  %v2494_v35 = vmul.f32 %v5058_v9, %v2492_v34 }
0x1a75   :  { %2496 = vrot.lane.b32.xlu1 %v2494_v35, %s5313_s29 }
0x1ae5   :  { %v2524_v19 = vpop.permute.xlu0 %2523 }
0x1ae6   :  { %v5944_v42 = vadd.f32 %v2524_v19, %v2516_v6 }
0x1ae7   :  { %v2497_v44 = vpop.permute.xlu1 %2496 }
0x1ae8   :  { %5059 = vtanh.f32 %v5944_v42  ;;  %v5947_v45 = vadd.f32 %v2497_v44, %v2489_v43  ;;  %v2728_v26 = vrot.slane %v5944_v42, 2 }
0x1aea   :  { %5061 = vtanh.f32 %v5947_v45  ;;  %v2701_v58 = vrot.slane %v5947_v45, 6 }
0x1af2   :  { %v5060_v46 = vpop.eup %5059 }
0x1af3   :  { %2529 = vrot.lane.b32.xlu0 %v5060_v46, %s5314_s3 }
0x1af4   :  { %v5062_v47 = vpop.eup %5061 }
0x1af5   :  { %2502 = vrot.lane.b32.xlu1 %v5062_v47, %s5314_s3 }
0x1b65   :  { %v2530_v50 = vpop.permute.xlu0 %2529 }
0x1b66   :  { %v5952_v51 = vmul.f32 %v5056_v27, %v2530_v50 }
0x1b67   :  { %v2503_v55 = vpop.permute.xlu1 %2502 }
0x1b68   :  { %v2614_v53 = vrot.slane %v5952_v51, 4  ;;  %v5955_v12 = vmul.f32 %v5058_v9, %v2503_v55 }
0x1b6a   :  { %2615 = vrot.lane.b32.xlu0 %v2614_v53, %s5313_s29  ;;  %v2534_v56 = vrot.slane %v5955_v12, 2 }
0x1b6c   :  { %2535 = vrot.lane.b32.xlu1 %v2534_v56, %s5313_s29 }
0x1bdc   :  { %v2616_v13 = vpop.permute.xlu0 %2615 }
0x1bdd   :  { %4565 = vmatmul.mubr.msk.f32.vlgmr.msra.gmra.mrb[26].mxu0 %vm207_vm3, %v2616_v13 }
0x1bde   :  { %4833 = vmatpush3.bf16.msra.mxu0 %v5817_v31  ;;  %4586 = vmatprep.mubr.msk.f32.mxu0 %vm5312_vm0, %v5311_v1  ;;  %v2536_v57 = vpop.permute.xlu1 %2535 }
0x1bdf   :  { %4834 = vmatprep.subr.bf16.mxu0 %v5310_v0  ;;  %4554 = vmatmul.mubr.msk.f32.vlgmr.msra.gmra.mrb[22].mxu1 %vm207_vm3, %v2536_v57 }
0x1be0   :  { %4827 = vmatpush3.bf16.msra.mxu1 %v5803_v38  ;;  %4575 = vmatprep.mubr.msk.f32.mxu1 %vm5312_vm0, %v5311_v1 }
0x1be1   :  { %4828 = vmatprep.subr.bf16.mxu1 %v5310_v0 }
0x1be2   :  { %4836 = vmatpush3.bf16.msra.mxu0 %v5828_v36 }
0x1be3   :  { %4843 = vmatprep.subr.bf16.mxu0 %v5310_v0 }
0x1be4   :  { %4830 = vmatpush3.bf16.msra.mxu1 %v5813_v22 }
0x1be5   :  { %4837 = vmatprep.subr.bf16.mxu1 %v5310_v0 }
0x1cb0   :  { %v2685_v59 = vpop.f32.mrb[26].mxu0 }
0x1cb1   :  { %v2690_v60 = vrot.slane %v2685_v59, 6  ;;  %v4566_v62 = vpop.f32.mrb[27].mxu0 }
0x1cb2   :  { %v2605_v63 = vpop.f32.mrb[22].mxu1 }
0x1cb3   :  { %v2692_v41 = vadd.f32 %v2690_v60, %v5891_v29  ;;  %v2610_v16 = vrot.slane %v2605_v63, 4  ;;  %v4555_v61 = vpop.f32.mrb[23].mxu1 }
0x1cb5   :  { %5063 = vtanh.f32 %v2692_v41  ;;  %v2612_v25 = vadd.f32 %v2610_v16, %v5884_v17  ;;  %v4142_v20 = vmul.f32 -1.442695, %v2692_v41 }
0x1cb7   :  { %5065 = vtanh.f32 %v2612_v25  ;;  %v4141_v5 = vmul.f32 -1.442695, %v2612_v25 }
0x1cb8   :  { %5067 = vpow2.f32 %v4142_v20 }
0x1cb9   :  { %5069 = vpow2.f32 %v4141_v5 }
0x1cbf   :  { %v5064_v3 = vpop.eup %5063 }
0x1cc0   :  { %2732 = vrot.lane.b32.xlu0 %v5064_v3, %s5314_s3 }
0x1cc1   :  { %v5066_v4 = vpop.eup %5065 }
0x1cc2   :  { %2705 = vrot.lane.b32.xlu1 %v5066_v4, %s5314_s3  ;;  %v5068_v32 = vpop.eup %5067 }
0x1cc3   :  { %v5070_v8 = vpop.eup %5069  ;;  %v2723_v40 = vadd.f32 1.0, %v5068_v32 }
0x1cc4   :  { %v2696_v7 = vadd.f32 1.0, %v5070_v8 }
0x1cc5   :  { %5071 = vrcp.f32 %v2723_v40 }
0x1cc6   :  { %5073 = vrcp.f32 %v2696_v7 }
0x1ccf   :  { %v5072_v11 = vpop.eup %5071 }
0x1cd0   :  { %v5074_v14 = vpop.eup %5073  ;;  %v2730_v10 = vmul.f32 %v5072_v11, %v2728_v26 }
0x1cd1   :  { %v2703_v24 = vmul.f32 %v5074_v14, %v2701_v58 }
0x1d32   :  { %v2733_v15 = vpop.permute.xlu0 %2732 }
0x1d33   :  { %v2735_v37 = vmul.f32 %v5072_v11, %v2733_v15 }
0x1d34   :  { %v2706_v18 = vpop.permute.xlu1 %2705 }
0x1d35   :  { %2737 = vrot.lane.b32.xlu0 %v2735_v37, %s5313_s29  ;;  %v2708_v49 = vmul.f32 %v5074_v14, %v2706_v18 }
0x1d37   :  { %2710 = vrot.lane.b32.xlu1 %v2708_v49, %s5313_s29 }
0x1da7   :  { %v2738_v27 = vpop.permute.xlu0 %2737 }
0x1da8   :  { %v5982_v23 = vadd.f32 %v2738_v27, %v2730_v10 }
0x1da9   :  { %v2711_v9 = vpop.permute.xlu1 %2710 }
0x1daa   :  { %5075 = vtanh.f32 %v5982_v23  ;;  %v5985_v34 = vadd.f32 %v2711_v9, %v2703_v24  ;;  %v2939_v32 = vrot.slane %v5982_v23, 2 }
0x1dac   :  { %5077 = vtanh.f32 %v5985_v34 }
0x1db4   :  { %v5076_v35 = vpop.eup %5075 }
0x1db5   :  { %2743 = vrot.lane.b32.xlu0 %v5076_v35, %s5314_s3 }
0x1db6   :  { %v5078_v30 = vpop.eup %5077 }
0x1db7   :  { %2716 = vrot.lane.b32.xlu1 %v5078_v30, %s5314_s3 }
0x1e27   :  { %v2744_v6 = vpop.permute.xlu0 %2743 }
0x1e28   :  { %v5990_v33 = vmul.f32 %v5072_v11, %v2744_v6  ;;  %v2912_v11 = vrot.slane %v5985_v34, 6 }
0x1e29   :  { %v2717_v42 = vpop.permute.xlu1 %2716 }
0x1e2a   :  { %v2828_v19 = vrot.slane %v5990_v33, 2  ;;  %v5993_v43 = vmul.f32 %v5074_v14, %v2717_v42 }
0x1e2c   :  { %2829 = vrot.lane.b32.xlu0 %v2828_v19, %s5313_s29  ;;  %v2748_v44 = vrot.slane %v5993_v43, 4 }
0x1e2e   :  { %2749 = vrot.lane.b32.xlu1 %v2748_v44, %s5313_s29 }
0x1e9e   :  { %v2830_v45 = vpop.permute.xlu0 %2829 }
0x1e9f   :  { %4587 = vmatmul.mubr.msk.f32.vlgmr.msra.gmra.mrb[28].mxu0 %vm207_vm3, %v2830_v45 }
0x1ea0   :  { %4845 = vmatpush3.bf16.msra.mxu0 %v5817_v31  ;;  %4608 = vmatprep.mubr.msk.f32.mxu0 %vm5312_vm0, %v5311_v1  ;;  %v2750_v46 = vpop.permute.xlu1 %2749 }
0x1ea1   :  { %4846 = vmatprep.subr.bf16.mxu0 %v5310_v0  ;;  %4576 = vmatmul.mubr.msk.f32.vlgmr.msra.gmra.mrb[24].mxu1 %vm207_vm3, %v2750_v46 }
0x1ea2   :  { %4839 = vmatpush3.bf16.msra.mxu1 %v5803_v38  ;;  %4597 = vmatprep.mubr.msk.f32.mxu1 %vm5312_vm0, %v5311_v1 }
0x1ea3   :  { %4840 = vmatprep.subr.bf16.mxu1 %v5310_v0 }
0x1ea4   :  { %4848 = vmatpush3.bf16.msra.mxu0 %v5828_v36 }
0x1ea5   :  { %4855 = vmatprep.subr.bf16.mxu0 %v5310_v0 }
0x1ea6   :  { %4842 = vmatpush3.bf16.msra.mxu1 %v5813_v22 }
0x1ea7   :  { %4849 = vmatprep.subr.bf16.mxu1 %v5310_v0 }
0x1f72   :  { %v2899_v47 = vpop.f32.mrb[28].mxu0 }
0x1f73   :  { %v2903_v50 = vadd.f32 %v2899_v47, %v5891_v29  ;;  %v4588_v53 = vpop.f32.mrb[29].mxu0 }
0x1f74   :  { %v2819_v55 = vpop.f32.mrb[24].mxu1 }
0x1f75   :  { %5079 = vtanh.f32 %v2903_v50  ;;  %v2824_v56 = vrot.slane %v2819_v55, 2  ;;  %v4577_v13 = vpop.f32.mrb[25].mxu1  ;;  %v4146_v62 = vmul.f32 -1.442695, %v2903_v50 }
0x1f77   :  { %v2826_v57 = vadd.f32 %v2824_v56, %v5884_v17 }
0x1f79   :  { %5081 = vtanh.f32 %v2826_v57  ;;  %v4145_v41 = vmul.f32 -1.442695, %v2826_v57 }
0x1f7a   :  { %5083 = vpow2.f32 %v4146_v62 }
0x1f7b   :  { %5085 = vpow2.f32 %v4145_v41 }
0x1f7f   :  { %v5080_v59 = vpop.eup %5079 }
0x1f80   :  { %2943 = vrot.lane.b32.xlu0 %v5080_v59, %s5314_s3 }
0x1f83   :  { %v5082_v60 = vpop.eup %5081 }
0x1f84   :  { %2916 = vrot.lane.b32.xlu1 %v5082_v60, %s5314_s3  ;;  %v5084_v63 = vpop.eup %5083 }
0x1f85   :  { %v2934_v29 = vadd.f32 1.0, %v5084_v63  ;;  %v5086_v16 = vpop.eup %5085 }
0x1f86   :  { %v2907_v61 = vadd.f32 1.0, %v5086_v16 }
0x1f87   :  { %5087 = vrcp.f32 %v2934_v29 }
0x1f88   :  { %5089 = vrcp.f32 %v2907_v61 }
0x1f91   :  { %v5088_v25 = vpop.eup %5087 }
0x1f92   :  { %v5090_v4 = vpop.eup %5089  ;;  %v2941_v8 = vmul.f32 %v5088_v25, %v2939_v32 }
0x1f93   :  { %v2914_v15 = vmul.f32 %v5090_v4, %v2912_v11 }
0x1ff2   :  { %v2944_v3 = vpop.permute.xlu0 %2943 }
0x1ff3   :  { %v2946_v17 = vmul.f32 %v5088_v25, %v2944_v3 }
0x1ff5   :  { %2948 = vrot.lane.b32.xlu0 %v2946_v17, %s5313_s29 }
0x1ff6   :  { %v2917_v20 = vpop.permute.xlu1 %2916 }
0x1ff7   :  { %v2919_v5 = vmul.f32 %v5090_v4, %v2917_v20 }
0x1ff9   :  { %2921 = vrot.lane.b32.xlu1 %v2919_v5, %s5313_s29 }
0x2067   :  { %v2949_v40 = vpop.permute.xlu0 %2948 }
0x2068   :  { %v6019_v7 = vadd.f32 %v2949_v40, %v2941_v8 }
0x206a   :  { %5091 = vtanh.f32 %v6019_v7  ;;  %v3149_v29 = vrot.slane %v6019_v7, 2 }
0x206b   :  { %v2922_v37 = vpop.permute.xlu1 %2921 }
0x206c   :  { %v6023_v14 = vadd.f32 %v2922_v37, %v2914_v15 }
0x206e   :  { %5093 = vtanh.f32 %v6023_v14  ;;  %v3122_v3 = vrot.slane %v6023_v14, 6 }
0x2074   :  { %v5092_v18 = vpop.eup %5091 }
0x2075   :  { %2954 = vrot.lane.b32.xlu0 %v5092_v18, %s5314_s3 }
0x2078   :  { %v5094_v49 = vpop.eup %5093 }
0x2079   :  { %2927 = vrot.lane.b32.xlu1 %v5094_v49, %s5314_s3 }
0x20e7   :  { %v2955_v26 = vpop.permute.xlu0 %2954 }
0x20e8   :  { %v6028_v10 = vmul.f32 %v5088_v25, %v2955_v26 }
0x20ea   :  { %3036 = vrot.lane.b32.xlu0 %v6028_v10, %s5313_s29 }
0x20eb   :  { %v2928_v58 = vpop.permute.xlu1 %2927 }
0x20ec   :  { %v6032_v27 = vmul.f32 %v5090_v4, %v2928_v58 }
0x20ee   :  { %v2959_v23 = vrot.slane %v6032_v27, 6 }
0x20f0   :  { %2960 = vrot.lane.b32.xlu1 %v2959_v23, %s5313_s29 }
0x215c   :  { %v3037_v24 = vpop.permute.xlu0 %3036 }
0x215d   :  { %4609 = vmatmul.mubr.msk.f32.vlgmr.msra.gmra.mrb[30].mxu0 %vm207_vm3, %v3037_v24 }
0x215e   :  { %4857 = vmatpush3.bf16.msra.mxu0 %v5817_v31  ;;  %4630 = vmatprep.mubr.msk.f32.mxu0 %vm5312_vm0, %v5311_v1 }
0x215f   :  { %4858 = vmatprep.subr.bf16.mxu0 %v5310_v0 }
0x2162   :  { %4860 = vmatpush3.bf16.msra.mxu0 %v5828_v36  ;;  %v2961_v9 = vpop.permute.xlu1 %2960 }
0x2163   :  { %4867 = vmatprep.subr.bf16.mxu0 %v5310_v0  ;;  %4598 = vmatmul.mubr.msk.f32.vlgmr.msra.gmra.mrb[26].mxu1 %vm207_vm3, %v2961_v9 }
0x2164   :  { %4851 = vmatpush3.bf16.msra.mxu1 %v5803_v38  ;;  %4619 = vmatprep.mubr.msk.f32.mxu1 %vm5312_vm0, %v5311_v1 }
0x2165   :  { %4852 = vmatprep.subr.bf16.mxu1 %v5310_v0 }
0x2168   :  { %4854 = vmatpush3.bf16.msra.mxu1 %v5813_v22 }
0x2169   :  { %4861 = vmatprep.subr.bf16.mxu1 %v5310_v0 }
0x2230   :  { %v3106_v34 = vpop.f32.mrb[30].mxu0 }
0x2231   :  { %v3111_v35 = vrot.slane %v3106_v34, 2  ;;  %v4610_v30 = vpop.f32.mrb[31].mxu0 }
0x2233   :  { %v3113_v6 = vadd.f32 %v3111_v35, %v5886_v21 }
0x2235   :  { %5095 = vtanh.f32 %v3113_v6  ;;  %v4150_v47 = vmul.f32 -1.442695, %v3113_v6 }
0x2236   :  { %v3030_v19 = vpop.f32.mrb[26].mxu1 }
0x2237   :  { %v3034_v42 = vadd.f32 %v3030_v19, %v5889_v28  ;;  %v4599_v44 = vpop.f32.mrb[27].mxu1 }
0x2239   :  { %5097 = vtanh.f32 %v3034_v42  ;;  %v4149_v50 = vmul.f32 -1.442695, %v3034_v42 }
0x223a   :  { %5099 = vpow2.f32 %v4150_v47 }
0x223b   :  { %5101 = vpow2.f32 %v4149_v50 }
0x223f   :  { %v5096_v45 = vpop.eup %5095 }
0x2240   :  { %3153 = vrot.lane.b32.xlu0 %v5096_v45, %s5314_s3 }
0x2243   :  { %v5098_v46 = vpop.eup %5097 }
0x2244   :  { %3126 = vrot.lane.b32.xlu1 %v5098_v46, %s5314_s3  ;;  %v5100_v53 = vpop.eup %5099 }
0x2245   :  { %v3144_v55 = vadd.f32 1.0, %v5100_v53  ;;  %v5102_v56 = vpop.eup %5101 }
0x2246   :  { %v3117_v13 = vadd.f32 1.0, %v5102_v56 }
0x2247   :  { %5103 = vrcp.f32 %v3144_v55 }
0x2248   :  { %5105 = vrcp.f32 %v3117_v13 }
0x2251   :  { %v5104_v57 = vpop.eup %5103 }
0x2252   :  { %v5106_v62 = vpop.eup %5105  ;;  %v3151_v16 = vmul.f32 %v5104_v57, %v3149_v29 }
0x2253   :  { %v3124_v17 = vmul.f32 %v5106_v62, %v3122_v3 }
0x22b2   :  { %v3154_v59 = vpop.permute.xlu0 %3153 }
0x22b3   :  { %v3156_v60 = vmul.f32 %v5104_v57, %v3154_v59 }
0x22b5   :  { %3158 = vrot.lane.b32.xlu0 %v3156_v60, %s5313_s29 }
0x22b6   :  { %v3127_v41 = vpop.permute.xlu1 %3126 }
0x22b7   :  { %v3129_v63 = vmul.f32 %v5106_v62, %v3127_v41 }
0x22b9   :  { %3131 = vrot.lane.b32.xlu1 %v3129_v63, %s5313_s29 }
0x2327   :  { %v3159_v61 = vpop.permute.xlu0 %3158 }
0x2328   :  { %v6057_v25 = vadd.f32 %v3159_v61, %v3151_v16 }
0x232a   :  { %5107 = vtanh.f32 %v6057_v25 }
0x232b   :  { %v3132_v4 = vpop.permute.xlu1 %3131 }
0x232c   :  { %v6061_v20 = vadd.f32 %v3132_v4, %v3124_v17 }
0x232e   :  { %5109 = vtanh.f32 %v6061_v20  ;;  %v3335_v60 = vrot.slane %v6061_v20, 6 }
0x2334   :  { %v5108_v5 = vpop.eup %5107 }
0x2335   :  { %3164 = vrot.lane.b32.xlu0 %v5108_v5, %s5314_s3 }
0x2338   :  { %v5110_v32 = vpop.eup %5109 }
0x2339   :  { %3137 = vrot.lane.b32.xlu1 %v5110_v32, %s5314_s3 }
0x23a7   :  { %v3165_v8 = vpop.permute.xlu0 %3164 }
0x23a8   :  { %v6066_v40 = vmul.f32 %v5104_v57, %v3165_v8  ;;  %v3362_v57 = vrot.slane %v6057_v25, 2 }
0x23aa   :  { %v3248_v7 = vrot.slane %v6066_v40, 6 }
0x23ab   :  { %v3138_v11 = vpop.permute.xlu1 %3137 }
0x23ac   :  { %3249 = vrot.lane.b32.xlu0 %v3248_v7, %s5313_s29  ;;  %v3140_v15 = vmul.f32 %v5106_v62, %v3138_v11 }
0x23ae   :  { %3169 = vrot.lane.b32.xlu1 %v3140_v15, %s5313_s29 }
0x241e   :  { %v3250_v37 = vpop.permute.xlu0 %3249 }
0x241f   :  { %4631 = vmatmul.mubr.msk.f32.vlgmr.msra.gmra.mrb[32].mxu0 %vm207_vm3, %v3250_v37 }
0x2420   :  { %4869 = vmatpush3.bf16.msra.mxu0 %v5817_v31  ;;  %4652 = vmatprep.mubr.msk.f32.mxu0 %vm5312_vm0, %v5311_v1  ;;  %v6075_v14 = vpop.permute.xlu1 %3169 }
0x2421   :  { %4870 = vmatprep.subr.bf16.mxu0 %v5310_v0  ;;  %4620 = vmatmul.mubr.msk.f32.vlgmr.msra.gmra.mrb[28].mxu1 %vm207_vm3, %v6075_v14 }
0x2422   :  { %4863 = vmatpush3.bf16.msra.mxu1 %v5803_v38  ;;  %4641 = vmatprep.mubr.msk.f32.mxu1 %vm5312_vm0, %v5311_v1 }
0x2423   :  { %4864 = vmatprep.subr.bf16.mxu1 %v5310_v0 }
0x2424   :  { %4872 = vmatpush3.bf16.msra.mxu0 %v5828_v36 }
0x2425   :  { %4879 = vmatprep.subr.bf16.mxu0 %v5310_v0 }
0x2426   :  { %4866 = vmatpush3.bf16.msra.mxu1 %v5813_v22 }
0x2427   :  { %4873 = vmatprep.subr.bf16.mxu1 %v5310_v0 }
0x24f2   :  { %v3319_v18 = vpop.f32.mrb[32].mxu0 }
0x24f3   :  { %v3324_v49 = vrot.slane %v3319_v18, 4  ;;  %v4632_v26 = vpop.f32.mrb[33].mxu0 }
0x24f4   :  { %v3239_v23 = vpop.f32.mrb[28].mxu1 }
0x24f5   :  { %v3326_v58 = vadd.f32 %v3324_v49, %v5886_v21  ;;  %v3244_v24 = vrot.slane %v3239_v23, 6  ;;  %v4621_v9 = vpop.f32.mrb[29].mxu1 }
0x24f7   :  { %5111 = vtanh.f32 %v3326_v58  ;;  %v3246_v34 = vadd.f32 %v3244_v24, %v5889_v28  ;;  %v4154_v6 = vmul.f32 -1.442695, %v3326_v58 }
0x24f9   :  { %5113 = vtanh.f32 %v3246_v34  ;;  %v4153_v19 = vmul.f32 -1.442695, %v3246_v34 }
0x24fa   :  { %5115 = vpow2.f32 %v4154_v6 }
0x24fb   :  { %5117 = vpow2.f32 %v4153_v19 }
0x2501   :  { %v5112_v35 = vpop.eup %5111 }
0x2502   :  { %3366 = vrot.lane.b32.xlu0 %v5112_v35, %s5314_s3 }
0x2503   :  { %v5114_v30 = vpop.eup %5113 }
0x2504   :  { %3339 = vrot.lane.b32.xlu1 %v5114_v30, %s5314_s3  ;;  %v5116_v42 = vpop.eup %5115 }
0x2505   :  { %v5118_v44 = vpop.eup %5117  ;;  %v3357_v45 = vadd.f32 1.0, %v5116_v42 }
0x2506   :  { %v3330_v46 = vadd.f32 1.0, %v5118_v44 }
0x2507   :  { %5119 = vrcp.f32 %v3357_v45 }
0x2508   :  { %5121 = vrcp.f32 %v3330_v46 }
0x2511   :  { %v5120_v47 = vpop.eup %5119 }
0x2512   :  { %v5122_v55 = vpop.eup %5121  ;;  %v3364_v59 = vmul.f32 %v5120_v47, %v3362_v57 }
0x2513   :  { %v3337_v63 = vmul.f32 %v5122_v55, %v3335_v60 }
0x2574   :  { %v3367_v50 = vpop.permute.xlu0 %3366 }
0x2575   :  { %v3369_v53 = vmul.f32 %v5120_v47, %v3367_v50 }
0x2576   :  { %v3340_v56 = vpop.permute.xlu1 %3339 }
0x2577   :  { %3371 = vrot.lane.b32.xlu0 %v3369_v53, %s5313_s29  ;;  %v3342_v13 = vmul.f32 %v5122_v55, %v3340_v56 }
0x2579   :  { %3344 = vrot.lane.b32.xlu1 %v3342_v13, %s5313_s29 }
0x25e9   :  { %v3372_v62 = vpop.permute.xlu0 %3371 }
0x25ea   :  { %v6096_v41 = vadd.f32 %v3372_v62, %v3364_v59 }
0x25eb   :  { %v3345_v29 = vpop.permute.xlu1 %3344 }
0x25ec   :  { %5123 = vtanh.f32 %v6096_v41  ;;  %v6099_v16 = vadd.f32 %v3345_v29, %v3337_v63  ;;  %v3576_v44 = vrot.slane %v6096_v41, 2 }
0x25ee   :  { %5125 = vtanh.f32 %v6099_v16  ;;  %v3549_v46 = vrot.slane %v6099_v16, 6 }
0x25f6   :  { %v5124_v61 = vpop.eup %5123 }
0x25f7   :  { %3377 = vrot.lane.b32.xlu0 %v5124_v61, %s5314_s3 }
0x25f8   :  { %v5126_v3 = vpop.eup %5125 }
0x25f9   :  { %3350 = vrot.lane.b32.xlu1 %v5126_v3, %s5314_s3 }
0x2669   :  { %v3378_v25 = vpop.permute.xlu0 %3377 }
0x266a   :  { %v6104_v17 = vmul.f32 %v5120_v47, %v3378_v25 }
0x266b   :  { %v3351_v20 = vpop.permute.xlu1 %3350 }
0x266c   :  { %v3462_v4 = vrot.slane %v6104_v17, 4  ;;  %v6107_v5 = vmul.f32 %v5122_v55, %v3351_v20 }
0x266e   :  { %3463 = vrot.lane.b32.xlu0 %v3462_v4, %s5313_s29  ;;  %v3382_v32 = vrot.slane %v6107_v5, 2 }
0x2670   :  { %3383 = vrot.lane.b32.xlu1 %v3382_v32, %s5313_s29 }
0x26e0   :  { %v3464_v8 = vpop.permute.xlu0 %3463 }
0x26e1   :  { %4653 = vmatmul.mubr.msk.f32.vlgmr.msra.gmra.mrb[34].mxu0 %vm207_vm3, %v3464_v8 }
0x26e2   :  { %4881 = vmatpush3.bf16.msra.mxu0 %v5817_v31  ;;  %4674 = vmatprep.mubr.msk.f32.mxu0 %vm5312_vm0, %v5311_v1  ;;  %v3384_v7 = vpop.permute.xlu1 %3383 }
0x26e3   :  { %4882 = vmatprep.subr.bf16.mxu0 %v5310_v0  ;;  %4642 = vmatmul.mubr.msk.f32.vlgmr.msra.gmra.mrb[30].mxu1 %vm207_vm3, %v3384_v7 }
0x26e4   :  { %4875 = vmatpush3.bf16.msra.mxu1 %v5803_v38  ;;  %4663 = vmatprep.mubr.msk.f32.mxu1 %vm5312_vm0, %v5311_v1  ;;  %vm1918_vm0 = vcmask 254976  }
0x26e5   :  { %4876 = vmatprep.subr.bf16.mxu1 %v5310_v0 }
0x26e6   :  { %4884 = vmatpush3.bf16.msra.mxu0 %v5828_v36 }
0x26e8   :  { %4878 = vmatpush3.bf16.msra.mxu1 %v5813_v22 }
0x27b4   :  { %v3533_v31 = vpop.f32.mrb[34].mxu0 }
0x27b5   :  { %v3538_v11 = vrot.slane %v3533_v31, 6  ;;  %v4654_v15 = vpop.f32.mrb[35].mxu0 }
0x27b6   :  { %v3453_v18 = vpop.f32.mrb[30].mxu1 }
0x27b7   :  { %v3540_v37 = vadd.f32 %v3538_v11, %v5886_v21  ;;  %v3458_v49 = vrot.slane %v3453_v18, 4  ;;  %v4643_v26 = vpop.f32.mrb[31].mxu1 }
0x27b9   :  { %5127 = vtanh.f32 %v3540_v37  ;;  %v3460_v38 = vadd.f32 %v3458_v49, %v5889_v28  ;;  %v4158_v0 = vmul.f32 -1.442695, %v3540_v37 }
0x27bb   :  { %5129 = vtanh.f32 %v3460_v38  ;;  %v4157_v22 = vmul.f32 -1.442695, %v3460_v38 }
0x27bc   :  { %5131 = vpow2.f32 %v4158_v0 }
0x27bd   :  { %5133 = vpow2.f32 %v4157_v22 }
0x27c3   :  { %v5128_v58 = vpop.eup %5127 }
0x27c4   :  { %3580 = vrot.lane.b32.xlu0 %v5128_v58, %s5314_s3 }
0x27c5   :  { %v5130_v1 = vpop.eup %5129 }
0x27c6   :  { %3553 = vrot.lane.b32.xlu1 %v5130_v1, %s5314_s3  ;;  %v5132_v36 = vpop.eup %5131 }
0x27c7   :  { %v5134_v23 = vpop.eup %5133  ;;  %v3571_v24 = vadd.f32 1.0, %v5132_v36 }
0x27c8   :  { %v3544_v9 = vadd.f32 1.0, %v5134_v23 }
0x27c9   :  { %5135 = vrcp.f32 %v3571_v24 }
0x27ca   :  { %5137 = vrcp.f32 %v3544_v9 }
0x27d3   :  { %v5136_v34 = vpop.eup %5135 }
0x27d4   :  { %v5138_v6 = vpop.eup %5137  ;;  %v3578_v45 = vmul.f32 %v5136_v34, %v3576_v44 }
0x27d5   :  { %v3551_v53 = vmul.f32 %v5138_v6, %v3549_v46 }
0x2836   :  { %v3581_v35 = vpop.permute.xlu0 %3580 }
0x2837   :  { %v3583_v30 = vmul.f32 %v5136_v34, %v3581_v35 }
0x2838   :  { %v3554_v19 = vpop.permute.xlu1 %3553 }
0x2839   :  { %3585 = vrot.lane.b32.xlu0 %v3583_v30, %s5313_s29  ;;  %v3556_v42 = vmul.f32 %v5138_v6, %v3554_v19 }
0x283b   :  { %3558 = vrot.lane.b32.xlu1 %v3556_v42, %s5313_s29 }
0x28ab   :  { %v3586_v47 = vpop.permute.xlu0 %3585 }
0x28ac   :  { %v3588_v50 = vadd.f32 %v3586_v47, %v3578_v45 }
0x28ad   :  { %v3559_v55 = vpop.permute.xlu1 %3558 }
0x28ae   :  { %5139 = vtanh.f32 %v3588_v50  ;;  %v3561_v56 = vadd.f32 %v3559_v55, %v3551_v53  ;;  %v3787_v36 = vrot.slane %v3588_v50, 2 }
0x28b0   :  { %5141 = vtanh.f32 %v3561_v56 }
0x28b8   :  { %v5140_v13 = vpop.eup %5139 }
0x28b9   :  { %3591 = vrot.lane.b32.xlu0 %v5140_v13, %s5314_s3 }
0x28ba   :  { %v5142_v57 = vpop.eup %5141 }
0x28bb   :  { %3564 = vrot.lane.b32.xlu1 %v5142_v57, %s5314_s3 }
0x292b   :  { %v3592_v59 = vpop.permute.xlu0 %3591 }
0x292c   :  { %v3594_v60 = vmul.f32 %v5136_v34, %v3592_v59  ;;  %v3760_v34 = vrot.slane %v3561_v56, 6 }
0x292d   :  { %v3565_v41 = vpop.permute.xlu1 %3564 }
0x292e   :  { %v3676_v62 = vrot.slane %v3594_v60, 2  ;;  %v3567_v63 = vmul.f32 %v5138_v6, %v3565_v41 }
0x2930   :  { %3677 = vrot.lane.b32.xlu0 %v3676_v62, %s5313_s29  ;;  %v3596_v29 = vrot.slane %v3567_v63, 4 }
0x2932   :  { %3597 = vrot.lane.b32.xlu1 %v3596_v29, %s5313_s29 }
0x29a2   :  { %v3678_v16 = vpop.permute.xlu0 %3677 }
0x29a3   :  { %4675 = vmatmul.mubr.msk.f32.vlgmr.msra.gmra.mrb[36].mxu0 %vm207_vm3, %v3678_v16 }
0x29a4   :  { %v3598_v61 = vpop.permute.xlu1 %3597 }
0x29a5   :  { %4664 = vmatmul.mubr.msk.f32.vlgmr.msra.gmra.mrb[32].mxu1 %vm207_vm3, %v3598_v61 }
0x2a76   :  { %v3747_v3 = vpop.f32.mrb[36].mxu0 }
0x2a77   :  { %v3751_v25 = vadd.f32 %v3747_v3, %v5886_v21  ;;  %v4676_v4 = vpop.f32.mrb[37].mxu0 }
0x2a78   :  { %v3667_v20 = vpop.f32.mrb[32].mxu1 }
0x2a79   :  { %5143 = vtanh.f32 %v3751_v25  ;;  %v3672_v32 = vrot.slane %v3667_v20, 2  ;;  %v4665_v8 = vpop.f32.mrb[33].mxu1  ;;  %v4162_v15 = vmul.f32 -1.442695, %v3751_v25 }
0x2a7b   :  { %v3674_v7 = vadd.f32 %v3672_v32, %v5889_v28 }
0x2a7d   :  { %5145 = vtanh.f32 %v3674_v7  ;;  %v4161_v37 = vmul.f32 -1.442695, %v3674_v7 }
0x2a7e   :  { %5147 = vpow2.f32 %v4162_v15 }
0x2a7f   :  { %5149 = vpow2.f32 %v4161_v37 }
0x2a83   :  { %v5144_v31 = vpop.eup %5143 }
0x2a84   :  { %3791 = vrot.lane.b32.xlu0 %v5144_v31, %s5314_s3 }
0x2a87   :  { %v5146_v11 = vpop.eup %5145 }
0x2a88   :  { %3764 = vrot.lane.b32.xlu1 %v5146_v11, %s5314_s3  ;;  %v5148_v18 = vpop.eup %5147 }
0x2a89   :  { %v3782_v21 = vadd.f32 1.0, %v5148_v18  ;;  %v5150_v49 = vpop.eup %5149 }
0x2a8a   :  { %v3755_v26 = vadd.f32 1.0, %v5150_v49 }
0x2a8b   :  { %5151 = vrcp.f32 %v3782_v21 }
0x2a8c   :  { %5153 = vrcp.f32 %v3755_v26 }
0x2a95   :  { %v5152_v38 = vpop.eup %5151 }
0x2a96   :  { %v5154_v1 = vpop.eup %5153  ;;  %v3789_v23 = vmul.f32 %v5152_v38, %v3787_v36 }
0x2a97   :  { %v3762_v35 = vmul.f32 %v5154_v1, %v3760_v34 }
0x2af6   :  { %v3792_v58 = vpop.permute.xlu0 %3791 }
0x2af7   :  { %v3794_v28 = vmul.f32 %v5152_v38, %v3792_v58 }
0x2af9   :  { %3796 = vrot.lane.b32.xlu0 %v3794_v28, %s5313_s29 }
0x2afa   :  { %v3765_v0 = vpop.permute.xlu1 %3764 }
0x2afb   :  { %v3767_v22 = vmul.f32 %v5154_v1, %v3765_v0 }
0x2afd   :  { %3769 = vrot.lane.b32.xlu1 %v3767_v22, %s5313_s29 }
0x2b6b   :  { %v3797_v24 = vpop.permute.xlu0 %3796 }
0x2b6c   :  { %v6144_v9 = vadd.f32 %v3797_v24, %v3789_v23 }
0x2b6e   :  { %5155 = vtanh.f32 %v6144_v9 }
0x2b6f   :  { %v3770_v30 = vpop.permute.xlu1 %3769 }
0x2b70   :  { %v6147_v6 = vadd.f32 %v3770_v30, %v3762_v35 }
0x2b72   :  { %5157 = vtanh.f32 %v6147_v6 }
0x2b78   :  { %v5156_v19 = vpop.eup %5155 }
0x2b79   :  { %3802 = vrot.lane.b32.xlu0 %v5156_v19, %s5314_s3 }
0x2b7c   :  { %v5158_v42 = vpop.eup %5157 }
0x2b7d   :  { %3835 = vrot.lane.b32.xlu0 %v5955_v12, %s5313_s29  ;;  %3775 = vrot.lane.b32.xlu1 %v5158_v42, %s5314_s3 }
0x2b81   :  { %3842 = vrot.lane.b32.xlu0 %v5993_v43, %s5313_s29  ;;  %3838 = vrot.lane.b32.xlu1 %v3594_v60, %s5314_s3 }
0x2b85   :  { %3852 = vrot.lane.b32.xlu0 %v6066_v40, %s5314_s3  ;;  %3845 = vrot.lane.b32.xlu1 %v6104_v17, %s5314_s3 }
0x2b89   :  { %3864 = vrot.lane.b32.xlu0 %v5990_v33, %s5314_s3  ;;  %3849 = vrot.lane.b32.xlu1 %v6032_v27, %s5313_s29 }
0x2b8d   :  { %3868 = vrot.lane.b32.xlu0 %v3567_v63, %s5313_s29  ;;  %3861 = vrot.lane.b32.xlu1 %v6107_v5, %s5313_s29 }
0x2b91   :  { %3857 = vrot.lane.b32.xlu1 %v6028_v10, %s5314_s3 }
0x2b95   :  { %3871 = vrot.lane.b32.xlu1 %v5952_v51, %s5314_s3  ;;  %v6182_v51 = vld [vmem:[%s6308_s7] ss:$0 sm:$0xff]  ;;  %s5315_s7 = smov 96  }
0x2b99   :  { %3875 = vrot.lane.b32.xlu1 %v5914_v2, %s5314_s3 }
0x2beb   :  { %v3803_v12 = vpop.permute.xlu0 %3802 }
0x2bec   :  { %v3805_v43 = vmul.f32 %v5152_v38, %v3803_v12 }
0x2bee   :  { %3831 = vrot.lane.b32.xlu0 %v3805_v43, %s5314_s3 }
0x2bef   :  { %v3836_v33 = vpop.permute.xlu0 %3835  ;;  %v3776_v27 = vpop.permute.xlu1 %3775 }
0x2bf0   :  { %v3778_v40 = vmul.f32 %v5154_v1, %v3776_v27 }
0x2bf2   :  { %3807 = vrot.lane.b32.xlu0 %v3778_v40, %s5313_s29 }
0x2bf3   :  { %v3843_v17 = vpop.permute.xlu0 %3842  ;;  %v3839_v5 = vpop.permute.xlu1 %3838 }
0x2bf4   :  { %v3841_v41 = vsel %vm207_vm3, %v3836_v33, %v3839_v5 }
0x2bf5   :  { %v3951_v16 = vmul.f32 %v6182_v51, %v3841_v41  ;;  %v3880_v7 = vrot.slane %v3841_v41, 1  ;;  %v3915_v31 = vrot.slane %v3841_v41, 2 }
0x2bf7   :  { %v3846_v44 = vpop.permute.xlu1 %3845  ;;  %v3853_v2 = vpop.permute.xlu0 %3852  ;;  %v3953_v3 = vsel %vm3952_vm9, %v3951_v16, 0.0 }
0x2bf8   :  { %v6177_v10 = vsel %vm207_vm3, %v3843_v17, %v3846_v44 }
0x2bf9   :  { %v3957_v45 = vmul.f32 %v6182_v51, %v6177_v10  ;;  %v3883_v11 = vrot.slane %v6177_v10, 2  ;;  %v3917_v15 = vrot.slane %v6177_v10, 3 }
0x2bfb   :  { %v3850_v46 = vpop.permute.xlu1 %3849  ;;  %v3959_v47 = vsel %vm3958_vm8, %v3957_v45, 0.0  ;;  %v3865_v50 = vpop.permute.xlu0 %3864 }
0x2bfc   :  { %3960 = vadd.xlane.f32.xlu1 %v3959_v47  ;;  %v3855_v61 = vsel %vm207_vm3, %v3850_v46, %v3853_v2 }
0x2bfd   :  { %v3963_v25 = vmul.f32 %v6182_v51, %v3855_v61  ;;  %v3886_v18 = vrot.slane %v3855_v61, 3  ;;  %v3919_v26 = vrot.slane %v3855_v61, 4 }
0x2bff   :  { %v3862_v53 = vpop.permute.xlu1 %3861  ;;  %v3869_v59 = vpop.permute.xlu0 %3868  ;;  %v3965_v20 = vsel %vm3964_vm10, %v3963_v25, 0.0 }
0x2c00   :  { %v6188_v55 = vsel %vm207_vm3, %v3862_v53, %v3865_v50 }
0x2c01   :  { %v3974_v56 = vmul.f32 %v6182_v51, %v6188_v55  ;;  %v3892_v38 = vrot.slane %v6188_v55, 5  ;;  %v3923_v1 = vrot.slane %v6188_v55, 6 }
0x2c03   :  { %v3858_v13 = vpop.permute.xlu1 %3857  ;;  %v3975_v57 = vsel %vm3952_vm9, %v3974_v56, 0.0 }
0x2c04   :  { %3976 = vadd.xlane.f32.xlu1 %v3975_v57  ;;  %v3860_v4 = vsel %vm207_vm3, %v6075_v14, %v3858_v13 }
0x2c05   :  { %v3969_v32 = vmul.f32 %v6182_v51, %v3860_v4  ;;  %v3889_v58 = vrot.slane %v3860_v4, 4  ;;  %v3921_v36 = vrot.slane %v3860_v4, 5 }
0x2c07   :  { %v3872_v60 = vpop.permute.xlu1 %3871  ;;  %v3970_v8 = vsel %vm3945_vm11, %v3969_v32, 0.0 }
0x2c08   :  { %v3874_v62 = vsel %vm207_vm3, %v3869_v59, %v3872_v60 }
0x2c09   :  { %v3979_v63 = vmul.f32 %v6182_v51, %v3874_v62  ;;  %v3895_v23 = vrot.slane %v3874_v62, 6  ;;  %v3925_v19 = vrot.slane %v3874_v62, 7 }
0x2c0b   :  { %v3980_v29 = vsel %vm3958_vm8, %v3979_v63, 0.0  ;;  %v3876_v24 = vpop.permute.xlu1 %3875  ;;  %vm4018_vm8 = vcmask 56320  }
0x2c0c   :  { %3981 = vadd.xlane.f32.xlu1 %v3980_v29 }
0x2c11   :  { %3954 = vadd.xlane.f32.xlu0 %v3953_v3 }
0x2c15   :  { %3966 = vadd.xlane.f32.xlu0 %v3965_v20 }
0x2c19   :  { %3971 = vadd.xlane.f32.xlu0 %v3970_v8 }
0x2c1d   :  { %3819 = vrot.lane.b32.xlu1 %v3805_v43, %s5313_s29 }
0x2c21   :  { %1909 = vrot.lane.b32.xlu1 %v5783_v54, %s5315_s7 }
0x2c60   :  { %v3832_v14 = vpop.permute.xlu0 %3831 }
0x2c61   :  { %v3834_v37 = vsel %vm207_vm3, %v5920_v52, %v3832_v14 }
0x2c62   :  { %v3901_v21 = vsel %vm3900_vm12, %v3834_v37, %v3880_v7  ;;  %v3913_v49 = vrot.slane %v3834_v37, 1  ;;  %v3944_v54 = vmul.f32 %v6182_v51, %v3834_v37 }
0x2c63   :  { %v3902_v28 = vsel %vm1975_vm4, %v3901_v21, %v3883_v11 }
0x2c64   :  { %v3904_v0 = vsel %vm3903_vm13, %v3902_v28, %v3886_v18  ;;  %v3927_v22 = vsel %vm3900_vm12, %v3913_v49, %v3915_v31  ;;  %v3946_v52 = vsel %vm3945_vm11, %v3944_v54, 0.0  ;;  %v3808_v30 = vpop.permute.xlu0 %3807 }
0x2c65   :  { %v3905_v34 = vsel %vm110_vm1, %v3904_v0, %v3889_v58  ;;  %v3928_v35 = vsel %vm1975_vm4, %v3927_v22, %v3917_v15  ;;  %3947 = vadd.xlane.f32.xlu0 %v3946_v52  ;;  %3811 = vst.msk [vmem:[#allocation10 - $0x2] sm:$0xc0] %vm1906_vm7, %v3808_v30  ;;  %v3878_v42 = vsel %vm207_vm3, %v3808_v30, %v3876_v24  ;;  %vm4009_vm3 = vcmask 15360  }
0x2c66   :  { %v3929_v12 = vsel %vm3903_vm13, %v3928_v35, %v3919_v26  ;;  %v3907_v43 = vsel %vm3906_vm14, %v3905_v34, %v3892_v38  ;;  %v3898_v33 = vrot.slane %v3878_v42, 7  ;;  %v3984_v40 = vmul.f32 %v6182_v51, %v3878_v42 }
0x2c67   :  { %v3930_v27 = vsel %vm110_vm1, %v3929_v12, %v3921_v36  ;;  %v3908_v17 = vsel %vm1978_vm5, %v3907_v43, %v3895_v23  ;;  %vm4007_vm1 = vcmask 7168   ;;  %vm4011_vm4 = vcmask 23552  }
0x2c68   :  { %v3931_v5 = vsel %vm3906_vm14, %v3930_v27, %v3923_v1  ;;  %v3985_v10 = vsel %vm3964_vm10, %v3984_v40, 0.0  ;;  %v3910_v2 = vsel %vm3909_vm15, %v3908_v17, %v3898_v33 }
0x2c69   :  { %v3932_v44 = vsel %vm1978_vm5, %v3931_v5, %v3925_v19  ;;  %3986 = vadd.xlane.f32.xlu0 %v3985_v10  ;;  %3911 = vst.msk [vmem:[#allocation9] sm:$0xff] %vm2011_vm6, %v3910_v2  ;;  %vm4014_vm5 = vcmask 39936  }
0x2c6a   :  { %v3933_v45 = vsel %vm3909_vm15, %v3932_v44, %v3878_v42 }
0x2c6b   :  { %3935 = vst.msk [vmem:[#allocation9 + $0x8] sm:$0xff] %vm2011_vm6, %v3933_v45  ;;  %vm4016_vm6 = vcmask 48128  }
0x2c7f   :  { %1914 = vrot.lane.b32.xlu0 %v5836_v39, %s5313_s29  ;;  %v3949_v39 = vstv %s6309_s8  ;;  %s5316_s8 = smov [#allocation10]  }
0x2c80   :  { %s4053_s27 = sshll.u32 %s5316_s8, 4  ;;  %s4054_s27 = int_to_ptr.vmem [resolvable:$true] %s4053_s27 }
0x2c81   :  { %s5229_s0 = scalar_lea.vmem %s4054_s27, 128  ;;  %p5234_p11 = scmp.lt.s32.totalorder %s4054_s27, %s4054_s27 }
0x2c82   :  { %p5230_p10 = scmp.ne.s32.totalorder %s4054_s27, %s5229_s0  ;;  %p5235_p12 = scmp.lt.s32.totalorder %s5229_s0, %s5229_s0 }
0x2c83   :  { %1921 = vrot.lane.b32.xlu0 %v5779_v48, %s5315_s7 }
0x2c84   :  { %p5236_p13 = por %p5235_p12, %p5234_p11 }
0x2c86   :  { %p5237_p0 = pnand %p5236_p13, %p5230_p10 }
0x2c87   :  { %3825 = vrot.lane.b32.xlu0 %v6144_v9, %s5315_s7 }
0x2c89   :  { %v3961_v51 = vpop.xlane.xlu1 %3960 }
0x2c8a   :  { %v3962_v57 = vadd.f32 %v3961_v51, %v3949_v39 }
0x2c8c   :  { %v3993_v63 = vrot.slane %v3962_v57, 4 }
0x2c91   :  { %v3977_v46 = vpop.xlane.xlu1 %3976 }
0x2c92   :  { %v3978_v60 = vadd.f32 %v3977_v46, %v3949_v39 }
0x2c94   :  { %v3999_v4 = vrot.slane %v3978_v60, 2 }
0x2c99   :  { %v3982_v47 = vpop.xlane.xlu1 %3981 }
0x2c9a   :  { %v3983_v29 = vadd.f32 %v3982_v47, %v3949_v39 }
0x2c9c   :  { %v4002_v8 = vrot.slane %v3983_v29, 4 }
0x2c9d   :  { %v3820_v50 = vpop.permute.xlu1 %3819 }
0x2c9e   :  { %3823 = vst.msk [vmem:[#allocation10 + $0x6] sm:$0x3] %vm1918_vm0, %v3820_v50  ;;  %v3955_v55 = vpop.xlane.xlu0 %3954 }
0x2c9f   :  { %v3956_v13 = vadd.f32 %v3955_v55, %v3949_v39 }
0x2ca1   :  { %v1910_v53 = vpop.permute.xlu1 %1909  ;;  %v3990_v62 = vrot.slane %v3956_v13, 2 }
0x2ca2   :  { %1912 = vst.msk [vmem:[#allocation12 - $0x6] sm:$0xc0] %vm1906_vm7, %v1910_v53  ;;  %v3967_v56 = vpop.xlane.xlu0 %3966 }
0x2ca3   :  { %v3968_v9 = vadd.f32 %v3967_v56, %v3949_v39 }
0x2ca5   :  { %v3996_v16 = vrot.slane %v3968_v9, 6 }
0x2ca6   :  { %v3972_v48 = vpop.xlane.xlu0 %3971 }
0x2ca7   :  { %v3973_v3 = vadd.f32 %v3972_v48, %v3949_v39 }
0x2cf2   :  { %v3948_v59 = vpop.xlane.xlu0 %3947 }
0x2cf3   :  { %v3950_v41 = vadd.f32 %v3949_v39, %v3948_v59 }
0x2cf5   :  { %v4008_v61 = vsel %vm4007_vm1, %v3950_v41, %v3990_v62 }
0x2cf6   :  { %v4010_v25 = vsel %vm4009_vm3, %v4008_v61, %v3993_v63  ;;  %v3987_v32 = vpop.xlane.xlu0 %3986 }
0x2cf7   :  { %v4012_v20 = vsel %vm4011_vm4, %v4010_v25, %v3996_v16  ;;  %v3988_v14 = vadd.f32 %v3987_v32, %v3949_v39 }
0x2cf8   :  { %v4013_v7 = vsel %vm103_vm2, %v4012_v20, %v3973_v3  ;;  %vm4026_vm2 = vcmask 58368  }
0x2cf9   :  { %v4015_v31 = vsel %vm4014_vm5, %v4013_v7, %v3999_v4  ;;  %v4005_v11 = vrot.slane %v3988_v14, 6 }
0x2cfa   :  { %v4017_v15 = vsel %vm4016_vm6, %v4015_v31, %v4002_v8  ;;  %v1915_v37 = vpop.permute.xlu0 %1914 }
0x2cfb   :  { %v4019_v18 = vsel %vm4018_vm8, %v4017_v15, %v4005_v11  ;;  %1919 = vst.msk [vmem:[#allocation10 + $0x2] sm:$0x3] %vm1918_vm0, %v1915_v37 }
0x2cfc   :  { %v4164_v21 = vmul.f32 -1.442695, %v4019_v18 }
0x2cfe   :  { %5159 = vpow2.f32 %v4164_v21  ;;  %v1922_v49 = vpop.permute.xlu0 %1921 }
0x2cff   :  { %1925 = vst.msk [vmem:[#allocation12 + $0x2] sm:$0x3] %vm1918_vm0, %v1922_v49 }
0x2d02   :  { %v3826_v54 = vpop.permute.xlu0 %3825 }
0x2d03   :  { %3829 = vst.msk [vmem:[#allocation12 + $0x6] sm:$0x3] %vm1918_vm0, %v3826_v54 }
0x2d08   :  { %v5160_v26 = vpop.eup %5159 }
0x2d09   :  { %v4023_v38 = vadd.f32 1.0, %v5160_v26 }
0x2d0b   :  { %5161 = vrcp.f32 %v4023_v38 }
0x2d15   :  { %v5162_v58 = vpop.eup %5161 }
0x2d16   :  { %v4027_v28 = vsel %vm4026_vm2, %v5162_v58, 0.0 }
0x2d17   :  { %4028 = vadd.xlane.f32.xlu1 %v4027_v28 }
0x2d28   :  { %3813 = vrot.lane.b32.xlu1 %v6147_v6, %s5315_s7 }
0x2d29   :  { %5240 = shalt.err (!%p5237_p0)
}
0x2d2a   :  { %s5241_s17 = scalar_lea.hbm %s6314_s13, 128 }
0x2d2b   :  { %p5242_p1 = scmp.ne.s32.totalorder %s6314_s13, %s5241_s17  ;;  %p5245_p2 = scmp.lt.u32.totalorder %s5241_s17, %s6314_s13 }
0x2d2d   :  { %p5247_p3 = pnand %p5245_p2, %p5242_p1 }
0x2d2f   :  { %5250 = shalt.err (!%p5247_p3)
}
0x2d30   :  { %s5317_s28 = smov 2   ;;  %s5318_s9 = smov [#allocation9]  }
0x2d31   :  { %4059 = dma.vmem_to_hbm [thread:$0]  %s4054_s27, 128, %s6314_s13, [#allocation11], %s5313_s29, %s5313_s29, %s5317_s28  }
0x2d32   :  { %s4041_s5 = sshll.u32 %s5318_s9, 4  ;;  %s4042_s5 = int_to_ptr.vmem [resolvable:$true] %s4041_s5 }
0x2d33   :  { %s5251_s6 = scalar_lea.vmem %s4042_s5, 256  ;;  %p5256_p5 = scmp.lt.s32.totalorder %s4042_s5, %s4042_s5 }
0x2d34   :  { %p5252_p4 = scmp.ne.s32.totalorder %s4042_s5, %s5251_s6  ;;  %p5257_p6 = scmp.lt.s32.totalorder %s5251_s6, %s5251_s6 }
0x2d36   :  { %p5258_p7 = por %p5257_p6, %p5256_p5 }
0x2d38   :  { %p5259_p8 = pnand %p5258_p7, %p5252_p4 }
0x2d3a   :  { %5262 = shalt.err (!%p5259_p8)
}
0x2d3b   :  { %s5263_s23 = scalar_lea.hbm %s6313_s12, 256 }
0x2d3c   :  { %p5264_p9 = scmp.ne.s32.totalorder %s6313_s12, %s5263_s23  ;;  %p5267_p10 = scmp.lt.u32.totalorder %s5263_s23, %s6313_s12 }
0x2d3e   :  { %p5269_p11 = pnand %p5267_p10, %p5264_p9 }
0x2d40   :  { %5272 = shalt.err (!%p5269_p11)
}
0x2d41   :  { %4047 = dma.vmem_to_hbm [thread:$0]  %s4042_s5, 256, %s6313_s12, [#allocation5], %s5307_s4, %s5307_s4, %s5308_s30   ;;  %vm4032_vm9 = vcmask 1024  }
0x2d42   :  { %s5319_s8 = smov [#allocation12]  }
0x2d43   :  { %s4065_s27 = sshll.u32 %s5319_s8, 4  ;;  %s4066_s27 = int_to_ptr.vmem [resolvable:$true] %s4065_s27 }
0x2d44   :  { %s5273_s16 = scalar_lea.vmem %s4066_s27, 128  ;;  %p5278_p13 = scmp.lt.s32.totalorder %s4066_s27, %s4066_s27 }
0x2d45   :  { %p5274_p12 = scmp.ne.s32.totalorder %s4066_s27, %s5273_s16  ;;  %p5279_p0 = scmp.lt.s32.totalorder %s5273_s16, %s5273_s16 }
0x2d47   :  { %p5280_p1 = por %p5279_p0, %p5278_p13 }
0x2d49   :  { %p5281_p2 = pnand %p5280_p1, %p5274_p12 }
0x2da4   :  { %v4029_v6 = vpop.xlane.xlu1 %4028 }
0x2da5   :  { %v4031_v1 = vmul.f32 0.125, %v4029_v6 }
0x2da7   :  { %4033 = vst.msk [vmem:[%s6312_s11] sm:$0x3] %vm4032_vm9, %v4031_v1 }
0x2da8   :  { %v3814_v0 = vpop.permute.xlu1 %3813 }
0x2da9   :  { %3817 = vst.msk [vmem:[#allocation12 - $0x2] sm:$0xc0] %vm1906_vm7, %v3814_v0 }
0x2daa   :  { %5284 = shalt.err (!%p5281_p2)
}
0x2dab   :  { %s5285_s30 = scalar_lea.hbm %s6315_s14, 128 }
0x2dac   :  { %p5286_p3 = scmp.ne.s32.totalorder %s6315_s14, %s5285_s30  ;;  %p5289_p4 = scmp.lt.u32.totalorder %s5285_s30, %s6315_s14 }
0x2dae   :  { %p5291_p5 = pnand %p5289_p4, %p5286_p3 }
0x2db0   :  { %5294 = shalt.err (!%p5291_p5)
}
0x2db1   :  { %4071 = dma.vmem_to_hbm [thread:$0]  %s4066_s27, 128, %s6315_s14, [#allocation11], %s5313_s29, %s5313_s29, %s5317_s28  }
0x2db2   :  { %5299 = dma.done.wait [#allocation5], 256  }
0x2db3   :  { %5300 = vsyncadd [#allocation5], 4294967040 }
0x2db4   :  { %5301 = dma.done.wait [#allocation11], 256  }
0x2db5   :  { %5302 = vsyncadd [#allocation11], 4294967040 }
0x2db6   :  { %4083 = vsyncpa [#allocation4], 1 }
0x2db7   :  { %4084 = vsyncpa [#allocation7], 1 }
0x2db8   :  { %4085 = vsyncpa [#allocation5], 1 }
0x2db9   :  { %4086 = vsyncpa [#allocation11], 1 }

</bundles_post_ra>
